<compile_context>
chip_gen: v7x
topology: tpu7x:2x2x1
jax: 0.10.0
libtpu: 0.0.40
codegen_flags: <defaults>
</compile_context>

<pallas_src>
import functools

import jax
import jax.numpy as jnp
from jax.experimental import pallas as pl
from jax.experimental.pallas import tpu as pltpu


# ----------------------------------------------------------------------------
# Kernel
# ----------------------------------------------------------------------------
def _upsample_conv_kernel(xp_ref, w_ref, b_ref, o_ref, slab_ref, *,
                          ksize, out_h, out_w):
    """One padded sample -> conv output via a single fused MXU matmul.

    xp_ref  : (C_in, Hp, Wp)            reflect-padded, upsampled sample (bf16)
    w_ref   : (C_out, K*K*C_in)         bf16 weights, rows ordered (ky, kx, c_in)
    b_ref   : (C_out, 1)                f32 bias
    o_ref   : (C_out, H_out*W_out)      lane-dense output block
    slab_ref: (K*K*C_in, H_out*W_out)   bf16 im2col scratch (VMEM)
    """
    c_in = xp_ref.shape[0]
    hw = out_h * out_w

    # im2col: each (ky, kx) tap is a shifted (C_in, H_out, W_out) window of the
    # padded sample; flatten it lane-dense into the bf16 slab (pure copy, the
    # input is already bf16).
    for ky in range(ksize):
        for kx in range(ksize):
            k = ky * ksize + kx
            patch = xp_ref[:, ky:ky + out_h, kx:kx + out_w]
            slab_ref[pl.ds(k * c_in, c_in), :] = patch.reshape(c_in, hw)

    # Single (C_out, K*K*C_in) @ (K*K*C_in, HW) matmul: bf16 in, f32 accumulate.
    acc = jnp.dot(w_ref[...], slab_ref[...],
                  preferred_element_type=jnp.float32)
    acc = acc + b_ref[...]                       # (C_out, 1) broadcast over lanes
    o_ref[...] = acc.astype(o_ref.dtype)


# ----------------------------------------------------------------------------
# Wrapper
# ----------------------------------------------------------------------------
@functools.partial(jax.jit, static_argnames=("stride", "upsample"))
def upsample_conv(x, w, b, *, stride=1, upsample=None):
    """UpsampleConvLayer forward.  x: (N, C_in, H, W) NCHW; w: (C_out, C_in, K, K)."""
    if stride != 1:
        # TODO(synk): strided output extraction not implemented in-kernel; the
        # layer is only used with stride=1 in transformer_net.
        raise NotImplementedError("stride != 1 is not supported")

    n, c_in, h, wdt = x.shape
    c_out, c_in_w, ksize, ksize2 = w.shape
    assert c_in_w == c_in and ksize == ksize2

    # 1) nearest-neighbour upsample (== F.interpolate(mode='nearest')).
    if upsample:
        x = jnp.repeat(jnp.repeat(x, upsample, axis=2), upsample, axis=3)
        h, wdt = h * upsample, wdt * upsample

    # 2) ReflectionPad2d(floor(K/2)) + one-time bf16 cast, outside the kernel.
    pad = ksize // 2
    xp = jnp.pad(x, ((0, 0), (0, 0), (pad, pad), (pad, pad)), mode="reflect")
    xp = xp.astype(jnp.bfloat16)
    hp, wp = h + 2 * pad, wdt + 2 * pad
    out_h = (hp - ksize) // stride + 1
    out_w = (wp - ksize) // stride + 1
    hw = out_h * out_w

    # 3) weights flattened tap-major to (C_out, K*K*C_in), cast to bf16 once.
    w_flat = jnp.transpose(w, (0, 2, 3, 1)).reshape(c_out, ksize * ksize * c_in)
    w_flat = w_flat.astype(jnp.bfloat16)
    b2d = b.astype(jnp.float32).reshape(c_out, 1)

    kernel = functools.partial(_upsample_conv_kernel,
                               ksize=ksize, out_h=out_h, out_w=out_w)

    # VMEM budget: double-buffered in/out blocks + im2col slab + params.
    in_bytes = c_in * hp * wp * 2                      # bf16 padded sample
    out_bytes = c_out * hw * x.dtype.itemsize
    slab_bytes = ksize * ksize * c_in * hw * 2
    fixed_bytes = w_flat.size * 2 + b2d.size * 4
    working_set = 2 * (in_bytes + out_bytes) + slab_bytes + fixed_bytes
    vmem_limit = int(min(max(2 * working_set, 32 << 20), 48 << 20))

    out = pl.pallas_call(
        kernel,
        out_shape=jax.ShapeDtypeStruct((n, c_out, hw), x.dtype),
        grid=(n,),
        in_specs=[
            pl.BlockSpec((None, c_in, hp, wp), lambda i: (i, 0, 0, 0)),
            pl.BlockSpec((c_out, ksize * ksize * c_in), lambda i: (0, 0)),
            pl.BlockSpec((c_out, 1), lambda i: (0, 0)),
        ],
        out_specs=pl.BlockSpec((None, c_out, hw), lambda i: (i, 0, 0)),
        scratch_shapes=[pltpu.VMEM((ksize * ksize * c_in, hw), jnp.bfloat16)],
        compiler_params=pltpu.CompilerParams(
            dimension_semantics=("parallel",),
            vmem_limit_bytes=vmem_limit),
    )(xp, w_flat, b2d)

    return out.reshape(n, c_out, out_h, out_w)


# ----------------------------------------------------------------------------
# Pure-JAX reference (for validation)
# ----------------------------------------------------------------------------
def upsample_conv_ref(x, w, b, *, stride=1, upsample=None):
    if upsample:
        x = jnp.repeat(jnp.repeat(x, upsample, axis=2), upsample, axis=3)
    pad = w.shape[2] // 2
    xp = jnp.pad(x, ((0, 0), (0, 0), (pad, pad), (pad, pad)), mode="reflect")
    out = jax.lax.conv_general_dilated(
        xp, w, (stride, stride), "VALID",
        dimension_numbers=("NCHW", "OIHW", "NCHW"),
        precision=jax.lax.Precision.HIGHEST)
    return out + b[None, :, None, None]


# ----------------------------------------------------------------------------
if __name__ == "__main__":
    key = jax.random.PRNGKey(0)
    ks = jax.random.split(key, 3)

    n, c_in, c_out, h, w_sp = 2, 4, 8, 16, 16
    ksize, stride, upsample = 3, 1, 2

    x = jax.random.normal(ks[0], (n, c_in, h, w_sp), jnp.float32)
    w_scale = 1.0 / jnp.sqrt(jnp.float32(c_in * ksize * ksize))
    w = w_scale * jax.random.normal(ks[1], (c_out, c_in, ksize, ksize),
                                    jnp.float32)
    b = 0.05 * jax.random.normal(ks[2], (c_out,), jnp.float32)

    # Path 1: with nearest upsample x2 (the deconv-replacement configuration).
    out_up = jax.block_until_ready(
        upsample_conv(x, w, b, stride=stride, upsample=upsample))
    ref_up = jax.block_until_ready(
        upsample_conv_ref(x, w, b, stride=stride, upsample=upsample))
    assert out_up.shape == (n, c_out, h * upsample, w_sp * upsample)
    assert out_up.dtype == x.dtype
    assert jnp.allclose(out_up, ref_up, atol=3e-2, rtol=3e-2), (
        float(jnp.max(jnp.abs(out_up - ref_up))))

    # Path 2: no upsample (plain reflect-pad conv).
    out_nu = jax.block_until_ready(
        upsample_conv(x, w, b, stride=stride, upsample=None))
    ref_nu = jax.block_until_ready(
        upsample_conv_ref(x, w, b, stride=stride, upsample=None))
    assert out_nu.shape == (n, c_out, h, w_sp)
    assert jnp.allclose(out_nu, ref_nu, atol=3e-2, rtol=3e-2), (
        float(jnp.max(jnp.abs(out_nu - ref_nu))))

    print("KERNEL_OK")
</pallas_src>

<mosaic_0001>
module attributes {stable_mosaic.version = 11 : i64} {
  func.func @_upsample_conv_kernel(%arg0: i32, %arg1: memref<1x4x34x34xbf16, #tpu.memory_space<vmem>>, %arg2: memref<8x36xbf16, #tpu.memory_space<vmem>>, %arg3: memref<8x1xf32, #tpu.memory_space<vmem>>, %arg4: memref<1x8x1024xf32, #tpu.memory_space<vmem>>, %arg5: memref<36x1024xbf16, #tpu.memory_space<vmem>>) attributes {dimension_semantics = [#tpu.dimension_semantics<parallel>], iteration_bounds = array<i64: 2>, scalar_prefetch = 0 : i64, scratch_operands = 1 : i64, tpu.core_type = #tpu.core_type<tc>, window_params = [{transform_indices = @transform_0, window_bounds = array<i64: 1, 4, 34, 34>}, {pipeline_mode = #tpu.pipeline_mode<synchronous>, transform_indices = @transform_1, window_bounds = array<i64: 8, 36>}, {pipeline_mode = #tpu.pipeline_mode<synchronous>, transform_indices = @transform_2, window_bounds = array<i64: 8, 1>}, {transform_indices = @transform_3, window_bounds = array<i64: 1, 8, 1024>}]} {
    %c0 = arith.constant 0 : index
    %c0_0 = arith.constant 0 : index
    %c0_1 = arith.constant 0 : index
    %c0_2 = arith.constant 0 : index
    %0 = vector.load %arg1[%c0, %c0_0, %c0_1, %c0_2] : memref<1x4x34x34xbf16, #tpu.memory_space<vmem>>, vector<1x4x32x32xbf16>
    %1 = vector.shape_cast %0 : vector<1x4x32x32xbf16> to vector<4x32x32xbf16>
    %2 = vector.shape_cast %1 : vector<4x32x32xbf16> to vector<4x1024xbf16>
    %c0_3 = arith.constant 0 : index
    %c0_4 = arith.constant 0 : index
    %3 = vector.load %arg5[%c0_3, %c0_4] : memref<36x1024xbf16, #tpu.memory_space<vmem>>, vector<4x1024xbf16>
    tpu.vector_store %arg5[%c0_3, %c0_4], %2 {strides = array<i32>} : memref<36x1024xbf16, #tpu.memory_space<vmem>>, vector<4x1024xbf16>,
    %c0_5 = arith.constant 0 : index
    %c0_6 = arith.constant 0 : index
    %c0_7 = arith.constant 0 : index
    %c1 = arith.constant 1 : index
    %4 = vector.load %arg1[%c0_5, %c0_6, %c0_7, %c1] : memref<1x4x34x34xbf16, #tpu.memory_space<vmem>>, vector<1x4x32x32xbf16>
    %5 = vector.shape_cast %4 : vector<1x4x32x32xbf16> to vector<4x32x32xbf16>
    %6 = vector.shape_cast %5 : vector<4x32x32xbf16> to vector<4x1024xbf16>
    %c4 = arith.constant 4 : index
    %c0_8 = arith.constant 0 : index
    %7 = vector.load %arg5[%c4, %c0_8] : memref<36x1024xbf16, #tpu.memory_space<vmem>>, vector<4x1024xbf16>
    tpu.vector_store %arg5[%c4, %c0_8], %6 {strides = array<i32>} : memref<36x1024xbf16, #tpu.memory_space<vmem>>, vector<4x1024xbf16>,
    %c0_9 = arith.constant 0 : index
    %c0_10 = arith.constant 0 : index
    %c0_11 = arith.constant 0 : index
    %c2 = arith.constant 2 : index
    %8 = vector.load %arg1[%c0_9, %c0_10, %c0_11, %c2] : memref<1x4x34x34xbf16, #tpu.memory_space<vmem>>, vector<1x4x32x32xbf16>
    %9 = vector.shape_cast %8 : vector<1x4x32x32xbf16> to vector<4x32x32xbf16>
    %10 = vector.shape_cast %9 : vector<4x32x32xbf16> to vector<4x1024xbf16>
    %c8 = arith.constant 8 : index
    %c0_12 = arith.constant 0 : index
    %11 = vector.load %arg5[%c8, %c0_12] : memref<36x1024xbf16, #tpu.memory_space<vmem>>, vector<4x1024xbf16>
    tpu.vector_store %arg5[%c8, %c0_12], %10 {strides = array<i32>} : memref<36x1024xbf16, #tpu.memory_space<vmem>>, vector<4x1024xbf16>,
    %c0_13 = arith.constant 0 : index
    %c0_14 = arith.constant 0 : index
    %c1_15 = arith.constant 1 : index
    %c0_16 = arith.constant 0 : index
    %12 = vector.load %arg1[%c0_13, %c0_14, %c1_15, %c0_16] : memref<1x4x34x34xbf16, #tpu.memory_space<vmem>>, vector<1x4x32x32xbf16>
    %13 = vector.shape_cast %12 : vector<1x4x32x32xbf16> to vector<4x32x32xbf16>
    %14 = vector.shape_cast %13 : vector<4x32x32xbf16> to vector<4x1024xbf16>
    %c12 = arith.constant 12 : index
    %c0_17 = arith.constant 0 : index
    %15 = vector.load %arg5[%c12, %c0_17] : memref<36x1024xbf16, #tpu.memory_space<vmem>>, vector<4x1024xbf16>
    tpu.vector_store %arg5[%c12, %c0_17], %14 {strides = array<i32>} : memref<36x1024xbf16, #tpu.memory_space<vmem>>, vector<4x1024xbf16>,
    %c0_18 = arith.constant 0 : index
    %c0_19 = arith.constant 0 : index
    %c1_20 = arith.constant 1 : index
    %c1_21 = arith.constant 1 : index
    %16 = vector.load %arg1[%c0_18, %c0_19, %c1_20, %c1_21] : memref<1x4x34x34xbf16, #tpu.memory_space<vmem>>, vector<1x4x32x32xbf16>
    %17 = vector.shape_cast %16 : vector<1x4x32x32xbf16> to vector<4x32x32xbf16>
    %18 = vector.shape_cast %17 : vector<4x32x32xbf16> to vector<4x1024xbf16>
    %c16 = arith.constant 16 : index
    %c0_22 = arith.constant 0 : index
    %19 = vector.load %arg5[%c16, %c0_22] : memref<36x1024xbf16, #tpu.memory_space<vmem>>, vector<4x1024xbf16>
    tpu.vector_store %arg5[%c16, %c0_22], %18 {strides = array<i32>} : memref<36x1024xbf16, #tpu.memory_space<vmem>>, vector<4x1024xbf16>,
    %c0_23 = arith.constant 0 : index
    %c0_24 = arith.constant 0 : index
    %c1_25 = arith.constant 1 : index
    %c2_26 = arith.constant 2 : index
    %20 = vector.load %arg1[%c0_23, %c0_24, %c1_25, %c2_26] : memref<1x4x34x34xbf16, #tpu.memory_space<vmem>>, vector<1x4x32x32xbf16>
    %21 = vector.shape_cast %20 : vector<1x4x32x32xbf16> to vector<4x32x32xbf16>
    %22 = vector.shape_cast %21 : vector<4x32x32xbf16> to vector<4x1024xbf16>
    %c20 = arith.constant 20 : index
    %c0_27 = arith.constant 0 : index
    %23 = vector.load %arg5[%c20, %c0_27] : memref<36x1024xbf16, #tpu.memory_space<vmem>>, vector<4x1024xbf16>
    tpu.vector_store %arg5[%c20, %c0_27], %22 {strides = array<i32>} : memref<36x1024xbf16, #tpu.memory_space<vmem>>, vector<4x1024xbf16>,
    %c0_28 = arith.constant 0 : index
    %c0_29 = arith.constant 0 : index
    %c2_30 = arith.constant 2 : index
    %c0_31 = arith.constant 0 : index
    %24 = vector.load %arg1[%c0_28, %c0_29, %c2_30, %c0_31] : memref<1x4x34x34xbf16, #tpu.memory_space<vmem>>, vector<1x4x32x32xbf16>
    %25 = vector.shape_cast %24 : vector<1x4x32x32xbf16> to vector<4x32x32xbf16>
    %26 = vector.shape_cast %25 : vector<4x32x32xbf16> to vector<4x1024xbf16>
    %c24 = arith.constant 24 : index
    %c0_32 = arith.constant 0 : index
    %27 = vector.load %arg5[%c24, %c0_32] : memref<36x1024xbf16, #tpu.memory_space<vmem>>, vector<4x1024xbf16>
    tpu.vector_store %arg5[%c24, %c0_32], %26 {strides = array<i32>} : memref<36x1024xbf16, #tpu.memory_space<vmem>>, vector<4x1024xbf16>,
    %c0_33 = arith.constant 0 : index
    %c0_34 = arith.constant 0 : index
    %c2_35 = arith.constant 2 : index
    %c1_36 = arith.constant 1 : index
    %28 = vector.load %arg1[%c0_33, %c0_34, %c2_35, %c1_36] : memref<1x4x34x34xbf16, #tpu.memory_space<vmem>>, vector<1x4x32x32xbf16>
    %29 = vector.shape_cast %28 : vector<1x4x32x32xbf16> to vector<4x32x32xbf16>
    %30 = vector.shape_cast %29 : vector<4x32x32xbf16> to vector<4x1024xbf16>
    %c28 = arith.constant 28 : index
    %c0_37 = arith.constant 0 : index
    %31 = vector.load %arg5[%c28, %c0_37] : memref<36x1024xbf16, #tpu.memory_space<vmem>>, vector<4x1024xbf16>
    tpu.vector_store %arg5[%c28, %c0_37], %30 {strides = array<i32>} : memref<36x1024xbf16, #tpu.memory_space<vmem>>, vector<4x1024xbf16>,
    %c0_38 = arith.constant 0 : index
    %c0_39 = arith.constant 0 : index
    %c2_40 = arith.constant 2 : index
    %c2_41 = arith.constant 2 : index
    %32 = vector.load %arg1[%c0_38, %c0_39, %c2_40, %c2_41] : memref<1x4x34x34xbf16, #tpu.memory_space<vmem>>, vector<1x4x32x32xbf16>
    %33 = vector.shape_cast %32 : vector<1x4x32x32xbf16> to vector<4x32x32xbf16>
    %34 = vector.shape_cast %33 : vector<4x32x32xbf16> to vector<4x1024xbf16>
    %c32 = arith.constant 32 : index
    %c0_42 = arith.constant 0 : index
    %35 = vector.load %arg5[%c32, %c0_42] : memref<36x1024xbf16, #tpu.memory_space<vmem>>, vector<4x1024xbf16>
    tpu.vector_store %arg5[%c32, %c0_42], %34 {strides = array<i32>} : memref<36x1024xbf16, #tpu.memory_space<vmem>>, vector<4x1024xbf16>,
    %c0_43 = arith.constant 0 : index
    %c0_44 = arith.constant 0 : index
    %36 = vector.load %arg2[%c0_43, %c0_44] : memref<8x36xbf16, #tpu.memory_space<vmem>>, vector<8x36xbf16>
    %c0_45 = arith.constant 0 : index
    %c0_46 = arith.constant 0 : index
    %37 = vector.load %arg5[%c0_45, %c0_46] : memref<36x1024xbf16, #tpu.memory_space<vmem>>, vector<36x1024xbf16>
    %cst = arith.constant dense<0.000000e+00> : vector<8x1024xf32>
    %38 = tpu.matmul %36, %37, %cst {dimension_numbers = #tpu.dot_dimension_numbers<[1], [0], [0], [1], [0, 0, 1, 1], [], []>} : vector<8x36xbf16>, vector<36x1024xbf16>, vector<8x1024xf32> -> vector<8x1024xf32>
    %c0_47 = arith.constant 0 : index
    %c0_48 = arith.constant 0 : index
    %39 = vector.load %arg3[%c0_47, %c0_48] : memref<8x1xf32, #tpu.memory_space<vmem>>, vector<8x1xf32>
    %40 = vector.broadcast %39 : vector<8x1xf32> to vector<8x1024xf32>
    %41 = arith.addf %38, %40 : vector<8x1024xf32>
    %c0_49 = arith.constant 0 : index
    %c0_50 = arith.constant 0 : index
    %c0_51 = arith.constant 0 : index
    %42 = vector.load %arg4[%c0_49, %c0_50, %c0_51] : memref<1x8x1024xf32, #tpu.memory_space<vmem>>, vector<1x8x1024xf32>
    %43 = vector.shape_cast %42 : vector<1x8x1024xf32> to vector<8x1024xf32>
    %44 = vector.shape_cast %41 : vector<8x1024xf32> to vector<1x8x1024xf32>
    tpu.vector_store %arg4[%c0_49, %c0_50, %c0_51], %44 {strides = array<i32>} : memref<1x8x1024xf32, #tpu.memory_space<vmem>>, vector<1x8x1024xf32>,
    return
  }
  func.func @transform_0(%arg0: i32) -> (i32, i32, i32, i32) {
    %c0_i32 = arith.constant 0 : i32
    %c0_i32_0 = arith.constant 0 : i32
    %c0_i32_1 = arith.constant 0 : i32
    %c0_i32_2 = arith.constant 0 : i32
    return %arg0, %c0_i32, %c0_i32_0, %c0_i32_1 : i32, i32, i32, i32
  }
  func.func @transform_1(%arg0: i32) -> (i32, i32) {
    %c0_i32 = arith.constant 0 : i32
    %c0_i32_0 = arith.constant 0 : i32
    %c0_i32_1 = arith.constant 0 : i32
    return %c0_i32, %c0_i32_0 : i32, i32
  }
  func.func @transform_2(%arg0: i32) -> (i32, i32) {
    %c0_i32 = arith.constant 0 : i32
    %c0_i32_0 = arith.constant 0 : i32
    %c0_i32_1 = arith.constant 0 : i32
    return %c0_i32, %c0_i32_0 : i32, i32
  }
  func.func @transform_3(%arg0: i32) -> (i32, i32, i32) {
    %c0_i32 = arith.constant 0 : i32
    %c0_i32_0 = arith.constant 0 : i32
    %c0_i32_1 = arith.constant 0 : i32
    return %arg0, %c0_i32, %c0_i32_0 : i32, i32, i32
  }
}

</mosaic_0001>

<bundles_post_ra>
// kernel: upsample_conv.1
= control target key start
LH: loop header
LB: loop body
LE: loop exit
PB: predicated region body
PF: predicated region fallthrough
CT: control target
= control target key end

     0   :  { %s6945_s12 = smov 0   ;;  %s9713_s0 = inlined_call_operand.vmem [shape: bf16[2,4,34,34], index: 0, kind: input, shape index: {}]   ;;  %s9714_s1 = inlined_call_operand.vmem [shape: bf16[8,36], index: 1, kind: input, shape index: {}]   ;;  %s9715_s2 = inlined_call_operand.vmem [shape: f32[8,1], index: 2, kind: input, shape index: {}]   ;;  %s9716_s3 = inlined_call_operand.vmem [shape: f32[2,8,1024], index: 3, kind: output, shape index: {}]  }
   0x1 LB: > { %s6432_s13 = sadd.s32 4294967295, %s6915_s12   ;;  %p6436_p0 = scmp.ge.s32.totalorder %s6915_s12, 1  ;;  %s6915_s12 = sphi %s6945_s12, %s13_s12  }
   0x2   : > { %p137_p1 = scmp.lt.s32.totalorder %s6915_s12, 3 }
   0x4   : > { %p138_p2 = pnand %p6436_p0, %p137_p1 }
   0x6   : > { %141 = sbr.rel (%p138_p2) target bundleno = 1248 (0x4e0), region = 32 }
   0xd   : > { %p161_p3 = scmp.lt.s32.totalorder %s6432_s13, 1  ;;  %v240_v0 = vlaneseq  ;;  %v6917_v1 = vmov 1983009808   ;;  %v6918_v3 = vmov 1934713408   ;;  %s6919_s18 = smov 64  }
   0xe   : > { %v238_v2 = vunpack.c.l.s4 %v6917_v1  ;;  %v255_v4 = vunpack.c.l.s4 %v6918_v3  ;;  %s6920_s19 = smov 96   ;;  %s6921_s20 = smov 32   ;;  %vm628_vm0 = vcmask 261120   ;;  %vm632_vm1 = vcmask 523264  }
   0xf   : > { %s9926_s13 = smov (!%p161_p3, %s6432_s13), 1  ;;  %v241_v5 = vshrl.u32 %v240_v0, 7  ;;  %s6922_s21 = smov 127   ;;  %vm635_vm2 = vcmask 785408   ;;  %vm1915_vm3 = vsmask.f32 3328 }
  0x10   : > { %v239_v6 = vunpack.c.0.s8 %v238_v2  ;;  %s6883_s14 = smul.u32 80, %s9926_s13  ;;  %v256_v7 = vunpack.c.0.s8 %v255_v4  ;;  %s6923_s22 = smov 126   ;;  %vm1916_vm4 = vsmask.f32 7440  ;;  %vm4170_vm6 = vcmask 1042432  }
  0x11   : > { %vm7383_vm5 = vmor %vm1915_vm3, %vm1916_vm4  ;;  %vm4171_vm7 = vcmask 1046532   ;;  %vm6180_vm9 = vcmask 1041408   ;;  %vm6176_vm10 = vcmask 293888   ;;  %s6738_s27 = sshll.u32 %s9926_s13, 6 }
  0x12   : > { %s6959_s17 = scalar_lea.vmem %s9713_s0, %s6883_s14  ;;  %v6961_v8 = vsub.s32 %v239_v6, %v241_v5  ;;  %v6967_v19 = vsub.s32 %v256_v7, %v241_v5  ;;  %vm7800_vm8 = vmor %vm4170_vm6, %vm4171_vm7  ;;  %s9700_s30 = scalar_lea.vmem %s9716_s3, %s6738_s27 }
  0x13   : > { %v173_v9 = vld [vmem:[%s6959_s17 + $0x4] sm:$0xf]  ;;  %v177_v10 = vld [vmem:[%s6959_s17 + $0x18] sm:$0xf]  ;;  %v181_v11 = vld [vmem:[%s6959_s17 + $0x2c] sm:$0xf] }
  0x14   : > { %9783 = vst [vmem:[#allocation3_spill] sm:$0xff] %v6961_v8  ;;  %v185_v12 = vld [vmem:[%s6959_s17 + $0x40] sm:$0xf]  ;;  %v202_v13 = vpack.i.b16 %v177_v10, %v173_v9  ;;  %v203_v14 = vshrl.u32 %v173_v9, 16  ;;  %v204_v15 = vshrl.u32 %v177_v10, 16  ;;  %v209_v17 = vshrl.u32 %v181_v11, 16 }
  0x15   : > { %v208_v16 = vpack.i.b16 %v185_v12, %v181_v11  ;;  %v210_v18 = vshrl.u32 %v185_v12, 16  ;;  %9784 = vst [vmem:[#allocation4_spill] sm:$0xff] %v6967_v19  ;;  %v172_v20 = vld [vmem:[%s6959_s17] sm:$0xf]  ;;  %v176_v21 = vld [vmem:[%s6959_s17 + $0x14] sm:$0xf] }
  0x16   : > { %v311_v22 = vrot.slane %v202_v13, %v6961_v8  ;;  %v180_v23 = vld [vmem:[%s6959_s17 + $0x28] sm:$0xf]  ;;  %v184_v24 = vld [vmem:[%s6959_s17 + $0x3c] sm:$0xf]  ;;  %v190_v25 = vpack.i.b16 %v176_v21, %v172_v20  ;;  %v191_v26 = vshrl.u32 %v172_v20, 16  ;;  %v192_v27 = vshrl.u32 %v176_v21, 16 }
  0x17   : > { %v319_v28 = vrot.slane %v208_v16, %v6961_v8  ;;  %v196_v29 = vpack.i.b16 %v184_v24, %v180_v23  ;;  %v197_v30 = vshrl.u32 %v180_v23, 16  ;;  %v198_v31 = vshrl.u32 %v184_v24, 16  ;;  %v174_v54 = vld [vmem:[%s6959_s17 + $0x8] sm:$0xf]  ;;  %v178_v55 = vld [vmem:[%s6959_s17 + $0x1c] sm:$0xf] }
  0x18   : > { %v243_v32 = vrot.slane %v190_v25, %v6961_v8  ;;  %v193_v33 = vpack.i.b16 %v192_v27, %v191_v26  ;;  %v205_v38 = vpack.i.b16 %v204_v15, %v203_v14  ;;  %v211_v39 = vpack.i.b16 %v210_v18, %v209_v17  ;;  %v182_v57 = vld [vmem:[%s6959_s17 + $0x30] sm:$0xf]  ;;  %v186_v58 = vld [vmem:[%s6959_s17 + $0x44] sm:$0xf]  ;;  %v175_v20 = vld [vmem:[%s6959_s17 + $0xc] sm:$0xf] }
  0x19   : > { %v320_v34 = vcombine.low %v311_v22, %v319_v28  ;;  %v251_v35 = vrot.slane %v196_v29, %v6961_v8  ;;  %v199_v36 = vpack.i.b16 %v198_v31, %v197_v30  ;;  %v321_v44 = vcombine.high %v311_v22, %v319_v28  ;;  %v179_v21 = vld [vmem:[%s6959_s17 + $0x20] sm:$0xf]  ;;  %v183_v22 = vld [vmem:[%s6959_s17 + $0x34] sm:$0xf]  ;;  %v187_v23 = vld [vmem:[%s6959_s17 + $0x48] sm:$0xf] }
  0x1a   : > { %v277_v37 = vrot.slane %v193_v33, %v6961_v8  ;;  %v345_v50 = vrot.slane %v205_v38, %v6961_v8  ;;  %v353_v51 = vrot.slane %v211_v39, %v6961_v8  ;;  %v214_v63 = vpack.i.b16 %v178_v55, %v174_v54 }
  0x1b   : > { %v6979_v40 = vrot.slane %v320_v34, %v6967_v19  ;;  %v252_v41 = vcombine.low %v243_v32, %v251_v35  ;;  %v285_v42 = vrot.slane %v199_v36, %v6961_v8  ;;  %v253_v43 = vcombine.high %v243_v32, %v251_v35 }
  0x1c   : > { %v7005_v61 = vrot.slane %v321_v44, %v6967_v19  ;;  %v355_v62 = vcombine.high %v345_v50, %v353_v51  ;;  %v215_v0 = vshrl.u32 %v174_v54, 16  ;;  %v216_v1 = vshrl.u32 %v178_v55, 16 }
  0x1d   : > { %v6743_v45 = vcombine.high %v6979_v40, %v6979_v40  ;;  %v6985_v46 = vrot.slane %v252_v41, %v6967_v19  ;;  %v286_v47 = vcombine.low %v277_v37, %v285_v42  ;;  %v6988_v48 = vrot.slane %v253_v43, %v6967_v19 }
  0x1e   : > { %v287_v49 = vcombine.high %v277_v37, %v285_v42  ;;  %v220_v3 = vpack.i.b16 %v186_v58, %v182_v57  ;;  %v221_v4 = vshrl.u32 %v182_v57, 16  ;;  %v222_v5 = vshrl.u32 %v186_v58, 16 }
  0x1f   : > { %546 = vrot.lane.b32.xlu1 %v6743_v45, %s6919_s18  ;;  %v6739_v52 = vcombine.high %v6985_v46, %v6985_v46  ;;  %v294_v53 = vrot.slane %v286_v47, %v6967_v19  ;;  %v6741_v60 = vcombine.high %v6988_v48, %v6988_v48  ;;  %v354_v6 = vcombine.low %v345_v50, %v353_v51 }
  0x20   : > { %v301_v56 = vrot.slane %v287_v49, %v6967_v19  ;;  %v6745_v7 = vcombine.high %v7005_v61, %v7005_v61  ;;  %v217_v9 = vpack.i.b16 %v216_v1, %v215_v0  ;;  %v223_v10 = vpack.i.b16 %v222_v5, %v221_v4 }
  0x21   : > { %516 = vrot.lane.b32.xlu0 %v6739_v52, %s6919_s18  ;;  %v6740_v59 = vcombine.high %v294_v53, %v294_v53  ;;  %v369_v12 = vrot.slane %v355_v62, %v6967_v19  ;;  %v379_v13 = vrot.slane %v214_v63, %v6961_v8  ;;  %v387_v14 = vrot.slane %v220_v3, %v6961_v8 }
  0x22   : > { %v6443_v2 = vcombine.low %v301_v56, %v301_v56  ;;  %v6742_v11 = vcombine.high %v301_v56, %v301_v56  ;;  %v362_v15 = vrot.slane %v354_v6, %v6967_v19  ;;  %v6440_v16 = vcombine.low %v294_v53, %v294_v53 }
  0x23   : > { %521 = vrot.lane.b32.xlu1 %v6740_v59, %s6920_s19  ;;  %v413_v17 = vrot.slane %v217_v9, %v6961_v8  ;;  %v421_v18 = vrot.slane %v223_v10, %v6961_v8  ;;  %v6449_v24 = vcombine.low %v369_v12, %v369_v12  ;;  %v388_v25 = vcombine.low %v379_v13, %v387_v14  ;;  %v716_v9 = vld [vmem:[%s6959_s17 + $0x4] sm:$0xf]  ;;  %v715_v10 = vld [vmem:[%s6959_s17] sm:$0xf] }
  0x24   : > { %v6446_v26 = vcombine.low %v362_v15, %v362_v15  ;;  %v227_v27 = vshrl.u32 %v175_v20, 16  ;;  %v228_v29 = vshrl.u32 %v179_v21, 16  ;;  %v233_v30 = vshrl.u32 %v183_v22, 16 }
  0x25   : > { %531 = vrot.lane.b32.xlu0 %v6741_v60, %s6919_s18  ;;  %v422_v28 = vcombine.low %v413_v17, %v421_v18  ;;  %v234_v31 = vshrl.u32 %v187_v23, 16  ;;  %v6746_v32 = vcombine.high %v369_v12, %v369_v12  ;;  %v7027_v33 = vrot.slane %v388_v25, %v6967_v19  ;;  %v717_v12 = vld [vmem:[%s6959_s17 + $0x8] sm:$0xf]  ;;  %v729_v25 = vld [vmem:[%s6959_s17 + $0x44] sm:$0xf] }
  0x26   : > { %v423_v34 = vcombine.high %v413_v17, %v421_v18  ;;  %v226_v35 = vpack.i.b16 %v179_v21, %v175_v20  ;;  %v232_v36 = vpack.i.b16 %v187_v23, %v183_v22  ;;  %v6744_v37 = vcombine.high %v362_v15, %v362_v15  ;;  %v722_v15 = vld [vmem:[%s6959_s17 + $0x20] sm:$0xf]  ;;  %v724_v17 = vld [vmem:[%s6959_s17 + $0x2c] sm:$0xf]  ;;  %v723_v18 = vld [vmem:[%s6959_s17 + $0x28] sm:$0xf] }
  0x27   : > { %526 = vrot.lane.b32.xlu1 %v6443_v2, %s6921_s20  ;;  %v430_v38 = vrot.slane %v422_v28, %v6967_v19  ;;  %v229_v39 = vpack.i.b16 %v228_v29, %v227_v27  ;;  %v235_v41 = vpack.i.b16 %v234_v31, %v233_v30  ;;  %v6747_v42 = vcombine.high %v7027_v33, %v7027_v33  ;;  %v726_v20 = vld [vmem:[%s6959_s17 + $0x34] sm:$0xf]  ;;  %v725_v21 = vld [vmem:[%s6959_s17 + $0x30] sm:$0xf]  ;;  %v728_v22 = vld [vmem:[%s6959_s17 + $0x40] sm:$0xf] }
  0x28   : > { %v437_v43 = vrot.slane %v423_v34, %v6967_v19  ;;  %v447_v44 = vrot.slane %v226_v35, %v6961_v8  ;;  %v455_v45 = vrot.slane %v232_v36, %v6961_v8  ;;  %v389_v49 = vcombine.high %v379_v13, %v387_v14  ;;  %v720_v13 = vld [vmem:[%s6959_s17 + $0x18] sm:$0xf]  ;;  %v719_v14 = vld [vmem:[%s6959_s17 + $0x14] sm:$0xf]  ;;  %v727_v23 = vld [vmem:[%s6959_s17 + $0x3c] sm:$0xf] }
  0x29   : > { %561 = vrot.lane.b32.xlu0 %v6745_v7, %s6919_s18  ;;  %v6452_v47 = vcombine.low %v430_v38, %v430_v38  ;;  %v481_v50 = vrot.slane %v229_v39, %v6961_v8  ;;  %v489_v51 = vrot.slane %v235_v41, %v6961_v8  ;;  %v6748_v54 = vcombine.high %v430_v38, %v430_v38  ;;  %v1307_v27 = vld [vmem:[%s6959_s17] sm:$0xf]  ;;  %v1310_v28 = vld [vmem:[%s6959_s17 + $0xc] sm:$0xf]  ;;  %v1309_v29 = vld [vmem:[%s6959_s17 + $0x8] sm:$0xf] }
  0x2a   : > { %v6455_v52 = vcombine.low %v437_v43, %v437_v43  ;;  %v456_v53 = vcombine.low %v447_v44, %v455_v45  ;;  %v7043_v55 = vrot.slane %v389_v49, %v6967_v19  ;;  %v6750_v57 = vcombine.high %v437_v43, %v437_v43 }
  0x2b   : > { %536 = vrot.lane.b32.xlu1 %v6742_v11, %s6920_s19  ;;  %v490_v56 = vcombine.low %v481_v50, %v489_v51  ;;  %v491_v59 = vcombine.high %v481_v50, %v489_v51  ;;  %v457_v2 = vcombine.high %v447_v44, %v455_v45  ;;  %v718_v11 = vld [vmem:[%s6959_s17 + $0xc] sm:$0xf] }
  0x2c   : > { %v7047_v58 = vrot.slane %v456_v53, %v6967_v19  ;;  %v6749_v60 = vcombine.high %v7043_v55, %v7043_v55 }
  0x2d   : > { %511 = vrot.lane.b32.xlu0 %v6440_v16, %s6921_s20  ;;  %v498_v62 = vrot.slane %v490_v56, %v6967_v19  ;;  %v505_v0 = vrot.slane %v491_v59, %v6967_v19  ;;  %v7061_v5 = vrot.slane %v457_v2, %v6967_v19  ;;  %v721_v16 = vld [vmem:[%s6959_s17 + $0x1c] sm:$0xf] }
  0x2e   : > { %v6751_v63 = vcombine.high %v7047_v58, %v7047_v58 }
  0x2f   : > { %556 = vrot.lane.b32.xlu1 %v6449_v24, %s6921_s20  ;;  %v6458_v1 = vcombine.low %v498_v62, %v498_v62  ;;  %v6461_v3 = vcombine.low %v505_v0, %v505_v0  ;;  %v6752_v4 = vcombine.high %v498_v62, %v498_v62  ;;  %v6754_v6 = vcombine.high %v505_v0, %v505_v0  ;;  %v730_v24 = vld [vmem:[%s6959_s17 + $0x48] sm:$0xf] }
  0x30   : > { %v6753_v7 = vcombine.high %v7061_v5, %v7061_v5 }
  0x31   : > { %541 = vrot.lane.b32.xlu0 %v6446_v26, %s6921_s20  ;;  %v1308_v26 = vld [vmem:[%s6959_s17 + $0x4] sm:$0xf] }
  0x33   : > { %566 = vrot.lane.b32.xlu1 %v6746_v32, %s6920_s19 }
  0x35   : > { %551 = vrot.lane.b32.xlu0 %v6744_v37, %s6920_s19 }
  0x37   : > { %576 = vrot.lane.b32.xlu1 %v6747_v42, %s6919_s18 }
  0x39   : > { %571 = vrot.lane.b32.xlu0 %v6452_v47, %s6921_s20 }
  0x3b   : > { %586 = vrot.lane.b32.xlu1 %v6455_v52, %s6921_s20 }
  0x3d   : > { %581 = vrot.lane.b32.xlu0 %v6748_v54, %s6920_s19 }
  0x3f   : > { %596 = vrot.lane.b32.xlu1 %v6750_v57, %s6920_s19 }
  0x41   : > { %591 = vrot.lane.b32.xlu0 %v6749_v60, %s6919_s18 }
  0x43   : > { %606 = vrot.lane.b32.xlu1 %v6751_v63, %s6919_s18 }
  0x45   : > { %601 = vrot.lane.b32.xlu0 %v6458_v1, %s6921_s20 }
  0x47   : > { %616 = vrot.lane.b32.xlu1 %v6461_v3, %s6921_s20 }
  0x49   : > { %611 = vrot.lane.b32.xlu0 %v6752_v4, %s6920_s19 }
  0x4b   : > { %626 = vrot.lane.b32.xlu1 %v6754_v6, %s6920_s19 }
  0x4d   : > { %621 = vrot.lane.b32.xlu0 %v6753_v7, %s6919_s18 }
  0x4f   : > { %749 = vrot.lane.b32.xlu1 %v716_v9, %s6922_s21 }
  0x51   : > { %747 = vrot.lane.b32.xlu0 %v715_v10, %s6922_s21 }
  0x53   : > { %753 = vrot.lane.b32.xlu1 %v718_v11, %s6922_s21 }
  0x55   : > { %751 = vrot.lane.b32.xlu0 %v717_v12, %s6922_s21 }
  0x57   : > { %757 = vrot.lane.b32.xlu1 %v720_v13, %s6922_s21 }
  0x59   : > { %755 = vrot.lane.b32.xlu0 %v719_v14, %s6922_s21 }
  0x5b   : > { %761 = vrot.lane.b32.xlu1 %v722_v15, %s6922_s21 }
  0x5d   : > { %759 = vrot.lane.b32.xlu0 %v721_v16, %s6922_s21 }
  0x5f   : > { %765 = vrot.lane.b32.xlu1 %v724_v17, %s6922_s21 }
  0x61   : > { %763 = vrot.lane.b32.xlu0 %v723_v18, %s6922_s21 }
  0x63   : > { %769 = vrot.lane.b32.xlu1 %v726_v20, %s6922_s21 }
  0x65   : > { %767 = vrot.lane.b32.xlu0 %v725_v21, %s6922_s21 }
  0x67   : > { %773 = vrot.lane.b32.xlu1 %v728_v22, %s6922_s21 }
  0x69   : > { %771 = vrot.lane.b32.xlu0 %v727_v23, %s6922_s21 }
  0x6b   : > { %777 = vrot.lane.b32.xlu1 %v730_v24, %s6922_s21 }
  0x6d   : > { %775 = vrot.lane.b32.xlu0 %v729_v25, %s6922_s21 }
  0x6f   : > { %1341 = vrot.lane.b32.xlu1 %v1308_v26, %s6923_s22 }
  0x71   : > { %1339 = vrot.lane.b32.xlu0 %v1307_v27, %s6923_s22 }
  0x73   : > { %1345 = vrot.lane.b32.xlu1 %v1310_v28, %s6923_s22 }
  0x75   : > { %1343 = vrot.lane.b32.xlu0 %v1309_v29, %s6923_s22 }
  0x91   : > { %v547_v30 = vpop.permute.xlu1 %546 }
  0x93   : > { %v517_v31 = vpop.permute.xlu0 %516 }
  0x95   : > { %v522_v32 = vpop.permute.xlu1 %521 }
  0x97   : > { %v532_v34 = vpop.permute.xlu0 %531 }
  0x99   : > { %v527_v35 = vpop.permute.xlu1 %526 }
  0x9a   : > { %v640_v38 = vsel %vm628_vm0, %v6988_v48, %v527_v35 }
  0x9b   : > { %v562_v36 = vpop.permute.xlu0 %561  ;;  %v642_v42 = vsel %vm632_vm1, %v640_v38, %v532_v34 }
  0x9d   : > { %v537_v37 = vpop.permute.xlu1 %536 }
  0x9e   : > { %v644_v45 = vsel %vm635_vm2, %v642_v42, %v537_v37 }
  0x9f   : > { %v512_v39 = vpop.permute.xlu0 %511 }
  0xa0   : > { %v631_v41 = vsel %vm628_vm0, %v6985_v46, %v512_v39 }
  0xa1   : > { %v634_v43 = vsel %vm632_vm1, %v631_v41, %v517_v31  ;;  %v557_v44 = vpop.permute.xlu1 %556 }
  0xa2   : > { %v637_v47 = vsel %vm635_vm2, %v634_v43, %v522_v32  ;;  %v654_v49 = vsel %vm628_vm0, %v7005_v61, %v557_v44 }
  0xa3   : > { %v6464_v50 = vcombine.low %v637_v47, %v644_v45  ;;  %v542_v48 = vpop.permute.xlu0 %541  ;;  %v656_v46 = vsel %vm632_vm1, %v654_v49, %v562_v36 }
  0xa4   : > { %v647_v51 = vsel %vm628_vm0, %v6979_v40, %v542_v48 }
  0xa5   : > { %711 = vst [vmem:[#allocation2] sm:$0x33] %v6464_v50  ;;  %v567_v52 = vpop.permute.xlu1 %566  ;;  %v649_v54 = vsel %vm632_vm1, %v647_v51, %v547_v30 }
  0xa6   : > { %v658_v53 = vsel %vm635_vm2, %v656_v46, %v567_v52 }
  0xa7   : > { %v552_v56 = vpop.permute.xlu0 %551 }
  0xa8   : > { %v651_v57 = vsel %vm635_vm2, %v649_v54, %v552_v56 }
  0xa9   : > { %v6465_v59 = vcombine.low %v651_v57, %v658_v53  ;;  %v577_v60 = vpop.permute.xlu1 %576 }
  0xab   : > { %712 = vst [vmem:[#allocation2 + $0x8] sm:$0x33] %v6465_v59  ;;  %v572_v61 = vpop.permute.xlu0 %571 }
  0xac   : > { %v661_v40 = vsel %vm628_vm0, %v7027_v33, %v572_v61 }
  0xad   : > { %v587_v62 = vpop.permute.xlu1 %586  ;;  %v663_v3 = vsel %vm632_vm1, %v661_v40, %v577_v60 }
  0xae   : > { %v668_v0 = vsel %vm628_vm0, %v7043_v55, %v587_v62 }
  0xaf   : > { %v582_v63 = vpop.permute.xlu0 %581 }
  0xb0   : > { %v665_v6 = vsel %vm635_vm2, %v663_v3, %v582_v63 }
  0xb1   : > { %v597_v1 = vpop.permute.xlu1 %596 }
  0xb3   : > { %v592_v2 = vpop.permute.xlu0 %591 }
  0xb4   : > { %v670_v4 = vsel %vm632_vm1, %v668_v0, %v592_v2 }
  0xb5   : > { %v672_v7 = vsel %vm635_vm2, %v670_v4, %v597_v1  ;;  %v607_v9 = vpop.permute.xlu1 %606 }
  0xb6   : > { %v6466_v10 = vcombine.low %v665_v6, %v672_v7 }
  0xb7   : > { %v602_v11 = vpop.permute.xlu0 %601 }
  0xb8   : > { %713 = vst [vmem:[#allocation2 + $0x10] sm:$0x33] %v6466_v10  ;;  %v675_v33 = vsel %vm628_vm0, %v7047_v58, %v602_v11 }
  0xb9   : > { %v617_v12 = vpop.permute.xlu1 %616  ;;  %v677_v16 = vsel %vm632_vm1, %v675_v33, %v607_v9 }
  0xba   : > { %v682_v55 = vsel %vm628_vm0, %v7061_v5, %v617_v12 }
  0xbb   : > { %v612_v13 = vpop.permute.xlu0 %611 }
  0xbc   : > { %v679_v18 = vsel %vm635_vm2, %v677_v16, %v612_v13 }
  0xbd   : > { %v627_v14 = vpop.permute.xlu1 %626 }
  0xbf   : > { %v622_v15 = vpop.permute.xlu0 %621 }
  0xc0   : > { %v684_v17 = vsel %vm632_vm1, %v682_v55, %v622_v15 }
  0xc1   : > { %v686_v20 = vsel %vm635_vm2, %v684_v17, %v627_v14  ;;  %v7141_v21 = vpop.permute.xlu1 %749 }
  0xc2   : > { %v6467_v22 = vcombine.low %v679_v18, %v686_v20 }
  0xc3   : > { %v748_v23 = vpop.permute.xlu0 %747 }
  0xc4   : > { %714 = vst [vmem:[#allocation2 + $0x18] sm:$0x33] %v6467_v22  ;;  %v782_v62 = vshrl.u32 %v748_v23, 16  ;;  %v794_v22 = vshrl.u32 %v7141_v21, 16 }
  0xc5   : > { %v7143_v24 = vpop.permute.xlu1 %753 }
  0xc7   : > { %v7145_v58 = vpop.permute.xlu0 %751 }
  0xc9   : > { %v7147_v5 = vpop.permute.xlu1 %757 }
  0xca   : > { %v793_v35 = vpack.i.b16 %v7147_v5, %v7141_v21  ;;  %v795_v17 = vshrl.u32 %v7147_v5, 16 }
  0xcb   : > { %v756_v25 = vpop.permute.xlu0 %755 }
  0xcc   : > { %v781_v36 = vpack.i.b16 %v756_v25, %v748_v23  ;;  %v902_v42 = vrot.slane %v793_v35, %v6961_v8  ;;  %v783_v57 = vshrl.u32 %v756_v25, 16  ;;  %v796_v35 = vpack.i.b16 %v795_v17, %v794_v22 }
  0xcd   : > { %v7149_v26 = vpop.permute.xlu1 %761 }
  0xce   : > { %v834_v43 = vrot.slane %v781_v36, %v6961_v8  ;;  %v817_v59 = vpack.i.b16 %v7149_v26, %v7143_v24  ;;  %v784_v9 = vpack.i.b16 %v783_v57, %v782_v62  ;;  %v819_v57 = vshrl.u32 %v7149_v26, 16 }
  0xcf   : > { %v7151_v27 = vpop.permute.xlu0 %759 }
  0xd0   : > { %v805_v44 = vpack.i.b16 %v7151_v27, %v7145_v58  ;;  %v1038_v10 = vrot.slane %v817_v59, %v6961_v8  ;;  %v868_v18 = vrot.slane %v784_v9, %v6961_v8 }
  0xd1   : > { %v766_v28 = vpop.permute.xlu1 %765 }
  0xd2   : > { %v970_v60 = vrot.slane %v805_v44, %v6961_v8  ;;  %v800_v20 = vshrl.u32 %v766_v28, 16  ;;  %v807_v44 = vshrl.u32 %v7151_v27, 16 }
  0xd3   : > { %v764_v29 = vpop.permute.xlu0 %763 }
  0xd4   : > { %v788_v53 = vshrl.u32 %v764_v29, 16 }
  0xd5   : > { %v7153_v30 = vpop.permute.xlu1 %769 }
  0xd7   : > { %v7155_v31 = vpop.permute.xlu0 %767 }
  0xd9   : > { %v774_v32 = vpop.permute.xlu1 %773 }
  0xda   : > { %v799_v34 = vpack.i.b16 %v774_v32, %v766_v28  ;;  %v801_v11 = vshrl.u32 %v774_v32, 16 }
  0xdb   : > { %v772_v37 = vpop.permute.xlu0 %771 }
  0xdc   : > { %v787_v38 = vpack.i.b16 %v772_v37, %v764_v29  ;;  %v910_v39 = vrot.slane %v799_v34, %v6961_v8  ;;  %v789_v49 = vshrl.u32 %v772_v37, 16  ;;  %v802_v23 = vpack.i.b16 %v801_v11, %v800_v20 }
  0xdd   : > { %v7160_v41 = vpop.permute.xlu1 %777 }
  0xde   : > { %v842_v45 = vrot.slane %v787_v38, %v6961_v8  ;;  %v912_v48 = vcombine.high %v902_v42, %v910_v39  ;;  %v823_v46 = vpack.i.b16 %v7160_v41, %v7153_v30  ;;  %v911_v54 = vcombine.low %v902_v42, %v910_v39 }
  0xdf   : > { %v7167_v47 = vpop.permute.xlu0 %775  ;;  %v790_v63 = vpack.i.b16 %v789_v49, %v788_v53  ;;  %v944_v21 = vrot.slane %v802_v23, %v6961_v8  ;;  %v825_v27 = vshrl.u32 %v7160_v41, 16  ;;  %v818_v41 = vshrl.u32 %v7143_v24, 16 }
  0xe0   : > { %v811_v50 = vpack.i.b16 %v7167_v47, %v7155_v31  ;;  %v843_v51 = vcombine.low %v834_v43, %v842_v45  ;;  %v844_v52 = vcombine.high %v834_v43, %v842_v45  ;;  %v1046_v0 = vrot.slane %v823_v46, %v6961_v8 }
  0xe1   : > { %v7187_v3 = vrot.slane %v912_v48, %v6967_v19  ;;  %v7192_v7 = vrot.slane %v911_v54, %v6967_v19  ;;  %v876_v12 = vrot.slane %v790_v63, %v6961_v8  ;;  %v813_v36 = vshrl.u32 %v7167_v47, 16 }
  0xe2   : > { %v978_v56 = vrot.slane %v811_v50, %v6961_v8  ;;  %v7178_v61 = vrot.slane %v844_v52, %v6967_v19  ;;  %v7181_v40 = vrot.slane %v843_v51, %v6967_v19  ;;  %v1048_v13 = vcombine.high %v1038_v10, %v1046_v0 }
  0xe3   : > { %v6761_v33 = vcombine.high %v7187_v3, %v7187_v3  ;;  %v1047_v14 = vcombine.low %v1038_v10, %v1046_v0  ;;  %v6759_v15 = vcombine.high %v7192_v7, %v7192_v7  ;;  %v877_v32 = vcombine.low %v868_v18, %v876_v12 }
  0xe4   : > { %v980_v1 = vcombine.high %v970_v60, %v978_v56  ;;  %v6757_v2 = vcombine.high %v7178_v61, %v7178_v61  ;;  %v979_v4 = vcombine.low %v970_v60, %v978_v56  ;;  %v6755_v6 = vcombine.high %v7181_v40, %v7181_v40 }
  0xe5   : > { %v7216_v29 = vrot.slane %v1048_v13, %v6967_v19  ;;  %v7221_v34 = vrot.slane %v1047_v14, %v6967_v19  ;;  %v878_v28 = vcombine.high %v868_v18, %v876_v12  ;;  %v885_v38 = vrot.slane %v877_v32, %v6967_v19  ;;  %v1311_v32 = vld [vmem:[%s6959_s17 + $0x14] sm:$0xf] }
  0xe6   : > { %1122 = vrot.lane.b32.xlu0 %v6757_v2, %s6919_s18  ;;  %1107 = vrot.lane.b32.xlu1 %v6755_v6, %s6919_s18  ;;  %v7201_v55 = vrot.slane %v980_v1, %v6967_v19  ;;  %v7206_v16 = vrot.slane %v979_v4, %v6967_v19  ;;  %v936_v43 = vrot.slane %v796_v35, %v6961_v8  ;;  %v812_v45 = vshrl.u32 %v7155_v31, 16  ;;  %v1314_v35 = vld [vmem:[%s6959_s17 + $0x20] sm:$0xf] }
  0xe7   : > { %v6769_v37 = vcombine.high %v7216_v29, %v7216_v29  ;;  %v6767_v39 = vcombine.high %v7221_v34, %v7221_v34  ;;  %v892_v42 = vrot.slane %v878_v28, %v6967_v19  ;;  %v806_v47 = vshrl.u32 %v7145_v58, 16  ;;  %v1313_v28 = vld [vmem:[%s6959_s17 + $0x1c] sm:$0xf] }
  0xe8   : > { %v6765_v25 = vcombine.high %v7201_v55, %v7201_v55  ;;  %v6763_v5 = vcombine.high %v7206_v16, %v7206_v16  ;;  %v814_v49 = vpack.i.b16 %v813_v36, %v812_v45  ;;  %v6468_v50 = vcombine.low %v885_v38, %v885_v38  ;;  %v1316_v36 = vld [vmem:[%s6959_s17 + $0x2c] sm:$0xf]  ;;  %v7293_v45 = vpop.permute.xlu0 %1339 }
  0xe9   : > { %v945_v48 = vcombine.low %v936_v43, %v944_v21  ;;  %v6471_v51 = vcombine.low %v892_v42, %v892_v42  ;;  %v946_v52 = vcombine.high %v936_v43, %v944_v21  ;;  %v808_v46 = vpack.i.b16 %v807_v44, %v806_v47  ;;  %v1315_v21 = vld [vmem:[%s6959_s17 + $0x28] sm:$0xf]  ;;  %v1321_v43 = vld [vmem:[%s6959_s17 + $0x44] sm:$0xf]  ;;  %v7295_v47 = vpop.permute.xlu1 %1341 }
  0xea   : > { %1152 = vrot.lane.b32.xlu0 %v6761_v33, %s6919_s18  ;;  %1137 = vrot.lane.b32.xlu1 %v6759_v15, %s6919_s18  ;;  %v1012_v31 = vrot.slane %v814_v49, %v6961_v8  ;;  %v6756_v53 = vcombine.high %v885_v38, %v885_v38  ;;  %v6758_v56 = vcombine.high %v892_v42, %v892_v42  ;;  %v824_v60 = vshrl.u32 %v7153_v30, 16  ;;  %v1318_v38 = vld [vmem:[%s6959_s17 + $0x34] sm:$0xf]  ;;  %v1320_v42 = vld [vmem:[%s6959_s17 + $0x40] sm:$0xf] }
  0xeb   : > { %v953_v54 = vrot.slane %v945_v48, %v6967_v19  ;;  %v960_v58 = vrot.slane %v946_v52, %v6967_v19  ;;  %v1004_v59 = vrot.slane %v808_v46, %v6961_v8  ;;  %v820_v4 = vpack.i.b16 %v819_v57, %v818_v41  ;;  %v1322_v44 = vld [vmem:[%s6959_s17 + $0x48] sm:$0xf] }
  0xec   : > { %v826_v62 = vpack.i.b16 %v825_v27, %v824_v60  ;;  %v7297_v49 = vpop.permute.xlu0 %1343 }
  0xed   : > { %v6474_v63 = vcombine.low %v953_v54, %v953_v54  ;;  %v1013_v0 = vcombine.low %v1004_v59, %v1012_v31  ;;  %v6477_v1 = vcombine.low %v960_v58, %v960_v58  ;;  %v1014_v2 = vcombine.high %v1004_v59, %v1012_v31 }
  0xee   : > { %1182 = vrot.lane.b32.xlu0 %v6765_v25, %s6919_s18  ;;  %1167 = vrot.lane.b32.xlu1 %v6763_v5, %s6919_s18  ;;  %v1080_v26 = vrot.slane %v826_v62, %v6961_v8  ;;  %v6760_v6 = vcombine.high %v953_v54, %v953_v54  ;;  %v6762_v9 = vcombine.high %v960_v58, %v960_v58  ;;  %v1312_v5 = vld [vmem:[%s6959_s17 + $0x18] sm:$0xf] }
  0xef   : > { %v1021_v30 = vrot.slane %v1013_v0, %v6967_v19  ;;  %v1028_v10 = vrot.slane %v1014_v2, %v6967_v19  ;;  %v1072_v24 = vrot.slane %v820_v4, %v6961_v8 }
  0xf1   : > { %v6480_v11 = vcombine.low %v1021_v30, %v1021_v30  ;;  %v1081_v12 = vcombine.low %v1072_v24, %v1080_v26  ;;  %v6483_v13 = vcombine.low %v1028_v10, %v1028_v10  ;;  %v1082_v33 = vcombine.high %v1072_v24, %v1080_v26 }
  0xf2   : > { %1212 = vrot.lane.b32.xlu0 %v6769_v37, %s6919_s18  ;;  %1197 = vrot.lane.b32.xlu1 %v6767_v39, %s6919_s18  ;;  %v6764_v14 = vcombine.high %v1021_v30, %v1021_v30  ;;  %v6766_v17 = vcombine.high %v1028_v10, %v1028_v10  ;;  %v1317_v37 = vld [vmem:[%s6959_s17 + $0x30] sm:$0xf]  ;;  %v1319_v39 = vld [vmem:[%s6959_s17 + $0x3c] sm:$0xf] }
  0xf3   : > { %v1089_v15 = vrot.slane %v1081_v12, %v6967_v19  ;;  %v1096_v18 = vrot.slane %v1082_v33, %v6967_v19 }
  0xf5   : > { %v6486_v20 = vcombine.low %v1089_v15, %v1089_v15  ;;  %v6489_v22 = vcombine.low %v1096_v18, %v1096_v18  ;;  %v6768_v23 = vcombine.high %v1089_v15, %v1089_v15  ;;  %v6770_v25 = vcombine.high %v1096_v18, %v1096_v18 }
  0xf6   : > { %1102 = vrot.lane.b32.xlu0 %v6468_v50, %s6921_s20  ;;  %1117 = vrot.lane.b32.xlu1 %v6471_v51, %s6921_s20  ;;  %v7299_v50 = vpop.permute.xlu1 %1345 }
  0xfa   : > { %1112 = vrot.lane.b32.xlu0 %v6756_v53, %s6920_s19  ;;  %1127 = vrot.lane.b32.xlu1 %v6758_v56, %s6920_s19 }
  0xfe   : > { %1132 = vrot.lane.b32.xlu0 %v6474_v63, %s6921_s20  ;;  %1147 = vrot.lane.b32.xlu1 %v6477_v1, %s6921_s20 }
 0x102   : > { %1142 = vrot.lane.b32.xlu0 %v6760_v6, %s6920_s19  ;;  %1157 = vrot.lane.b32.xlu1 %v6762_v9, %s6920_s19 }
 0x106   : > { %1162 = vrot.lane.b32.xlu0 %v6480_v11, %s6921_s20  ;;  %1177 = vrot.lane.b32.xlu1 %v6483_v13, %s6921_s20 }
 0x10a   : > { %1172 = vrot.lane.b32.xlu0 %v6764_v14, %s6920_s19  ;;  %1187 = vrot.lane.b32.xlu1 %v6766_v17, %s6920_s19 }
 0x10e   : > { %1192 = vrot.lane.b32.xlu0 %v6486_v20, %s6921_s20  ;;  %1207 = vrot.lane.b32.xlu1 %v6489_v22, %s6921_s20 }
 0x112   : > { %1202 = vrot.lane.b32.xlu0 %v6768_v23, %s6920_s19  ;;  %1217 = vrot.lane.b32.xlu1 %v6770_v25, %s6920_s19 }
 0x116   : > { %1347 = vrot.lane.b32.xlu0 %v1311_v32, %s6923_s22  ;;  %1349 = vrot.lane.b32.xlu1 %v1312_v5, %s6923_s22 }
 0x11a   : > { %1351 = vrot.lane.b32.xlu0 %v1313_v28, %s6923_s22  ;;  %1353 = vrot.lane.b32.xlu1 %v1314_v35, %s6923_s22 }
 0x11e   : > { %1355 = vrot.lane.b32.xlu0 %v1315_v21, %s6923_s22  ;;  %1357 = vrot.lane.b32.xlu1 %v1316_v36, %s6923_s22 }
 0x122   : > { %1359 = vrot.lane.b32.xlu0 %v1317_v37, %s6923_s22  ;;  %1361 = vrot.lane.b32.xlu1 %v1318_v38, %s6923_s22 }
 0x126   : > { %1363 = vrot.lane.b32.xlu0 %v1319_v39, %s6923_s22  ;;  %1365 = vrot.lane.b32.xlu1 %v1320_v42, %s6923_s22 }
 0x12a   : > { %1367 = vrot.lane.b32.xlu0 %v1321_v43, %s6923_s22  ;;  %1369 = vrot.lane.b32.xlu1 %v1322_v44, %s6923_s22 }
 0x158   : > { %v1123_v48 = vpop.permute.xlu0 %1122  ;;  %v1108_v51 = vpop.permute.xlu1 %1107 }
 0x15c   : > { %v1153_v52 = vpop.permute.xlu0 %1152  ;;  %v1138_v46 = vpop.permute.xlu1 %1137 }
 0x160   : > { %v1183_v27 = vpop.permute.xlu0 %1182  ;;  %v1168_v31 = vpop.permute.xlu1 %1167 }
 0x164   : > { %v1213_v53 = vpop.permute.xlu0 %1212  ;;  %v1198_v54 = vpop.permute.xlu1 %1197 }
 0x168   : > { %v1103_v56 = vpop.permute.xlu0 %1102  ;;  %v1118_v58 = vpop.permute.xlu1 %1117 }
 0x169   : > { %v1221_v57 = vsel %vm628_vm0, %v7181_v40, %v1103_v56  ;;  %v1228_v59 = vsel %vm628_vm0, %v7178_v61, %v1118_v58 }
 0x16a   : > { %v1223_v60 = vsel %vm632_vm1, %v1221_v57, %v1108_v51  ;;  %v1230_v63 = vsel %vm632_vm1, %v1228_v59, %v1123_v48 }
 0x16c   : > { %v1113_v41 = vpop.permute.xlu0 %1112  ;;  %v1128_v62 = vpop.permute.xlu1 %1127 }
 0x16d   : > { %v1225_v0 = vsel %vm635_vm2, %v1223_v60, %v1113_v41  ;;  %v1232_v1 = vsel %vm635_vm2, %v1230_v63, %v1128_v62  ;;  %v1905_v41 = vld [vmem:[%s6959_s17 + $0x28] sm:$0xf]  ;;  %v1910_v63 = vld [vmem:[%s6959_s17 + $0x3c] sm:$0xf] }
 0x16e   : > { %v6492_v2 = vcombine.low %v1225_v0, %v1232_v1 }
 0x170   : > { %v1133_v4 = vpop.permute.xlu0 %1132  ;;  %v1295_v26 = vrot.slane %v6492_v2, 6  ;;  %v1148_v6 = vpop.permute.xlu1 %1147  ;;  %v1386_v2 = vshrl.u32 %v7295_v47, 16 }
 0x171   : > { %v1235_v40 = vsel %vm628_vm0, %v7192_v7, %v1133_v4  ;;  %v1242_v61 = vsel %vm628_vm0, %v7187_v3, %v1148_v6  ;;  %v1374_v4 = vshrl.u32 %v7293_v45, 16 }
 0x172   : > { %1303 = vst [vmem:[#allocation2] sm:$0xcc] %v1295_v26  ;;  %v1237_v30 = vsel %vm632_vm1, %v1235_v40, %v1138_v46  ;;  %v1244_v24 = vsel %vm632_vm1, %v1242_v61, %v1153_v52  ;;  %v1895_v46 = vld [vmem:[%s6959_s17] sm:$0xf] }
 0x174   : > { %v1143_v9 = vpop.permute.xlu0 %1142  ;;  %v1158_v10 = vpop.permute.xlu1 %1157 }
 0x175   : > { %v1239_v11 = vsel %vm635_vm2, %v1237_v30, %v1143_v9  ;;  %v1246_v12 = vsel %vm635_vm2, %v1244_v24, %v1158_v10  ;;  %v7351_v24 = vld [vmem:[%s6959_s17 + $0x4] sm:$0xf] }
 0x176   : > { %v6493_v13 = vcombine.low %v1239_v11, %v1246_v12  ;;  %v2007_v11 = vshrl.u32 %v1905_v41, 16 }
 0x178   : > { %v1163_v33 = vpop.permute.xlu0 %1162  ;;  %v1296_v14 = vrot.slane %v6493_v13, 6  ;;  %v1178_v15 = vpop.permute.xlu1 %1177  ;;  %v7354_v13 = vld [vmem:[%s6959_s17 + $0x18] sm:$0xf] }
 0x179   : > { %v1249_v7 = vsel %vm628_vm0, %v7206_v16, %v1163_v33  ;;  %v1256_v3 = vsel %vm628_vm0, %v7201_v55, %v1178_v15  ;;  %v2010_v33 = vshll.u32 %v1905_v41, 16  ;;  %v2054_v15 = vshll.u32 %v1910_v63, 16 }
 0x17a   : > { %1304 = vst [vmem:[#allocation2 + $0x8] sm:$0xcc] %v1296_v14  ;;  %v1251_v17 = vsel %vm632_vm1, %v1249_v7, %v1168_v31  ;;  %v1258_v22 = vsel %vm632_vm1, %v1256_v3, %v1183_v27  ;;  %v1900_v31 = vld [vmem:[%s6959_s17 + $0x14] sm:$0xf]  ;;  %v2051_v14 = vshrl.u32 %v1910_v63, 16 }
 0x17b   : > { %v1963_v58 = vshrl.u32 %v1900_v31, 16  ;;  %v1966_v57 = vshll.u32 %v1900_v31, 16  ;;  %v2056_v41 = vrot.slane %v2054_v15, 5 }
 0x17c   : > { %v1173_v18 = vpop.permute.xlu0 %1172  ;;  %v1188_v20 = vpop.permute.xlu1 %1187 }
 0x17d   : > { %v1253_v23 = vsel %vm635_vm2, %v1251_v17, %v1173_v18  ;;  %v1260_v25 = vsel %vm635_vm2, %v1258_v22, %v1188_v20  ;;  %v1965_v6 = vrot.slane %v1963_v58, 4  ;;  %v1968_v40 = vrot.slane %v1966_v57, 5  ;;  %v7359_v22 = vld [vmem:[%s6959_s17 + $0x2c] sm:$0xf] }
 0x17e   : > { %v6494_v32 = vcombine.low %v1253_v23, %v1260_v25  ;;  %v1928_v23 = vshll.u32 %v7351_v24, 16 }
 0x17f   : > { %v1969_v25 = vor.u32 %v1968_v40, %v1965_v6 }
 0x180   : > { %v1193_v5 = vpop.permute.xlu0 %1192  ;;  %v1297_v28 = vrot.slane %v6494_v32, 6  ;;  %v1208_v35 = vpop.permute.xlu1 %1207 }
 0x181   : > { %v1263_v16 = vsel %vm628_vm0, %v7221_v34, %v1193_v5  ;;  %v1270_v55 = vsel %vm628_vm0, %v7216_v29, %v1208_v35  ;;  %v2009_v35 = vrot.slane %v2007_v11, 4 }
 0x182   : > { %1305 = vst [vmem:[#allocation2 + $0x10] sm:$0xcc] %v1297_v28  ;;  %v1265_v21 = vsel %vm632_vm1, %v1263_v16, %v1198_v54  ;;  %v1272_v38 = vsel %vm632_vm1, %v1270_v55, %v1213_v53  ;;  %v1919_v53 = vshrl.u32 %v1895_v46, 16  ;;  %v1922_v54 = vshll.u32 %v1895_v46, 16 }
 0x183   : > { %v1972_v28 = vshll.u32 %v7354_v13, 16  ;;  %v1970_v46 = vrot.slane %v1969_v25, 4 }
 0x184   : > { %v1203_v36 = vpop.permute.xlu0 %1202  ;;  %v1218_v37 = vpop.permute.xlu1 %1217  ;;  %v1921_v0 = vrot.slane %v1919_v53, 4  ;;  %v1924_v1 = vrot.slane %v1922_v54, 5 }
 0x185   : > { %v1267_v39 = vsel %vm635_vm2, %v1265_v21, %v1203_v36  ;;  %v1274_v42 = vsel %vm635_vm2, %v1272_v38, %v1218_v37  ;;  %v2012_v36 = vrot.slane %v2010_v33, 5  ;;  %v2016_v38 = vshll.u32 %v7359_v22, 16 }
 0x186   : > { %v6495_v43 = vcombine.low %v1267_v39, %v1274_v42  ;;  %v1925_v17 = vor.u32 %v1924_v1, %v1921_v0 }
 0x187   : > { %v2013_v57 = vor.u32 %v2012_v36, %v2009_v35 }
 0x188   : > { %v1348_v44 = vpop.permute.xlu0 %1347  ;;  %v1298_v48 = vrot.slane %v6495_v43, 6  ;;  %v7333_v34 = vpop.permute.xlu1 %1349 }
 0x189   : > { %v1375_v60 = vshrl.u32 %v1348_v44, 16  ;;  %v1373_v62 = vpack.i.b16 %v1348_v44, %v7293_v45  ;;  %v1387_v16 = vshrl.u32 %v7333_v34, 16  ;;  %v1385_v39 = vpack.i.b16 %v7333_v34, %v7295_v47 }
 0x18a   : > { %1306 = vst [vmem:[#allocation2 + $0x18] sm:$0xcc] %v1298_v48  ;;  %v1926_v48 = vrot.slane %v1925_v17, 4 }
 0x18b   : > { %v1376_v12 = vpack.i.b16 %v1375_v60, %v1374_v4  ;;  %v1426_v7 = vrot.slane %v1373_v62, %v6961_v8  ;;  %v1388_v31 = vpack.i.b16 %v1387_v16, %v1386_v2  ;;  %v2053_v60 = vrot.slane %v2051_v14, 4  ;;  %v7394_v2 = vld [vmem:[%s6959_s17 + $0x40] sm:$0xf] }
 0x18c   : > { %v7335_v29 = vpop.permute.xlu0 %1351  ;;  %v7337_v51 = vpop.permute.xlu1 %1353  ;;  %v7389_v62 = vrot.slane %v1385_v39, %v6961_v8 }
 0x18d   : > { %v1460_v55 = vrot.slane %v1376_v12, %v6961_v8  ;;  %v1528_v6 = vrot.slane %v1388_v31, %v6961_v8  ;;  %v2057_v11 = vor.u32 %v2056_v41, %v2053_v60  ;;  %v2060_v12 = vshll.u32 %v7394_v2, 16 }
 0x18e   : > { %v2064_v31 = vshrl.u32 %v7394_v2, 16 }
 0x18f   : > { %v2058_v35 = vrot.slane %v2057_v11, 4  ;;  %v7422_v16 = vrot.slane %v2060_v12, 5 }
 0x190   : > { %v1356_v52 = vpop.permute.xlu0 %1355  ;;  %v1358_v27 = vpop.permute.xlu1 %1357 }
 0x191   : > { %v1380_v61 = vshrl.u32 %v1356_v52, 16  ;;  %v1392_v18 = vshrl.u32 %v1358_v27, 16 }
 0x194   : > { %v7341_v56 = vpop.permute.xlu0 %1359  ;;  %v7343_v59 = vpop.permute.xlu1 %1361 }
 0x198   : > { %v1364_v26 = vpop.permute.xlu0 %1363  ;;  %v1366_v30 = vpop.permute.xlu1 %1365 }
 0x199   : > { %v1379_v9 = vpack.i.b16 %v1364_v26, %v1356_v52  ;;  %v1381_v10 = vshrl.u32 %v1364_v26, 16  ;;  %v1393_v20 = vshrl.u32 %v1366_v30, 16  ;;  %v1391_v21 = vpack.i.b16 %v1366_v30, %v1358_v27 }
 0x19a   : > { %v7372_v52 = vrot.slane %v1928_v23, 5  ;;  %v7374_v27 = vrot.slane %v1972_v28, 5  ;;  %v1932_v28 = vshrl.u32 %v7351_v24, 16 }
 0x19b   : > { %v1382_v45 = vpack.i.b16 %v1381_v10, %v1380_v61  ;;  %v1434_v3 = vrot.slane %v1379_v9, %v6961_v8  ;;  %v1394_v42 = vpack.i.b16 %v1393_v20, %v1392_v18  ;;  %v7377_v53 = vrot.slane %v1391_v21, %v6961_v8 }
 0x19c   : > { %v1368_v4 = vpop.permute.xlu0 %1367  ;;  %v1931_v26 = vsel %vm7383_vm5, %v1926_v48, %v7372_v52  ;;  %v1975_v30 = vsel %vm7383_vm5, %v1970_v46, %v7374_v27  ;;  %v2014_v9 = vrot.slane %v2013_v57, 4  ;;  %v7406_v10 = vrot.slane %v2016_v38, 5  ;;  %v1370_v60 = vpop.permute.xlu1 %1369 }
 0x19d   : > { %v1435_v32 = vcombine.low %v1426_v7, %v1434_v3  ;;  %v1468_v5 = vrot.slane %v1382_v45, %v6961_v8  ;;  %v1536_v63 = vrot.slane %v1394_v42, %v6961_v8  ;;  %v1436_v0 = vcombine.high %v1426_v7, %v1434_v3 }
 0x19e   : > { %v1503_v40 = vcombine.low %v7389_v62, %v7377_v53  ;;  %v1405_v33 = vshrl.u32 %v1368_v4, 16  ;;  %v1399_v45 = vshrl.u32 %v7335_v29, 16  ;;  %v1404_v3 = vshrl.u32 %v7341_v56, 16 }
 0x19f   : > { %v7367_v37 = vrot.slane %v1435_v32, %v6967_v19  ;;  %v1469_v43 = vcombine.low %v1460_v55, %v1468_v5  ;;  %v1470_v44 = vcombine.high %v1460_v55, %v1468_v5  ;;  %v7411_v15 = vrot.slane %v1436_v0, %v6967_v19 }
 0x1a0   : > { %v1537_v7 = vcombine.low %v1528_v6, %v1536_v63  ;;  %v2097_v17 = vshrl.u32 %v1931_v26, 16  ;;  %v2098_v18 = vshrl.u32 %v1975_v30, 16  ;;  %v1403_v20 = vpack.i.b16 %v1368_v4, %v7341_v56  ;;  %v7465_v4 = vld [vmem:[%s6959_s17 + $0x8] sm:$0xf] }
 0x1a1   : > { %v6771_v54 = vcombine.high %v7367_v37, %v7367_v37  ;;  %v1477_v58 = vrot.slane %v1469_v43, %v6967_v19  ;;  %v1484_v34 = vrot.slane %v1470_v44, %v6967_v19  ;;  %v7418_v25 = vrot.slane %v1503_v40, %v6967_v19 }
 0x1a2   : > { %v1538_v32 = vcombine.high %v1528_v6, %v1536_v63  ;;  %v1398_v5 = vshrl.u32 %v7297_v49, 16  ;;  %v1397_v55 = vpack.i.b16 %v7335_v29, %v7297_v49  ;;  %v1406_v21 = vpack.i.b16 %v1405_v33, %v1404_v3  ;;  %v7473_v33 = vld [vmem:[%s6959_s17 + $0x1c] sm:$0xf] }
 0x1a3   : > { %1699 = vrot.lane.b32.xlu1 %v6771_v54, %s6919_s18  ;;  %v6496_v1 = vcombine.low %v1477_v58, %v1477_v58  ;;  %v6499_v61 = vcombine.low %v1484_v34, %v1484_v34  ;;  %v6772_v14 = vcombine.high %v1477_v58, %v1477_v58  ;;  %v6774_v23 = vcombine.high %v1484_v34, %v1484_v34 }
 0x1a4   : > { %v6773_v56 = vcombine.high %v7411_v15, %v7411_v15  ;;  %v1545_v36 = vrot.slane %v1537_v7, %v6967_v19  ;;  %v1976_v38 = vshrl.u32 %v7354_v13, 16  ;;  %v2019_v24 = vsel %vm7383_vm5, %v2014_v9, %v7406_v10 }
 0x1a5   : > { %1694 = vrot.lane.b32.xlu0 %v6496_v1, %s6921_s20  ;;  %v2096_v39 = vpack.i.b16 %v1975_v30, %v1931_v26  ;;  %v2099_v42 = vpack.i.b16 %v2098_v18, %v2097_v17  ;;  %v1400_v43 = vpack.i.b16 %v1399_v45, %v1398_v5  ;;  %v7435_v44 = vrot.slane %v1403_v20, %v6961_v8 }
 0x1a6   : > { %v6775_v49 = vcombine.high %v7418_v25, %v7418_v25  ;;  %v1552_v29 = vrot.slane %v1538_v32, %v6967_v19  ;;  %v1410_v48 = vshrl.u32 %v7299_v50, 16  ;;  %v2020_v13 = vshrl.u32 %v7359_v22, 16 }
 0x1a7   : > { %1709 = vrot.lane.b32.xlu1 %v6499_v61, %s6921_s20  ;;  %v2063_v46 = vsel %vm7383_vm5, %v2058_v35, %v7422_v16  ;;  %v7448_v54 = vrot.slane %v1397_v55, %v6961_v8  ;;  %v1504_v58 = vcombine.high %v7389_v62, %v7377_v53  ;;  %v1604_v34 = vrot.slane %v1406_v21, %v6961_v8 }
 0x1a8   : > { %v6502_v57 = vcombine.low %v1545_v36, %v1545_v36  ;;  %v7455_v22 = vrot.slane %v2096_v39, %v6961_v8  ;;  %v2103_v41 = vshrl.u32 %v2019_v24, 16  ;;  %v1934_v63 = vrot.slane %v1932_v28, 4 }
 0x1a9   : > { %1704 = vrot.lane.b32.xlu0 %v6772_v14, %s6920_s19  ;;  %v1978_v0 = vrot.slane %v1976_v38, 4  ;;  %v1596_v1 = vrot.slane %v1400_v43, %v6961_v8  ;;  %v1571_v2 = vcombine.low %v7448_v54, %v7435_v44  ;;  %v6505_v53 = vcombine.low %v1552_v29, %v1552_v29  ;;  %v7476_v14 = vld [vmem:[%s6959_s17 + $0x30] sm:$0xf] }
 0x1aa   : > { %v7462_v62 = vrot.slane %v2099_v42, %v6961_v8  ;;  %v1416_v26 = vshrl.u32 %v7343_v59, 16  ;;  %v2102_v6 = vpack.i.b16 %v2063_v46, %v2019_v24  ;;  %v2104_v40 = vshrl.u32 %v2063_v46, 16 }
 0x1ab   : > { %1719 = vrot.lane.b32.xlu1 %v6774_v23, %s6920_s19  ;;  %v2022_v61 = vrot.slane %v2020_v13, 4  ;;  %v1417_v30 = vshrl.u32 %v1370_v60, 16  ;;  %v6776_v9 = vcombine.high %v1545_v36, %v1545_v36  ;;  %v7470_v11 = vrot.slane %v1504_v58, %v6967_v19 }
 0x1ac   : > { %v1605_v12 = vcombine.low %v1596_v1, %v1604_v34  ;;  %v1411_v7 = vshrl.u32 %v7337_v51, 16  ;;  %v1935_v45 = vor.u32 %v1934_v63, %v7372_v52  ;;  %v1938_v3 = vshll.u32 %v7465_v4, 16 }
 0x1ad   : > { %1714 = vrot.lane.b32.xlu0 %v6773_v56, %s6919_s18  ;;  %v1979_v17 = vor.u32 %v1978_v0, %v7374_v27  ;;  %v1415_v18 = vpack.i.b16 %v1370_v60, %v7343_v59  ;;  %v6778_v20 = vcombine.high %v1552_v29, %v1552_v29  ;;  %v7485_v23 = vrot.slane %v1571_v2, %v6967_v19  ;;  %v7497_v56 = vld [vmem:[%s6959_s17 + $0x44] sm:$0xf] }
 0x1ae   : > { %v1606_v32 = vcombine.high %v1596_v1, %v1604_v34  ;;  %v1982_v5 = vshll.u32 %v7473_v33, 16  ;;  %v2023_v28 = vor.u32 %v2022_v61, %v7406_v10  ;;  %v2026_v52 = vshll.u32 %v7476_v14, 16 }
 0x1af   : > { %1729 = vrot.lane.b32.xlu1 %v6775_v49, %s6919_s18  ;;  %v2066_v35 = vrot.slane %v2064_v31, 4  ;;  %v1409_v55 = vpack.i.b16 %v7337_v51, %v7299_v50  ;;  %v1418_v27 = vpack.i.b16 %v1417_v30, %v1416_v26  ;;  %v6777_v59 = vcombine.high %v7470_v11, %v7470_v11 }
 0x1b0   : > { %v1613_v21 = vrot.slane %v1605_v12, %v6967_v19  ;;  %v2157_v36 = vrot.slane %v2102_v6, %v6961_v8  ;;  %v2105_v38 = vpack.i.b16 %v2104_v40, %v2103_v41  ;;  %v1936_v10 = vrot.slane %v1935_v45, 4 }
 0x1b1   : > { %1724 = vrot.lane.b32.xlu0 %v6502_v57, %s6921_s20  ;;  %v7500_v24 = vrot.slane %v1938_v3, 5  ;;  %v1412_v39 = vpack.i.b16 %v1411_v7, %v1410_v48  ;;  %v7503_v42 = vrot.slane %v1415_v18, %v6961_v8  ;;  %v6779_v50 = vcombine.high %v7485_v23, %v7485_v23 }
 0x1b2   : > { %v1620_v51 = vrot.slane %v1606_v32, %v6967_v19  ;;  %v1980_v43 = vrot.slane %v1979_v17, 4  ;;  %v7509_v49 = vrot.slane %v1982_v5, 5  ;;  %v2067_v29 = vor.u32 %v2066_v35, %v7422_v16  ;;  %v1898_v5 = vld [vmem:[%s6959_s17 + $0xc] sm:$0xf] }
 0x1b3   : > { %1739 = vrot.lane.b32.xlu1 %v6505_v53, %s6921_s20  ;;  %v2070_v13 = vshll.u32 %v7497_v56, 16  ;;  %v7514_v46 = vrot.slane %v1409_v55, %v6961_v8  ;;  %v1672_v48 = vrot.slane %v1418_v27, %v6961_v8  ;;  %v1572_v31 = vcombine.high %v7448_v54, %v7435_v44  ;;  %v1903_v27 = vld [vmem:[%s6959_s17 + $0x20] sm:$0xf] }
 0x1b4   : > { %v6508_v58 = vcombine.low %v1613_v21, %v1613_v21  ;;  %v2158_v34 = vcombine.low %v7455_v22, %v2157_v36  ;;  %v2191_v57 = vrot.slane %v2105_v38, %v6961_v8  ;;  %v2024_v60 = vrot.slane %v2023_v28, 4  ;;  %v1908_v38 = vld [vmem:[%s6959_s17 + $0x34] sm:$0xf] }
 0x1b5   : > { %1734 = vrot.lane.b32.xlu0 %v6776_v9, %s6920_s19  ;;  %v7522_v41 = vrot.slane %v2026_v52, 5  ;;  %v1664_v16 = vrot.slane %v1412_v39, %v6961_v8  ;;  %v1639_v63 = vcombine.low %v7514_v46, %v7503_v42  ;;  %v6511_v0 = vcombine.low %v1620_v51, %v1620_v51 }
 0x1b6   : > { %v2159_v44 = vcombine.high %v7455_v22, %v2157_v36  ;;  %v7532_v54 = vsel %vm7383_vm5, %v1936_v10, %v7500_v24  ;;  %v1942_v1 = vshrl.u32 %v7465_v4, 16  ;;  %v1986_v2 = vshrl.u32 %v7473_v33, 16 }
 0x1b7   : > { %1749 = vrot.lane.b32.xlu1 %v6778_v20, %s6920_s19  ;;  %v7536_v53 = vrot.slane %v2070_v13, 5  ;;  %v1673_v26 = vcombine.low %v1664_v16, %v1672_v48  ;;  %v6780_v6 = vcombine.high %v1613_v21, %v1613_v21  ;;  %v7540_v40 = vrot.slane %v1572_v31, %v6967_v19 }
 0x1b8   : > { %v2068_v61 = vrot.slane %v2067_v29, 4  ;;  %v2192_v22 = vcombine.low %v7462_v62, %v2191_v57  ;;  %v2193_v30 = vcombine.high %v7462_v62, %v2191_v57  ;;  %v7547_v4 = vsel %vm7383_vm5, %v1980_v43, %v7509_v49 }
 0x1b9   : > { %1744 = vrot.lane.b32.xlu0 %v6777_v59, %s6919_s18  ;;  %v2030_v9 = vshrl.u32 %v7476_v14, 16  ;;  %v1674_v12 = vcombine.high %v1664_v16, %v1672_v48  ;;  %v6782_v33 = vcombine.high %v1620_v51, %v1620_v51  ;;  %v7552_v7 = vrot.slane %v1639_v63, %v6967_v19  ;;  %v1913_v51 = vld [vmem:[%s6959_s17 + $0x48] sm:$0xf] }
 0x1ba   : > { %v2074_v45 = vshrl.u32 %v7497_v56, 16  ;;  %v7556_v62 = vrot.slane %v2158_v34, %v6967_v19  ;;  %v7559_v3 = vrot.slane %v2159_v44, %v6967_v19  ;;  %v2029_v14 = vsel %vm7383_vm5, %v2024_v60, %v7522_v41 }
 0x1bb   : > { %1759 = vrot.lane.b32.xlu1 %v6779_v50, %s6919_s18  ;;  %v1944_v17 = vrot.slane %v1942_v1, 4  ;;  %v6781_v18 = vcombine.high %v7540_v40, %v7540_v40  ;;  %v1681_v20 = vrot.slane %v1673_v26, %v6967_v19  ;;  %v2073_v32 = vsel %vm7383_vm5, %v2068_v61, %v7536_v53 }
 0x1bc   : > { %v1988_v28 = vrot.slane %v1986_v2, 4  ;;  %v7573_v52 = vrot.slane %v2192_v22, %v6967_v19  ;;  %v2109_v35 = vshrl.u32 %v7532_v54, 16  ;;  %v2110_v55 = vshrl.u32 %v7547_v4, 16 }
 0x1bd   : > { %1754 = vrot.lane.b32.xlu0 %v6508_v58, %s6921_s20  ;;  %v2032_v59 = vrot.slane %v2030_v9, 4  ;;  %v6783_v21 = vcombine.high %v7552_v7, %v7552_v7  ;;  %v1688_v56 = vrot.slane %v1674_v12, %v6967_v19  ;;  %v7583_v36 = vrot.slane %v2193_v30, %v6967_v19 }
 0x1be   : > { %v2076_v10 = vrot.slane %v2074_v45, 4  ;;  %v2115_v39 = vshrl.u32 %v2029_v14, 16  ;;  %v2116_v50 = vshrl.u32 %v2073_v32, 16  ;;  %v1945_v43 = vor.u32 %v1944_v17, %v7500_v24 }
 0x1bf   : > { %1769 = vrot.lane.b32.xlu1 %v6511_v0, %s6921_s20  ;;  %v1948_v29 = vshll.u32 %v1898_v5, 16  ;;  %v1640_v13 = vcombine.high %v7514_v46, %v7503_v42  ;;  %v6514_v48 = vcombine.low %v1681_v20, %v1681_v20  ;;  %v1989_v31 = vor.u32 %v1988_v28, %v7509_v49 }
 0x1c0   : > { %v1992_v58 = vshll.u32 %v1903_v27, 16  ;;  %v2108_v34 = vpack.i.b16 %v7547_v4, %v7532_v54  ;;  %v2111_v57 = vpack.i.b16 %v2110_v55, %v2109_v35  ;;  %v2033_v60 = vor.u32 %v2032_v59, %v7522_v41 }
 0x1c1   : > { %1764 = vrot.lane.b32.xlu0 %v6780_v6, %s6920_s19  ;;  %v2036_v16 = vshll.u32 %v1908_v38, 16  ;;  %v6517_v24 = vcombine.low %v1688_v56, %v1688_v56  ;;  %v2114_v63 = vpack.i.b16 %v2073_v32, %v2029_v14  ;;  %v2077_v0 = vor.u32 %v2076_v10, %v7536_v53 }
 0x1c2   : > { %v2080_v42 = vshll.u32 %v1913_v51, 16  ;;  %v2117_v46 = vpack.i.b16 %v2116_v50, %v2115_v39  ;;  %v1946_v44 = vrot.slane %v1945_v43, 4  ;;  %v7597_v1 = vrot.slane %v1948_v29, 5 }
 0x1c3   : > { %1779 = vrot.lane.b32.xlu1 %v6782_v33, %s6920_s19  ;;  %v1952_v49 = vshrl.u32 %v1898_v5, 16  ;;  %v6784_v2 = vcombine.high %v1681_v20, %v1681_v20  ;;  %v7601_v54 = vrot.slane %v1640_v13, %v6967_v19  ;;  %v1990_v41 = vrot.slane %v1989_v31, 4  ;;  %v1909_v13 = vld [vmem:[%s6959_s17 + $0x38] sm:$0x1] }
 0x1c4   : > { %v1994_v26 = vrot.slane %v1992_v58, 5  ;;  %v1996_v6 = vshrl.u32 %v1903_v27, 16  ;;  %v2034_v61 = vrot.slane %v2033_v60, 4  ;;  %v2038_v22 = vrot.slane %v2036_v16, 5 }
 0x1c5   : > { %1774 = vrot.lane.b32.xlu0 %v6781_v18, %s6919_s18  ;;  %v2040_v30 = vshrl.u32 %v1908_v38, 16  ;;  %v6786_v53 = vcombine.high %v1688_v56, %v1688_v56  ;;  %v2078_v4 = vrot.slane %v2077_v0, 4  ;;  %v2082_v9 = vrot.slane %v2080_v42, 5  ;;  %v1899_v56 = vld [vmem:[%s6959_s17 + $0x10] sm:$0x1] }
 0x1c6   : > { %v2084_v12 = vshrl.u32 %v1913_v51, 16  ;;  %v7605_v33 = vrot.slane %v2108_v34, %v6961_v8  ;;  %v7608_v45 = vrot.slane %v2114_v63, %v6961_v8  ;;  %v2251_v14 = vrot.slane %v2111_v57, %v6961_v8  ;;  %v1904_v38 = vld [vmem:[%s6959_s17 + $0x24] sm:$0x1] }
 0x1c7   : > { %1789 = vrot.lane.b32.xlu1 %v6783_v21, %s6919_s18  ;;  %v2259_v17 = vrot.slane %v2117_v46, %v6961_v8  ;;  %v6785_v18 = vcombine.high %v7601_v54, %v7601_v54  ;;  %v6787_v20 = vcombine.high %v7556_v62, %v7556_v62  ;;  %v6789_v32 = vcombine.high %v7559_v3, %v7559_v3 }
 0x1c8   : > { %v1954_v5 = vrot.slane %v1952_v49, 4  ;;  %v1951_v28 = vsel %vm7383_vm5, %v1946_v44, %v7597_v1  ;;  %v1995_v35 = vsel %vm7383_vm5, %v1990_v41, %v1994_v26  ;;  %v2039_v55 = vsel %vm7383_vm5, %v2034_v61, %v2038_v22 }
 0x1c9   : > { %1784 = vrot.lane.b32.xlu0 %v6514_v48, %s6921_s20  ;;  %v1998_v27 = vrot.slane %v1996_v6, 4  ;;  %v6524_v59 = vcombine.low %v7573_v52, %v7573_v52  ;;  %v2083_v21 = vsel %vm7383_vm5, %v2078_v4, %v2082_v9  ;;  %v2042_v10 = vrot.slane %v2040_v30, 4  ;;  %v1914_v48 = vld [vmem:[%s6959_s17 + $0x4c] sm:$0x1] }
 0x1ca   : > { %v2086_v39 = vrot.slane %v2084_v12, 4  ;;  %v6527_v50 = vcombine.low %v7583_v36, %v7583_v36  ;;  %v6788_v51 = vcombine.high %v7573_v52, %v7573_v52  ;;  %v2226_v43 = vcombine.low %v7605_v33, %v7608_v45 }
 0x1cb   : > { %1799 = vrot.lane.b32.xlu1 %v6517_v24, %s6921_s20  ;;  %v2260_v29 = vcombine.low %v2251_v14, %v2259_v17  ;;  %v2121_v31 = vshrl.u32 %v1951_v28, 16  ;;  %v2122_v58 = vshrl.u32 %v1995_v35, 16  ;;  %v2127_v34 = vshrl.u32 %v2039_v55, 16 }
 0x1cc   : > { %v1955_v57 = vor.u32 %v1954_v5, %v7597_v1  ;;  %v2128_v60 = vshrl.u32 %v2083_v21, 16  ;;  %v1958_v16 = vshll.u32 %v1899_v56, 16  ;;  %v1999_v24 = vor.u32 %v1998_v27, %v1994_v26 }
 0x1cd   : > { %1794 = vrot.lane.b32.xlu0 %v6784_v2, %s6920_s19  ;;  %v2002_v63 = vshll.u32 %v1904_v38, 16  ;;  %v2043_v52 = vor.u32 %v2042_v10, %v2038_v22  ;;  %v2046_v0 = vshll.u32 %v1909_v13, 16  ;;  %v2087_v42 = vor.u32 %v2086_v39, %v2082_v9 }
 0x1ce   : > { %v2090_v46 = vshll.u32 %v1914_v48, 16  ;;  %v6790_v44 = vcombine.high %v7583_v36, %v7583_v36  ;;  %v7647_v49 = vrot.slane %v2226_v43, %v6967_v19  ;;  %v2268_v2 = vrot.slane %v2260_v29, %v6967_v19 }
 0x1cf   : > { %1809 = vrot.lane.b32.xlu1 %v6786_v53, %s6920_s19  ;;  %v2261_v41 = vcombine.high %v2251_v14, %v2259_v17  ;;  %v2120_v1 = vpack.i.b16 %v1995_v35, %v1951_v28  ;;  %v2126_v26 = vpack.i.b16 %v2083_v21, %v2039_v55  ;;  %v2123_v6 = vpack.i.b16 %v2122_v58, %v2121_v31 }
 0x1d0   : > { %v1956_v61 = vrot.slane %v1955_v57, 4  ;;  %v2129_v30 = vpack.i.b16 %v2128_v60, %v2127_v34  ;;  %v1960_v22 = vrot.slane %v1958_v16, 5  ;;  %v2000_v53 = vrot.slane %v1999_v24, 4  ;;  %v3375_v16 = vld [vmem:[%s6959_s17 + $0x4] sm:$0xf] }
 0x1d1   : > { %1804 = vrot.lane.b32.xlu0 %v6785_v18, %s6919_s18  ;;  %v2004_v4 = vrot.slane %v2002_v63, 5  ;;  %v2044_v9 = vrot.slane %v2043_v52, 4  ;;  %v2048_v36 = vrot.slane %v2046_v0, 5  ;;  %v2088_v12 = vrot.slane %v2087_v42, 4 }
 0x1d2   : > { %v2092_v18 = vrot.slane %v2090_v46, 5  ;;  %v6791_v14 = vcombine.high %v7647_v49, %v7647_v49  ;;  %v2275_v17 = vrot.slane %v2261_v41, %v6967_v19  ;;  %v2293_v5 = vrot.slane %v2126_v26, %v6961_v8  ;;  %v3374_v46 = vld [vmem:[%s6959_s17] sm:$0xf] }
 0x1d3   : > { %2422 = vrot.lane.b32.xlu1 %v6787_v20, %s6919_s18  ;;  %v2285_v20 = vrot.slane %v2120_v1, %v6961_v8  ;;  %v6530_v28 = vcombine.low %v2268_v2, %v2268_v2  ;;  %v2227_v35 = vcombine.high %v7605_v33, %v7608_v45  ;;  %v2319_v55 = vrot.slane %v2123_v6, %v6961_v8 }
 0x1d4   : > { %v1961_v27 = vsel %vm7383_vm5, %v1956_v61, %v1960_v22  ;;  %v2005_v21 = vsel %vm7383_vm5, %v2000_v53, %v2004_v4  ;;  %v2049_v56 = vsel %vm7383_vm5, %v2044_v9, %v2048_v36  ;;  %v2093_v38 = vsel %vm7383_vm5, %v2088_v12, %v2092_v18  ;;  %v3380_v61 = vld [vmem:[%s6959_s17 + $0x18] sm:$0xf]  ;;  %v3379_v36 = vld [vmem:[%s6959_s17 + $0x14] sm:$0xf] }
 0x1d5   : > { %2417 = vrot.lane.b32.xlu0 %v6524_v59, %s6921_s20  ;;  %v2327_v59 = vrot.slane %v2129_v30, %v6961_v8  ;;  %v6533_v33 = vcombine.low %v2275_v17, %v2275_v17  ;;  %v2294_v45 = vcombine.low %v2285_v20, %v2293_v5  ;;  %v2133_v10 = vshrl.u32 %v1961_v27, 16 }
 0x1d6   : > { %v2134_v39 = vshrl.u32 %v2005_v21, 16  ;;  %v7674_v43 = vrot.slane %v2227_v35, %v6967_v19  ;;  %v2132_v48 = vpack.i.b16 %v2005_v21, %v1961_v27  ;;  %v2138_v31 = vpack.i.b16 %v2093_v38, %v2049_v56  ;;  %v7716_v35 = vld [vmem:[%s6959_s17 + $0x8] sm:$0xf] }
 0x1d7   : > { %2432 = vrot.lane.b32.xlu1 %v6527_v50, %s6921_s20  ;;  %v2139_v50 = vshrl.u32 %v2049_v56, 16  ;;  %v2328_v29 = vcombine.low %v2319_v55, %v2327_v59  ;;  %v2329_v13 = vcombine.high %v2319_v55, %v2327_v59  ;;  %v6794_v58 = vcombine.high %v2275_v17, %v2275_v17  ;;  %v3385_v56 = vld [vmem:[%s6959_s17 + $0x2c] sm:$0xf] }
 0x1d8   : > { %v7678_v34 = vrot.slane %v2294_v45, %v6967_v19  ;;  %v2135_v57 = vpack.i.b16 %v2134_v39, %v2133_v10  ;;  %v6793_v24 = vcombine.high %v7674_v43, %v7674_v43  ;;  %v7687_v0 = vrot.slane %v2132_v48, %v6961_v8 }
 0x1d9   : > { %2427 = vrot.lane.b32.xlu0 %v6788_v51, %s6920_s19  ;;  %v6792_v51 = vcombine.high %v2268_v2, %v2268_v2  ;;  %v2336_v63 = vrot.slane %v2328_v29, %v6967_v19  ;;  %v2343_v52 = vrot.slane %v2329_v13, %v6967_v19  ;;  %v7690_v42 = vrot.slane %v2138_v31, %v6961_v8  ;;  %v7732_v29 = vld [vmem:[%s6959_s17 + $0x1c] sm:$0xf] }
 0x1da   : > { %9787 = vst [vmem:[#allocation5_spill] sm:$0xff] %v7687_v0  ;;  %v3404_v2 = vshll.u32 %v3375_v16, 16  ;;  %v3408_v41 = vshrl.u32 %v3375_v16, 16  ;;  %v2295_v1 = vcombine.high %v2285_v20, %v2293_v5  ;;  %v7697_v26 = vrot.slane %v2135_v57, %v6961_v8  ;;  %v3390_v16 = vld [vmem:[%s6959_s17 + $0x40] sm:$0xf] }
 0x1db   : > { %2442 = vrot.lane.b32.xlu1 %v6790_v44, %s6920_s19  ;;  %9788 = vst [vmem:[#allocation6_spill] sm:$0xff] %v7690_v42  ;;  %v6795_v44 = vcombine.high %v7678_v34, %v7678_v34  ;;  %v6536_v30 = vcombine.low %v2336_v63, %v2336_v63  ;;  %v3395_v22 = vshrl.u32 %v3374_v46, 16  ;;  %v3398_v53 = vshll.u32 %v3374_v46, 16 }
 0x1dc   : > { %9789 = vst [vmem:[#allocation7_spill] sm:$0xff] %v7697_v26  ;;  %v6539_v4 = vcombine.low %v2343_v52, %v2343_v52  ;;  %v2362_v9 = vcombine.low %v7687_v0, %v7690_v42  ;;  %v7708_v12 = vrot.slane %v3404_v2, 5  ;;  %v3410_v18 = vrot.slane %v3408_v41, 4 }
 0x1dd   : > { %2437 = vrot.lane.b32.xlu0 %v6789_v32, %s6919_s18  ;;  %v2140_v32 = vshrl.u32 %v2093_v38, 16  ;;  %v3452_v17 = vshrl.u32 %v3380_v61, 16  ;;  %v6796_v20 = vcombine.high %v2336_v63, %v2336_v63  ;;  %v7711_v5 = vrot.slane %v2295_v1, %v6967_v19  ;;  %v3389_v1 = vld [vmem:[%s6959_s17 + $0x3c] sm:$0xf] }
 0x1de   : > { %v3397_v55 = vrot.slane %v3395_v22, 4  ;;  %v3400_v27 = vrot.slane %v3398_v53, 5  ;;  %v3439_v59 = vshrl.u32 %v3379_v36, 16  ;;  %v3442_v21 = vshll.u32 %v3379_v36, 16 }
 0x1df   : > { %2452 = vrot.lane.b32.xlu1 %v6791_v14, %s6919_s18  ;;  %v2141_v60 = vpack.i.b16 %v2140_v32, %v2139_v50  ;;  %v3448_v14 = vshll.u32 %v3380_v61, 16  ;;  %v6798_v38 = vcombine.high %v2343_v52, %v2343_v52  ;;  %v3411_v45 = vor.u32 %v3410_v18, %v7708_v12  ;;  %v3384_v32 = vld [vmem:[%s6959_s17 + $0x28] sm:$0xf]  ;;  %v7751_v18 = vld [vmem:[%s6959_s17 + $0x30] sm:$0xf] }
 0x1e0   : > { %v3414_v10 = vshll.u32 %v7716_v35, 16  ;;  %v3454_v50 = vrot.slane %v3452_v17, 4  ;;  %v3492_v13 = vshll.u32 %v3385_v56, 16  ;;  %v3496_v48 = vshrl.u32 %v3385_v56, 16 }
 0x1e1   : > { %2447 = vrot.lane.b32.xlu0 %v6530_v28, %s6921_s20  ;;  %v7700_v6 = vrot.slane %v2141_v60, %v6961_v8  ;;  %v7726_v39 = vrot.slane %v3448_v14, 5  ;;  %v3441_v57 = vrot.slane %v3439_v59, 4  ;;  %v3444_v60 = vrot.slane %v3442_v21, 5  ;;  %v5402_v8 = vld [vmem:[%s6959_s17 + $0x4] sm:$0xf] }
 0x1e2   : > { %v3483_v63 = vshrl.u32 %v3384_v32, 16  ;;  %v3486_v52 = vshll.u32 %v3384_v32, 16  ;;  %v3412_v46 = vrot.slane %v3411_v45, 4  ;;  %v3458_v41 = vshll.u32 %v7732_v29, 16 }
 0x1e3   : > { %2462 = vrot.lane.b32.xlu1 %v6533_v33, %s6921_s20  ;;  %9790 = vst [vmem:[#allocation8_spill] sm:$0xff] %v7700_v6  ;;  %v2396_v28 = vcombine.low %v7697_v26, %v7700_v6  ;;  %v7721_v33 = vrot.slane %v2362_v9, %v6967_v19  ;;  %v3455_v2 = vor.u32 %v3454_v50, %v7726_v39  ;;  %v3494_v61 = vrot.slane %v3492_v13, 5  ;;  %v7765_v50 = vld [vmem:[%s6959_s17 + $0x44] sm:$0xf] }
 0x1e4   : > { %v3536_v22 = vshll.u32 %v3390_v16, 16  ;;  %v3540_v53 = vshrl.u32 %v3390_v16, 16  ;;  %v3445_v36 = vor.u32 %v3444_v60, %v3441_v57  ;;  %v3485_v14 = vrot.slane %v3483_v63, 4 }
 0x1e5   : > { %2457 = vrot.lane.b32.xlu0 %v6792_v51, %s6920_s19  ;;  %9791 = vst [vmem:[#allocation9_spill] sm:$0xff] %v7721_v33  ;;  %v6797_v51 = vcombine.high %v7711_v5, %v7711_v5  ;;  %v7736_v31 = vrot.slane %v2396_v28, %v6967_v19  ;;  %v3488_v17 = vrot.slane %v3486_v52, 5  ;;  %v3530_v28 = vshll.u32 %v3389_v1, 16 }
 0x1e6   : > { %v7757_v59 = vrot.slane %v3458_v41, 5  ;;  %v3502_v56 = vshll.u32 %v7751_v18, 16  ;;  %v3542_v45 = vrot.slane %v3540_v53, 4  ;;  %v3446_v32 = vrot.slane %v3445_v36, 4 }
 0x1e7   : > { %2472 = vrot.lane.b32.xlu1 %v6794_v58, %s6920_s19  ;;  %9792 = vst [vmem:[#allocation10_spill] sm:$0xff] %v7736_v31  ;;  %v3401_v58 = vor.u32 %v3400_v27, %v3397_v55  ;;  %v3456_v27 = vrot.slane %v3455_v2, 4 }
 0x1e8   : > { %v7771_v60 = vrot.slane %v3502_v56, 5  ;;  %v3451_v63 = vsel %vm7383_vm5, %v3446_v32, %v7726_v39  ;;  %v4755_v39 = vld [vmem:[%s6959_s17 + $0x18] sm:$0xf]  ;;  %v7814_v32 = vld [vmem:[%s6959_s17 + $0x40] sm:$0xf] }
 0x1e9   : > { %2467 = vrot.lane.b32.xlu0 %v6793_v24, %s6919_s18  ;;  %v6799_v24 = vcombine.high %v7721_v33, %v7721_v33  ;;  %v3402_v9 = vrot.slane %v3401_v58, 4  ;;  %v3461_v58 = vsel %vm7383_vm5, %v3456_v27, %v7757_v59  ;;  %v4760_v27 = vld [vmem:[%s6959_s17 + $0x2c] sm:$0xf] }
 0x1eb   : > { %2482 = vrot.lane.b32.xlu1 %v6795_v44, %s6919_s18  ;;  %v7742_v44 = vrot.slane %v3414_v10, 5  ;;  %v3407_v10 = vsel %vm7383_vm5, %v3402_v9, %v7708_v12  ;;  %v3546_v12 = vshll.u32 %v7765_v50, 16  ;;  %v4749_v9 = vld [vmem:[%s6959_s17] sm:$0xe] }
 0x1ec   : > { %v6640_v56 = vrot.slane %v4749_v9, 9 }
 0x1ed   : > { %2477 = vrot.lane.b32.xlu0 %v6536_v30, %s6921_s20  ;;  %v3498_v30 = vrot.slane %v3496_v48, 4  ;;  %v3417_v55 = vsel %vm7383_vm5, %v3412_v46, %v7742_v44  ;;  %v3532_v48 = vrot.slane %v3530_v28, 5  ;;  %v2623_v28 = vld [vmem:[%s6959_s17 + $0x4] sm:$0xf] }
 0x1ef   : > { %2492 = vrot.lane.b32.xlu1 %v6539_v4, %s6921_s20  ;;  %v6542_v4 = vcombine.low %v7736_v31, %v7736_v31  ;;  %v3499_v21 = vor.u32 %v3498_v30, %v3494_v61 }
 0x1f1   : > { %2487 = vrot.lane.b32.xlu0 %v6796_v20, %s6920_s19  ;;  %v3527_v20 = vshrl.u32 %v3389_v1, 16  ;;  %v3500_v57 = vrot.slane %v3499_v21, 4  ;;  %v7783_v1 = vrot.slane %v3546_v12, 5  ;;  %v7824_v12 = vld [vmem:[%s6959_s17 + $0x30] sm:$0xf] }
 0x1f3   : > { %2502 = vrot.lane.b32.xlu1 %v6798_v38, %s6920_s19  ;;  %v3538_v38 = vrot.slane %v3536_v22, 5  ;;  %v3529_v13 = vrot.slane %v3527_v20, 4  ;;  %v3505_v2 = vsel %vm7383_vm5, %v3500_v57, %v7771_v60  ;;  %v7787_v22 = vld [vmem:[%s6959_s17 + $0x8] sm:$0xf]  ;;  %v4804_v20 = vrot.slane %v4755_v39, 5 }
 0x1f4   : > { %v4817_v57 = vrot.slane %v4760_v27, 5  ;;  %v2627_v39 = vld [vmem:[%s6959_s17 + $0x14] sm:$0xf]  ;;  %v9722_v27 = vrot.slane %v7824_v12, 5 }
 0x1f5   : > { %2497 = vrot.lane.b32.xlu0 %v6797_v51, %s6919_s18  ;;  %v3489_v51 = vor.u32 %v3488_v17, %v3485_v14  ;;  %v3543_v16 = vor.u32 %v3542_v45, %v3538_v38  ;;  %v3533_v46 = vor.u32 %v3532_v48, %v3529_v13  ;;  %v9718_v17 = vrot.slane %v7787_v22, 5  ;;  %v2622_v45 = vld [vmem:[%s6959_s17] sm:$0xf] }
 0x1f6   : > { %v2656_v13 = vshrl.u32 %v2623_v28, 16 }
 0x1f7   : > { %2512 = vrot.lane.b32.xlu1 %v6799_v24, %s6919_s18  ;;  %v4750_v24 = vld [vmem:[%s6959_s17 + $0x4] sm:$0xf]  ;;  %v3490_v52 = vrot.slane %v3489_v51, 4  ;;  %v3544_v41 = vrot.slane %v3543_v16, 4  ;;  %v2652_v51 = vshll.u32 %v2623_v28, 16  ;;  %v4819_v28 = vrot.slane %v4817_v57, 4 }
 0x1f8   : > { %v4791_v30 = vrot.slane %v4750_v24, 5  ;;  %v2628_v16 = vld [vmem:[%s6959_s17 + $0x18] sm:$0xf]  ;;  %v2643_v24 = vshrl.u32 %v2622_v45, 16  ;;  %v2658_v9 = vrot.slane %v2656_v13, 4 }
 0x1f9   : > { %2507 = vrot.lane.b32.xlu0 %v6542_v4, %s6921_s20  ;;  %v3495_v53 = vsel %vm7383_vm5, %v3490_v52, %v3494_v61  ;;  %v3534_v4 = vrot.slane %v3533_v46, 4  ;;  %v3549_v36 = vsel %vm7383_vm5, %v3544_v41, %v7783_v1  ;;  %v4830_v41 = vrot.slane %v7814_v32, 5 }
 0x1fa   : > { %v4793_v14 = vrot.slane %v4791_v30, 4  ;;  %v4792_v52 = vsel %vm7800_vm8, %v6640_v56, %v4791_v30  ;;  %v2645_v56 = vrot.slane %v2643_v24, 4  ;;  %v2690_v32 = vshll.u32 %v2627_v39, 16 }
 0x1fb   : > { %3572 = vrot.lane.b32.xlu1 %v3417_v55, %s6923_s22  ;;  %v7805_v55 = vld [vmem:[%s6959_s17 + $0x1c] sm:$0xf]  ;;  %v3539_v21 = vsel %vm7383_vm5, %v3534_v4, %v3538_v38  ;;  %v7835_v4 = vrot.slane %v2652_v51, 5  ;;  %v2633_v51 = vld [vmem:[%s6959_s17 + $0x2c] sm:$0xf] }
 0x1fc   : > { %v4795_v48 = vsel %vm7800_vm8, %v4793_v14, %v9718_v17  ;;  %v9717_v38 = vrot.slane %v7805_v55, 5  ;;  %v2700_v14 = vshrl.u32 %v2628_v16, 16  ;;  %v2692_v31 = vrot.slane %v2690_v32, 5 }
 0x1fd   : > { %3570 = vrot.lane.b32.xlu0 %v3407_v10, %s6923_s22  ;;  %v4754_v10 = vld [vmem:[%s6959_s17 + $0x14] sm:$0xe] }
 0x1fe   : > { %v6641_v46 = vrot.slane %v4754_v10, 9  ;;  %v2687_v10 = vshrl.u32 %v2627_v39, 16  ;;  %v2702_v17 = vrot.slane %v2700_v14, 4  ;;  %v2632_v39 = vld [vmem:[%s6959_s17 + $0x28] sm:$0xf] }
 0x1ff   : > { %3580 = vrot.lane.b32.xlu1 %v3461_v58, %s6923_s22  ;;  %v4806_v58 = vrot.slane %v4804_v20, 4  ;;  %v2734_v42 = vshll.u32 %v2632_v39, 16 }
 0x200   : > { %v4805_v13 = vsel %vm7800_vm8, %v6641_v46, %v4804_v20  ;;  %v4821_v20 = vsel %vm7800_vm8, %v4819_v28, %v9722_v27  ;;  %v7862_v46 = vld [vmem:[%s6959_s17 + $0x1c] sm:$0xf]  ;;  %v2689_v33 = vrot.slane %v2687_v10, 4  ;;  %v2731_v27 = vshrl.u32 %v2632_v39, 16 }
 0x201   : > { %3578 = vrot.lane.b32.xlu0 %v3451_v63, %s6923_s22  ;;  %v2646_v63 = vshll.u32 %v2622_v45, 16  ;;  %v4808_v30 = vsel %vm7800_vm8, %v4806_v58, %v9717_v38  ;;  %v4764_v38 = vld [vmem:[%s6959_s17 + $0x3c] sm:$0xe]  ;;  %v2744_v58 = vshrl.u32 %v2633_v51, 16  ;;  %v2736_v39 = vrot.slane %v2734_v42, 5 }
 0x203   : > { %3588 = vrot.lane.b32.xlu1 %v3505_v2, %s6923_s22  ;;  %v4759_v2 = vld [vmem:[%s6959_s17 + $0x28] sm:$0xe]  ;;  %v2648_v45 = vrot.slane %v2646_v63, 5 }
 0x205   : > { %3586 = vrot.lane.b32.xlu0 %v3495_v53, %s6923_s22  ;;  %v7833_v53 = vld [vmem:[%s6959_s17 + $0x44] sm:$0xf] }
 0x206   : > { %v9795_v0 = vrot.slane %v7833_v53, 5 }
 0x207   : > { %3596 = vrot.lane.b32.xlu1 %v3549_v36, %s6923_s22  ;;  %v2696_v36 = vshll.u32 %v2628_v16, 16  ;;  %v4832_v16 = vrot.slane %v4830_v41, 4 }
 0x209   : > { %3594 = vrot.lane.b32.xlu0 %v3539_v21, %s6923_s22  ;;  %v7843_v21 = vld [vmem:[%s6959_s17 + $0x8] sm:$0xf]  ;;  %v7854_v63 = vrot.slane %v2696_v36, 5  ;;  %v2638_v36 = vld [vmem:[%s6959_s17 + $0x40] sm:$0xf]  ;;  %v4834_v28 = vsel %vm7800_vm8, %v4832_v16, %v9795_v0 }
 0x20a   : > { %v2662_v24 = vshll.u32 %v7843_v21, 16  ;;  %v2784_v32 = vshll.u32 %v2638_v36, 16 }
 0x20b   : > { %4843 = vrot.lane.b32.xlu1 %v4795_v48, %s6922_s21  ;;  %v6642_v48 = vrot.slane %v4759_v2, 9  ;;  %v2740_v2 = vshll.u32 %v2633_v51, 16 }
 0x20d   : > { %4841 = vrot.lane.b32.xlu0 %v4792_v52, %s6922_s21  ;;  %v2659_v52 = vor.u32 %v2658_v9, %v7835_v4  ;;  %v2649_v9 = vor.u32 %v2648_v45, %v2645_v56  ;;  %v4818_v14 = vsel %vm7800_vm8, %v6642_v48, %v4817_v57  ;;  %v2706_v56 = vshll.u32 %v7862_v46, 16  ;;  %v2637_v45 = vld [vmem:[%s6959_s17 + $0x3c] sm:$0xf] }
 0x20e   : > { %v7878_v10 = vrot.slane %v2740_v2, 5  ;;  %v2746_v57 = vrot.slane %v2744_v58, 4  ;;  %v2788_v48 = vshrl.u32 %v2638_v36, 16  ;;  %v2778_v6 = vshll.u32 %v2637_v45, 16 }
 0x20f   : > { %4851 = vrot.lane.b32.xlu1 %v4808_v30, %s6922_s21  ;;  %v6643_v30 = vrot.slane %v4764_v38, 9  ;;  %v2660_v51 = vrot.slane %v2659_v52, 4  ;;  %v2703_v38 = vor.u32 %v2702_v17, %v7854_v63  ;;  %v2650_v16 = vrot.slane %v2649_v9, 4 }
 0x210   : > { %v2693_v52 = vor.u32 %v2692_v31, %v2689_v33  ;;  %v2733_v17 = vrot.slane %v2731_v27, 4  ;;  %v7894_v31 = vrot.slane %v2784_v32, 5  ;;  %v7897_v27 = vld [vmem:[%s6959_s17 + $0x44] sm:$0xf]  ;;  %v2790_v42 = vrot.slane %v2788_v48, 4 }
 0x211   : > { %4849 = vrot.lane.b32.xlu0 %v4805_v13, %s6922_s21  ;;  %v7873_v13 = vrot.slane %v2662_v24, 5  ;;  %v4831_v0 = vsel %vm7800_vm8, %v6643_v30, %v4830_v41  ;;  %v7884_v24 = vld [vmem:[%s6959_s17 + $0x30] sm:$0xf]  ;;  %v2704_v36 = vrot.slane %v2703_v38, 4  ;;  %v2747_v41 = vor.u32 %v2746_v57, %v7878_v10 }
 0x212   : > { %v2750_v33 = vshll.u32 %v7884_v24, 16  ;;  %v2655_v9 = vsel %vm7383_vm5, %v2650_v16, %v7835_v4  ;;  %v2794_v57 = vshll.u32 %v7897_v27, 16 }
 0x213   : > { %4859 = vrot.lane.b32.xlu1 %v4821_v20, %s6922_s21  ;;  %v2775_v20 = vshrl.u32 %v2637_v45, 16  ;;  %v2665_v2 = vsel %vm7383_vm5, %v2660_v51, %v7873_v13  ;;  %v2737_v51 = vor.u32 %v2736_v39, %v2733_v17  ;;  %v2748_v48 = vrot.slane %v2747_v41, 4 }
 0x214   : > { %v7908_v19 = vrot.slane %v2750_v33, 5 }
 0x215   : > { %v1700_v26 = vpop.permute.xlu1 %1699  ;;  %4857 = vrot.lane.b32.xlu0 %v4818_v14, %s6922_s21  ;;  %v7890_v14 = vrot.slane %v2706_v56, 5  ;;  %v2777_v38 = vrot.slane %v2775_v20, 4  ;;  %v2780_v56 = vrot.slane %v2778_v6, 5 }
 0x217   : > { %4867 = vrot.lane.b32.xlu1 %v4834_v28, %s6922_s21  ;;  %v1695_v58 = vpop.permute.xlu0 %1694  ;;  %v2694_v28 = vrot.slane %v2693_v52, 4  ;;  %v2709_v32 = vsel %vm7383_vm5, %v2704_v36, %v7890_v14  ;;  %v2738_v52 = vrot.slane %v2737_v51, 4  ;;  %v2781_v17 = vor.u32 %v2780_v56, %v2777_v38  ;;  %v5401_v51 = vld [vmem:[%s6959_s17] sm:$0xe]  ;;  %v7941_v56 = vld [vmem:[%s6959_s17 + $0x2c] sm:$0xf] }
 0x218   : > { %v1813_v4 = vsel %vm628_vm0, %v7367_v37, %v1695_v58  ;;  %v5443_v37 = vrot.slane %v5402_v8, 5  ;;  %v5407_v8 = vld [vmem:[%s6959_s17 + $0x18] sm:$0xf] }
 0x219   : > { %v1710_v30 = vpop.permute.xlu1 %1709  ;;  %4865 = vrot.lane.b32.xlu0 %v4831_v0, %s6922_s21  ;;  %v2791_v0 = vor.u32 %v2790_v42, %v7894_v31  ;;  %v2699_v6 = vsel %vm7383_vm5, %v2694_v28, %v7854_v63  ;;  %v1815_v58 = vsel %vm632_vm1, %v1813_v4, %v1700_v26  ;;  %v2753_v63 = vsel %vm7383_vm5, %v2748_v48, %v7908_v19 }
 0x21a   : > { %v1820_v39 = vsel %vm628_vm0, %v7411_v15, %v1710_v30  ;;  %v7932_v30 = vld [vmem:[%s6959_s17 + $0x8] sm:$0xf]  ;;  %v2782_v28 = vrot.slane %v2781_v17, 4  ;;  %v6672_v4 = vrot.slane %v5401_v51, 9  ;;  %v5469_v17 = vrot.slane %v7941_v56, 5 }
 0x21b   : > { %v1705_v45 = vpop.permute.xlu0 %1704  ;;  %2820 = vrot.lane.b32.xlu1 %v2665_v2, %s6922_s21  ;;  %v7921_v2 = vrot.slane %v2794_v57, 5  ;;  %v2792_v41 = vrot.slane %v2791_v0, 4  ;;  %v9730_v48 = vrot.slane %v7932_v30, 5  ;;  %v5456_v0 = vrot.slane %v5407_v8, 5  ;;  %v7973_v51 = vld [vmem:[%s6959_s17 + $0x40] sm:$0xf] }
 0x21c   : > { %v1817_v15 = vsel %vm635_vm2, %v1815_v58, %v1705_v45  ;;  %v3377_v45 = vld [vmem:[%s6959_s17 + $0xc] sm:$0xf]  ;;  %v3462_v8 = vshrl.u32 %v7732_v29, 16  ;;  %v5444_v56 = vsel %vm7800_vm8, %v6672_v4, %v5443_v37 }
 0x21d   : > { %v1720_v16 = vpop.permute.xlu1 %1719  ;;  %2818 = vrot.lane.b32.xlu0 %v2655_v9, %s6922_s21  ;;  %v2743_v9 = vsel %vm7383_vm5, %v2738_v52, %v7878_v10  ;;  %v2797_v57 = vsel %vm7383_vm5, %v2792_v41, %v7921_v2  ;;  %v5406_v52 = vld [vmem:[%s6959_s17 + $0x14] sm:$0xe] }
 0x21f   : > { %v1715_v20 = vpop.permute.xlu0 %1714  ;;  %2828 = vrot.lane.b32.xlu1 %v2709_v32, %s6922_s21  ;;  %v5445_v32 = vrot.slane %v5443_v37, 4 }
 0x220   : > { %v1822_v36 = vsel %vm632_vm1, %v1820_v39, %v1715_v20  ;;  %v3424_v39 = vshll.u32 %v3377_v45, 16  ;;  %v3428_v20 = vshrl.u32 %v3377_v45, 16  ;;  %v5411_v45 = vld [vmem:[%s6959_s17 + $0x28] sm:$0xe] }
 0x221   : > { %v1824_v33 = vsel %vm635_vm2, %v1822_v36, %v1720_v16  ;;  %v1730_v42 = vpop.permute.xlu1 %1729  ;;  %2826 = vrot.lane.b32.xlu0 %v2699_v6, %s6922_s21  ;;  %v7950_v16 = vld [vmem:[%s6959_s17 + $0x1c] sm:$0xf]  ;;  %v2787_v6 = vsel %vm7383_vm5, %v2782_v28, %v7894_v31  ;;  %v5447_v36 = vsel %vm7800_vm8, %v5445_v32, %v9730_v48  ;;  %v3382_v31 = vld [vmem:[%s6959_s17 + $0x20] sm:$0xf]  ;;  %v6673_v28 = vrot.slane %v5406_v52, 9 }
 0x222   : > { %v6520_v26 = vcombine.low %v1817_v15, %v1824_v33  ;;  %9796 = vst [vmem:[#allocation11_spill] sm:$0xff] %v7950_v16  ;;  %v9731_v41 = vrot.slane %v7950_v16, 5  ;;  %v7964_v15 = vld [vmem:[%s6959_s17 + $0x30] sm:$0xf]  ;;  %v3418_v33 = vshrl.u32 %v7716_v35, 16  ;;  %v7978_v32 = vrot.slane %v3424_v39, 5 }
 0x223   : > { %v1725_v38 = vpop.permute.xlu0 %1724  ;;  %2836 = vrot.lane.b32.xlu1 %v2753_v63, %s6922_s21  ;;  %v5458_v63 = vrot.slane %v5456_v0, 4  ;;  %9797 = vst [vmem:[#allocation12_spill] sm:$0xff] %v7964_v15  ;;  %v3430_v35 = vrot.slane %v3428_v20, 4  ;;  %v3472_v52 = vshrl.u32 %v3382_v31, 16 }
 0x224   : > { %1891 = vst [vmem:[#allocation2 + $0x20] sm:$0x33] %v6520_v26  ;;  %v1827_v26 = vsel %vm628_vm0, %v7418_v25, %v1725_v38  ;;  %v3378_v38 = vld [vmem:[%s6959_s17 + $0x10] sm:$0x1] }
 0x225   : > { %v1740_v10 = vpop.permute.xlu1 %1739  ;;  %2834 = vrot.lane.b32.xlu0 %v2743_v9, %s6922_s21  ;;  %v1829_v37 = vsel %vm632_vm1, %v1827_v26, %v1730_v42  ;;  %v5460_v39 = vsel %vm7800_vm8, %v5458_v63, %v9731_v41  ;;  %v5457_v42 = vsel %vm7800_vm8, %v6673_v28, %v5456_v0  ;;  %v3420_v63 = vrot.slane %v3418_v33, 4 }
 0x226   : > { %v1834_v29 = vsel %vm628_vm0, %v7470_v11, %v1740_v10  ;;  %v5482_v11 = vrot.slane %v7973_v51, 5  ;;  %v3387_v10 = vld [vmem:[%s6959_s17 + $0x34] sm:$0xf]  ;;  %v3431_v51 = vor.u32 %v3430_v35, %v7978_v32  ;;  %v3434_v41 = vshll.u32 %v3378_v38, 16 }
 0x227   : > { %v1735_v58 = vpop.permute.xlu0 %1734  ;;  %2844 = vrot.lane.b32.xlu1 %v2797_v57, %s6922_s21  ;;  %v5471_v57 = vrot.slane %v5469_v17, 4  ;;  %v9798_v0 = vrot.slane %v7964_v15, 5  ;;  %v3506_v35 = vshrl.u32 %v7751_v18, 16 }
 0x228   : > { %v1831_v20 = vsel %vm635_vm2, %v1829_v37, %v1735_v58  ;;  %v3512_v37 = vshll.u32 %v3387_v10, 16  ;;  %v5484_v33 = vrot.slane %v5482_v11, 4 }
 0x229   : > { %v1750_v9 = vpop.permute.xlu1 %1749  ;;  %2842 = vrot.lane.b32.xlu0 %v2787_v6, %s6922_s21  ;;  %v3468_v6 = vshll.u32 %v3382_v31, 16  ;;  %v7999_v31 = vld [vmem:[%s6959_s17 + $0x44] sm:$0xf]  ;;  %v5473_v28 = vsel %vm7800_vm8, %v5471_v57, %v9798_v0 }
 0x22b   : > { %v1745_v48 = vpop.permute.xlu0 %1744  ;;  %5495 = vrot.lane.b32.xlu1 %v5447_v36, %s6923_s22  ;;  %v8004_v58 = vrot.slane %v3468_v6, 5 }
 0x22c   : > { %v1836_v4 = vsel %vm632_vm1, %v1834_v29, %v1745_v48  ;;  %v6674_v48 = vrot.slane %v5411_v45, 9  ;;  %v5416_v29 = vld [vmem:[%s6959_s17 + $0x3c] sm:$0xe]  ;;  %v8020_v45 = vrot.slane %v3512_v37, 5 }
 0x22d   : > { %v1838_v36 = vsel %vm635_vm2, %v1836_v4, %v1750_v9  ;;  %v1760_v25 = vpop.permute.xlu1 %1759  ;;  %5493 = vrot.lane.b32.xlu0 %v5444_v56, %s6923_s22  ;;  %v3383_v9 = vld [vmem:[%s6959_s17 + $0x24] sm:$0x1]  ;;  %v3474_v56 = vrot.slane %v3472_v52, 4  ;;  %v3516_v4 = vshrl.u32 %v3387_v10, 16  ;;  %v6675_v52 = vrot.slane %v5416_v29, 9 }
 0x22e   : > { %v6521_v26 = vcombine.low %v1831_v20, %v1838_v36  ;;  %v5470_v6 = vsel %vm7800_vm8, %v6674_v48, %v5469_v17  ;;  %v3392_v10 = vld [vmem:[%s6959_s17 + $0x48] sm:$0xf]  ;;  %v3421_v20 = vor.u32 %v3420_v63, %v7742_v44  ;;  %v3432_v36 = vrot.slane %v3431_v51, 4 }
 0x22f   : > { %v1755_v16 = vpop.permute.xlu0 %1754  ;;  %5503 = vrot.lane.b32.xlu1 %v5460_v39, %s6923_s22  ;;  %v3464_v39 = vrot.slane %v3462_v8, 4  ;;  %v3478_v57 = vshll.u32 %v3383_v9, 16  ;;  %v3475_v18 = vor.u32 %v3474_v56, %v8004_v58  ;;  %v3518_v15 = vrot.slane %v3516_v4, 4  ;;  %v3388_v8 = vld [vmem:[%s6959_s17 + $0x38] sm:$0x1] }
 0x230   : > { %1892 = vst [vmem:[#allocation2 + $0x28] sm:$0x33] %v6521_v26  ;;  %v3436_v26 = vrot.slane %v3434_v41, 5  ;;  %v3556_v48 = vshll.u32 %v3392_v10, 16  ;;  %v3560_v29 = vshrl.u32 %v3392_v10, 16  ;;  %v3550_v44 = vshrl.u32 %v7765_v50, 16 }
 0x231   : > { %v1770_v38 = vpop.permute.xlu1 %1769  ;;  %5501 = vrot.lane.b32.xlu0 %v5457_v42, %s6923_s22  ;;  %v9799_v42 = vrot.slane %v7999_v31, 5  ;;  %v1841_v41 = vsel %vm628_vm0, %v7485_v23, %v1755_v16  ;;  %v5483_v51 = vsel %vm7800_vm8, %v6675_v52, %v5482_v11  ;;  %v3465_v9 = vor.u32 %v3464_v39, %v7757_v59 }
 0x232   : > { %v3422_v56 = vrot.slane %v3421_v20, 4  ;;  %v3437_v37 = vsel %vm7383_vm5, %v3432_v36, %v3436_v26  ;;  %v3480_v4 = vrot.slane %v3478_v57, 5  ;;  %v1848_v50 = vsel %vm628_vm0, %v7540_v40, %v1770_v38  ;;  %v3393_v38 = vld [vmem:[%s6959_s17 + $0x4c] sm:$0x1] }
 0x233   : > { %v1765_v0 = vpop.permute.xlu0 %1764  ;;  %5511 = vrot.lane.b32.xlu1 %v5473_v28, %s6923_s22  ;;  %v5486_v17 = vsel %vm7800_vm8, %v5484_v33, %v9799_v42  ;;  %v3508_v28 = vrot.slane %v3506_v35, 4  ;;  %v3476_v23 = vrot.slane %v3475_v18, 4  ;;  %v3519_v16 = vor.u32 %v3518_v15, %v8020_v45 }
 0x234   : > { %v1843_v11 = vsel %vm632_vm1, %v1841_v41, %v1760_v25  ;;  %v8042_v52 = vrot.slane %v3556_v48, 5  ;;  %v3562_v39 = vrot.slane %v3560_v29, 4  ;;  %v3466_v40 = vrot.slane %v3465_v9, 4 }
 0x235   : > { %v1780_v63 = vpop.permute.xlu1 %1779  ;;  %5509 = vrot.lane.b32.xlu0 %v5470_v6, %s6923_s22  ;;  %v3522_v6 = vshll.u32 %v3388_v8, 16  ;;  %v1845_v35 = vsel %vm635_vm2, %v1843_v11, %v1765_v0  ;;  %v3427_v15 = vsel %vm7383_vm5, %v3422_v56, %v7978_v32  ;;  %v3509_v25 = vor.u32 %v3508_v28, %v7771_v60  ;;  %v4752_v32 = vld [vmem:[%s6959_s17 + $0xc] sm:$0xf] }
 0x236   : > { %v3552_v26 = vrot.slane %v3550_v44, 4  ;;  %v3481_v18 = vsel %vm7383_vm5, %v3476_v23, %v3480_v4  ;;  %v3520_v42 = vrot.slane %v3519_v16, 4  ;;  %v3566_v8 = vshll.u32 %v3393_v38, 16  ;;  %v4757_v4 = vld [vmem:[%s6959_s17 + $0x20] sm:$0xf] }
 0x237   : > { %v1775_v33 = vpop.permute.xlu0 %1774  ;;  %5519 = vrot.lane.b32.xlu1 %v5486_v17, %s6923_s22  ;;  %v3524_v0 = vrot.slane %v3522_v6, 5  ;;  %v3563_v17 = vor.u32 %v3562_v39, %v8042_v52  ;;  %v3471_v60 = vsel %vm7383_vm5, %v3466_v40, %v8004_v58  ;;  %v3510_v29 = vrot.slane %v3509_v25, 4  ;;  %v2625_v39 = vld [vmem:[%s6959_s17 + $0xc] sm:$0xf]  ;;  %v4758_v40 = vld [vmem:[%s6959_s17 + $0x24] sm:$0x1] }
 0x238   : > { %v1850_v59 = vsel %vm632_vm1, %v1848_v50, %v1775_v33  ;;  %v3553_v44 = vor.u32 %v3552_v26, %v7783_v1  ;;  %v3568_v56 = vrot.slane %v3566_v8, 5  ;;  %v4810_v6 = vrot.slane %v4757_v4, 5  ;;  %v8086_v38 = vld [vmem:[%s6959_s17 + $0x34] sm:$0xf] }
 0x239   : > { %v1852_v10 = vsel %vm635_vm2, %v1850_v59, %v1780_v63  ;;  %v1790_v20 = vpop.permute.xlu1 %1789  ;;  %5517 = vrot.lane.b32.xlu0 %v5483_v51, %s6923_s22  ;;  %v4753_v63 = vld [vmem:[%s6959_s17 + $0x10] sm:$0x1]  ;;  %v3525_v51 = vsel %vm7383_vm5, %v3520_v42, %v3524_v0  ;;  %v3564_v9 = vrot.slane %v3563_v17, 4  ;;  %v3515_v1 = vsel %vm7383_vm5, %v3510_v29, %v8020_v45 }
 0x23a   : > { %v6522_v36 = vcombine.low %v1845_v35, %v1852_v10  ;;  %v3554_v58 = vrot.slane %v3553_v44, 4  ;;  %v4800_v16 = vrot.slane %v4753_v63, 5  ;;  %v2672_v42 = vshll.u32 %v2625_v39, 16 }
 0x23b   : > { %v1785_v57 = vpop.permute.xlu0 %1784  ;;  %3576 = vrot.lane.b32.xlu1 %v3437_v37, %s6923_s22  ;;  %v4797_v37 = vrot.slane %v4752_v32, 5  ;;  %v3569_v59 = vsel %vm7383_vm5, %v3564_v9, %v3568_v56  ;;  %v2676_v17 = vshrl.u32 %v2625_v39, 16  ;;  %v2630_v32 = vld [vmem:[%s6959_s17 + $0x20] sm:$0xf]  ;;  %v2710_v44 = vshrl.u32 %v7862_v46, 16 }
 0x23c   : > { %1893 = vst [vmem:[#allocation2 + $0x30] sm:$0x33] %v6522_v36  ;;  %v1855_v28 = vsel %vm628_vm0, %v7552_v7, %v1785_v57  ;;  %v3559_v36 = vsel %vm7383_vm5, %v3554_v58, %v8042_v52  ;;  %v9801_v57 = vrot.slane %v7805_v55, 5  ;;  %v4812_v52 = vrot.slane %v4810_v6, 4  ;;  %v4763_v55 = vld [vmem:[%s6959_s17 + $0x38] sm:$0x1] }
 0x23d   : > { %v1800_v48 = vpop.permute.xlu1 %1799  ;;  %3574 = vrot.lane.b32.xlu0 %v3427_v15, %s6923_s22  ;;  %v1857_v7 = vsel %vm632_vm1, %v1855_v28, %v1790_v20  ;;  %v4799_v45 = vrot.slane %v4797_v37, 4  ;;  %v9800_v15 = vrot.slane %v7787_v22, 5  ;;  %v4813_v22 = vrot.slane %v4758_v40, 5  ;;  %v4768_v9 = vld [vmem:[%s6959_s17 + $0x4c] sm:$0x1] }
 0x23e   : > { %v1862_v33 = vsel %vm628_vm0, %v7601_v54, %v1800_v48  ;;  %v4809_v0 = vrot.slane %v9801_v57, 4  ;;  %v4823_v48 = vrot.slane %v8086_v38, 5  ;;  %v8113_v4 = vrot.slane %v2672_v42, 5 }
 0x23f   : > { %v1795_v41 = vpop.permute.xlu0 %1794  ;;  %3584 = vrot.lane.b32.xlu1 %v3481_v18, %s6923_s22  ;;  %v4796_v25 = vrot.slane %v9800_v15, 4  ;;  %v8097_v18 = vld [vmem:[%s6959_s17 + $0x48] sm:$0xf]  ;;  %v4801_v8 = vsel %vm7800_vm8, %v4799_v45, %v4800_v16  ;;  %v2678_v28 = vrot.slane %v2676_v17, 4 }
 0x240   : > { %v1859_v35 = vsel %vm635_vm2, %v1857_v7, %v1795_v41  ;;  %v2754_v41 = vshrl.u32 %v7884_v24, 16  ;;  %v4811_v46 = vsel %vm7800_vm8, %v4809_v0, %v4810_v6  ;;  %v4814_v24 = vsel %vm7800_vm8, %v4812_v52, %v4813_v22 }
 0x241   : > { %v1810_v50 = vpop.permute.xlu1 %1809  ;;  %3582 = vrot.lane.b32.xlu0 %v3471_v60, %s6923_s22  ;;  %v2666_v60 = vshrl.u32 %v7843_v21, 16  ;;  %v4798_v63 = vsel %vm7800_vm8, %v4796_v25, %v4797_v37  ;;  %v2626_v21 = vld [vmem:[%s6959_s17 + $0x10] sm:$0x1]  ;;  %v4825_v58 = vrot.slane %v4823_v48, 4  ;;  %v4826_v37 = vrot.slane %v4763_v55, 5 }
 0x242   : > { %v9803_v6 = vrot.slane %v7833_v53, 5  ;;  %v2682_v40 = vshll.u32 %v2626_v21, 16  ;;  %v2631_v25 = vld [vmem:[%s6959_s17 + $0x24] sm:$0x1] }
 0x243   : > { %v1805_v23 = vpop.permute.xlu0 %1804  ;;  %3592 = vrot.lane.b32.xlu1 %v3525_v51, %s6923_s22  ;;  %v4836_v51 = vrot.slane %v8097_v18, 5  ;;  %v4827_v15 = vsel %vm7800_vm8, %v4825_v58, %v4826_v37 }
 0x244   : > { %v1864_v11 = vsel %vm632_vm1, %v1862_v33, %v1805_v23  ;;  %v2635_v33 = vld [vmem:[%s6959_s17 + $0x34] sm:$0xf]  ;;  %v4835_v45 = vrot.slane %v9803_v6, 4 }
 0x245   : > { %v1866_v10 = vsel %vm635_vm2, %v1864_v11, %v1810_v50  ;;  %v2423_v54 = vpop.permute.xlu1 %2422  ;;  %3590 = vrot.lane.b32.xlu0 %v3515_v1, %s6923_s22  ;;  %v2716_v50 = vshll.u32 %v2630_v32, 16  ;;  %v2720_v1 = vshrl.u32 %v2630_v32, 16  ;;  %v9802_v11 = vrot.slane %v7824_v12, 5 }
 0x246   : > { %v6523_v20 = vcombine.low %v1859_v35, %v1866_v10  ;;  %v4838_v39 = vrot.slane %v4836_v51, 4  ;;  %v4839_v35 = vrot.slane %v4768_v9, 5  ;;  %v2668_v10 = vrot.slane %v2666_v60, 4 }
 0x247   : > { %v2418_v26 = vpop.permute.xlu0 %2417  ;;  %3600 = vrot.lane.b32.xlu1 %v3569_v59, %s6923_s22  ;;  %v4822_v59 = vrot.slane %v9802_v11, 4  ;;  %v8134_v38 = vrot.slane %v2716_v50, 5  ;;  %v2722_v12 = vrot.slane %v2720_v1, 4  ;;  %v2684_v60 = vrot.slane %v2682_v40, 5 }
 0x248   : > { %1894 = vst [vmem:[#allocation2 + $0x38] sm:$0x33] %v6523_v20  ;;  %v2536_v23 = vsel %vm628_vm0, %v7556_v62, %v2418_v26  ;;  %v2760_v20 = vshll.u32 %v2635_v33, 16  ;;  %v2764_v26 = vshrl.u32 %v2635_v33, 16  ;;  %v4840_v22 = vsel %vm7800_vm8, %v4838_v39, %v4839_v35 }
 0x249   : > { %v2433_v29 = vpop.permute.xlu1 %2432  ;;  %3598 = vrot.lane.b32.xlu0 %v3559_v36, %s6923_s22  ;;  %v2538_v36 = vsel %vm632_vm1, %v2536_v23, %v2423_v54  ;;  %v4824_v17 = vsel %vm7800_vm8, %v4822_v59, %v4823_v48  ;;  %v2640_v54 = vld [vmem:[%s6959_s17 + $0x48] sm:$0xf]  ;;  %v2669_v32 = vor.u32 %v2668_v10, %v7873_v13  ;;  %v2726_v9 = vshll.u32 %v2631_v25, 16  ;;  %v2636_v48 = vld [vmem:[%s6959_s17 + $0x38] sm:$0x1] }
 0x24a   : > { %v2543_v16 = vsel %vm628_vm0, %v7559_v3, %v2433_v29  ;;  %v2679_v3 = vor.u32 %v2678_v28, %v8113_v4  ;;  %v2804_v28 = vshll.u32 %v2640_v54, 16  ;;  %v2808_v50 = vshrl.u32 %v2640_v54, 16 }
 0x24b   : > { %v2428_v56 = vpop.permute.xlu0 %2427  ;;  %4847 = vrot.lane.b32.xlu1 %v4801_v8, %s6922_s21  ;;  %v2712_v8 = vrot.slane %v2710_v44, 4  ;;  %v2766_v44 = vrot.slane %v2764_v26, 4  ;;  %v4837_v58 = vsel %vm7800_vm8, %v4835_v45, %v4836_v51  ;;  %v2670_v37 = vrot.slane %v2669_v32, 4 }
 0x24c   : > { %v2540_v57 = vsel %vm635_vm2, %v2538_v36, %v2428_v56  ;;  %v2680_v55 = vrot.slane %v2679_v3, 4  ;;  %v8152_v56 = vrot.slane %v2760_v20, 5  ;;  %v2810_v59 = vrot.slane %v2808_v50, 4 }
 0x24d   : > { %v2443_v7 = vpop.permute.xlu1 %2442  ;;  %4845 = vrot.lane.b32.xlu0 %v4798_v63, %s6922_s21  ;;  %v2723_v63 = vor.u32 %v2722_v12, %v8134_v38  ;;  %v2713_v13 = vor.u32 %v2712_v8, %v7890_v14  ;;  %v2675_v35 = vsel %vm7383_vm5, %v2670_v37, %v8113_v4 }
 0x24e   : > { %v2685_v11 = vsel %vm7383_vm5, %v2680_v55, %v2684_v60  ;;  %v2767_v14 = vor.u32 %v2766_v44, %v8152_v56  ;;  %v5409_v55 = vld [vmem:[%s6959_s17 + $0x20] sm:$0xf] }
 0x24f   : > { %v2438_v62 = vpop.permute.xlu0 %2437  ;;  %4855 = vrot.lane.b32.xlu1 %v4814_v24, %s6922_s21  ;;  %v2798_v24 = vshrl.u32 %v7897_v27, 16  ;;  %v2724_v23 = vrot.slane %v2723_v63, 4  ;;  %v8167_v27 = vrot.slane %v2804_v28, 5  ;;  %v2714_v45 = vrot.slane %v2713_v13, 4  ;;  %v5410_v13 = vld [vmem:[%s6959_s17 + $0x24] sm:$0x1] }
 0x250   : > { %v2545_v53 = vsel %vm632_vm1, %v2543_v16, %v2438_v62  ;;  %v2728_v16 = vrot.slane %v2726_v9, 5  ;;  %v2768_v20 = vrot.slane %v2767_v14, 4  ;;  %v5405_v9 = vld [vmem:[%s6959_s17 + $0x10] sm:$0x1]  ;;  %v5462_v44 = vrot.slane %v5409_v55, 5  ;;  %v6051_v14 = vld [vmem:[#allocation2 + $0x8] sm:$0xff] }
 0x251   : > { %v2547_v0 = vsel %vm635_vm2, %v2545_v53, %v2443_v7  ;;  %v2453_v42 = vpop.permute.xlu1 %2452  ;;  %4853 = vrot.lane.b32.xlu0 %v4811_v46, %s6922_s21  ;;  %v2756_v46 = vrot.slane %v2754_v41, 4  ;;  %v2770_v7 = vshll.u32 %v2636_v48, 16  ;;  %v2641_v41 = vld [vmem:[%s6959_s17 + $0x4c] sm:$0x1]  ;;  %v2800_v10 = vrot.slane %v2798_v24, 4 }
 0x252   : > { %v6548_v52 = vcombine.low %v2540_v57, %v2547_v0  ;;  %v2719_v26 = vsel %vm7383_vm5, %v2714_v45, %v8134_v38  ;;  %v5404_v0 = vld [vmem:[%s6959_s17 + $0xc] sm:$0xf] }
 0x253   : > { %v2448_v29 = vpop.permute.xlu0 %2447  ;;  %4863 = vrot.lane.b32.xlu1 %v4827_v15, %s6922_s21  ;;  %v2757_v39 = vor.u32 %v2756_v46, %v7908_v19  ;;  %v2772_v62 = vrot.slane %v2770_v7, 5  ;;  %v2811_v19 = vor.u32 %v2810_v59, %v8167_v27  ;;  %v6050_v15 = vld [vmem:[#allocation2] sm:$0xff]  ;;  %v2801_v54 = vor.u32 %v2800_v10, %v7921_v2 }
 0x254   : > { %v2610_v21 = vrot.slane %v6548_v52, 6  ;;  %v2550_v18 = vsel %vm628_vm0, %v7647_v49, %v2448_v29  ;;  %v2729_v49 = vsel %vm7383_vm5, %v2724_v23, %v2728_v16  ;;  %v5449_v38 = vrot.slane %v5404_v0, 5 }
 0x255   : > { %v2463_v1 = vpop.permute.xlu1 %2462  ;;  %4861 = vrot.lane.b32.xlu0 %v4824_v17, %s6922_s21  ;;  %v2552_v3 = vsel %vm632_vm1, %v2550_v18, %v2453_v42  ;;  %v2758_v57 = vrot.slane %v2757_v39, 4  ;;  %v2773_v60 = vsel %vm7383_vm5, %v2768_v20, %v2772_v62  ;;  %v2812_v29 = vrot.slane %v2811_v19, 4  ;;  %v5415_v39 = vld [vmem:[%s6959_s17 + $0x38] sm:$0x1] }
 0x256   : > { %2618 = vst [vmem:[#allocation2 + $0x20] sm:$0xcc] %v2610_v21  ;;  %v2557_v51 = vsel %vm628_vm0, %v7674_v43, %v2463_v1  ;;  %v2814_v43 = vshll.u32 %v2641_v41, 16  ;;  %v2802_v21 = vrot.slane %v2801_v54, 4  ;;  %v5451_v50 = vrot.slane %v5449_v38, 4 }
 0x257   : > { %v2458_v33 = vpop.permute.xlu0 %2457  ;;  %4871 = vrot.lane.b32.xlu1 %v4840_v22, %s6922_s21  ;;  %v2763_v2 = vsel %vm7383_vm5, %v2758_v57, %v8152_v56  ;;  %v5452_v1 = vrot.slane %v5405_v9, 5  ;;  %v5414_v56 = vld [vmem:[%s6959_s17 + $0x34] sm:$0xf]  ;;  %v5465_v7 = vrot.slane %v5410_v13, 5  ;;  %v5478_v19 = vrot.slane %v5415_v39, 5 }
 0x258   : > { %v2554_v36 = vsel %vm635_vm2, %v2552_v3, %v2458_v33  ;;  %v2816_v22 = vrot.slane %v2814_v43, 5  ;;  %v2807_v37 = vsel %vm7383_vm5, %v2802_v21, %v8167_v27  ;;  %v9804_v33 = vrot.slane %v7932_v30, 5 }
 0x259   : > { %v2473_v6 = vpop.permute.xlu1 %2472  ;;  %4869 = vrot.lane.b32.xlu0 %v4837_v58, %s6922_s21  ;;  %v5453_v41 = vsel %vm7800_vm8, %v5451_v50, %v5452_v1  ;;  %v5475_v47 = vrot.slane %v5414_v56, 5 }
 0x25a   : > { %v2817_v28 = vsel %vm7383_vm5, %v2812_v29, %v2816_v22  ;;  %v5448_v23 = vrot.slane %v9804_v33, 4  ;;  %v9811_v22 = vrot.slane %v7999_v31, 5  ;;  %v9812_v33 = vld [vmem:[#allocation3_spill] sm:$0xff] }
 0x25b   : > { %v2468_v40 = vpop.permute.xlu0 %2467  ;;  %2824 = vrot.lane.b32.xlu1 %v2685_v11, %s6922_s21  ;;  %v5477_v20 = vrot.slane %v5475_v47, 4 }
 0x25c   : > { %v2559_v12 = vsel %vm632_vm1, %v2557_v51, %v2468_v40  ;;  %v9806_v51 = vld [vmem:[#allocation11_spill] sm:$0xff]  ;;  %v5450_v62 = vsel %vm7800_vm8, %v5448_v23, %v5449_v38 }
 0x25d   : > { %v2561_v4 = vsel %vm635_vm2, %v2559_v12, %v2473_v6  ;;  %v2483_v53 = vpop.permute.xlu1 %2482  ;;  %v6054_v25 = vld [vmem:[#allocation2 + $0x20] sm:$0xff]  ;;  %2822 = vrot.lane.b32.xlu0 %v2675_v35, %s6922_s21  ;;  %v9807_v6 = vrot.slane %v9806_v51, 5  ;;  %v5419_v35 = vld [vmem:[%s6959_s17 + $0x48] sm:$0xf] }
 0x25e   : > { %v6549_v42 = vcombine.low %v2554_v36, %v2561_v4  ;;  %v6705_v17 = vcombine.high %v6050_v15, %v6054_v25  ;;  %v6704_v8 = vcombine.low %v6050_v15, %v6054_v25  ;;  %v5488_v36 = vrot.slane %v5419_v35, 5  ;;  %v9809_v25 = vld [vmem:[#allocation12_spill] sm:$0xff] }
 0x25f   : > { %v2478_v52 = vpop.permute.xlu0 %2477  ;;  %2832 = vrot.lane.b32.xlu1 %v2729_v49, %s6922_s21  ;;  %v5461_v45 = vrot.slane %v9807_v6, 4  ;;  %v9813_v51 = vld [vmem:[#allocation4_spill] sm:$0xff] }
 0x260   : > { %v2611_v32 = vrot.slane %v6549_v42, 6  ;;  %6205 = vmatprep.subr.bf16.mxu0 %v6705_v17  ;;  %v2564_v46 = vsel %vm628_vm0, %v7678_v34, %v2478_v52  ;;  %v5464_v34 = vrot.slane %v5462_v44, 4  ;;  %v5479_v42 = vsel %vm7800_vm8, %v5477_v20, %v5478_v19 }
 0x261   : > { %v2493_v63 = vpop.permute.xlu1 %2492  ;;  %6206 = vmatpush1.bf16.msra.mxu0 %v6704_v8  ;;  %2830 = vrot.lane.b32.xlu0 %v2719_v26, %s6922_s21  ;;  %v5463_v15 = vsel %vm7800_vm8, %v5461_v45, %v5462_v44  ;;  %v9810_v26 = vrot.slane %v9809_v25, 5  ;;  %v5490_v17 = vrot.slane %v5488_v36, 4 }
 0x262   : > { %2619 = vst [vmem:[#allocation2 + $0x28] sm:$0xcc] %v2611_v32  ;;  %v2571_v24 = vsel %vm628_vm0, %v7711_v5, %v2493_v63  ;;  %v2566_v5 = vsel %vm632_vm1, %v2564_v46, %v2483_v53  ;;  %v5466_v3 = vsel %vm7800_vm8, %v5464_v34, %v5465_v7  ;;  %v5420_v53 = vld [vmem:[%s6959_s17 + $0x4c] sm:$0x1]  ;;  %v5487_v32 = vrot.slane %v9811_v22, 4 }
 0x263   : > { %v2488_v48 = vpop.permute.xlu0 %2487  ;;  %2840 = vrot.lane.b32.xlu1 %v2773_v60, %s6922_s21  ;;  %v5474_v57 = vrot.slane %v9810_v26, 4  ;;  %v5491_v8 = vrot.slane %v5420_v53, 5 }
 0x264   : > { %v2568_v27 = vsel %vm635_vm2, %v2566_v5, %v2488_v48  ;;  %v5489_v55 = vsel %vm7800_vm8, %v5487_v32, %v5488_v36 }
 0x265   : > { %v2503_v58 = vpop.permute.xlu1 %2502  ;;  %2838 = vrot.lane.b32.xlu0 %v2763_v2, %s6922_s21  ;;  %v5476_v52 = vsel %vm7800_vm8, %v5474_v57, %v5475_v47  ;;  %v5492_v29 = vsel %vm7800_vm8, %v5490_v17, %v5491_v8 }
 0x267   : > { %v2498_v16 = vpop.permute.xlu0 %2497  ;;  %2848 = vrot.lane.b32.xlu1 %v2817_v28, %s6922_s21 }
 0x268   : > { %v2573_v11 = vsel %vm632_vm1, %v2571_v24, %v2498_v16 }
 0x269   : > { %v2575_v30 = vsel %vm635_vm2, %v2573_v11, %v2503_v58  ;;  %v8223_v59 = vpop.permute.xlu1 %2512  ;;  %v6055_v18 = vld [vmem:[#allocation2 + $0x28] sm:$0xff]  ;;  %2846 = vrot.lane.b32.xlu0 %v2807_v37, %s6922_s21 }
 0x26a   : > { %9805 = vst [vmem:[#allocation13_spill] sm:$0xff] %v8223_v59  ;;  %v6550_v10 = vcombine.low %v2568_v27, %v2575_v30  ;;  %v6707_v40 = vcombine.high %v6051_v14, %v6055_v18  ;;  %v6706_v49 = vcombine.low %v6051_v14, %v6055_v18 }
 0x26b   : > { %v8232_v43 = vpop.permute.xlu0 %2507  ;;  %5499 = vrot.lane.b32.xlu1 %v5453_v41, %s6923_s22 }
 0x26c   : > { %9808 = vst [vmem:[#allocation11_spill] sm:$0xff] %v8232_v43  ;;  %v2612_v12 = vrot.slane %v6550_v10, 6  ;;  %6246 = vmatprep.subr.bf16.mxu1 %v6707_v40 }
 0x26d   : > { %v8237_v4 = vpop.permute.xlu1 %3572  ;;  %6247 = vmatpush1.bf16.msra.mxu1 %v6706_v49  ;;  %5497 = vrot.lane.b32.xlu0 %v5450_v62, %s6923_s22 }
 0x26e   : > { %2620 = vst [vmem:[#allocation2 + $0x30] sm:$0xcc] %v2612_v12  ;;  %v3617_v2 = vshrl.u32 %v8237_v4, 16 }
 0x26f   : > { %v8245_v0 = vpop.permute.xlu0 %3570  ;;  %5507 = vrot.lane.b32.xlu1 %v5466_v3, %s6923_s22 }
 0x270   : > { %v3605_v44 = vshrl.u32 %v8245_v0, 16 }
 0x271   : > { %v8250_v54 = vpop.permute.xlu1 %3580  ;;  %5505 = vrot.lane.b32.xlu0 %v5463_v15, %s6923_s22 }
 0x272   : > { %v3618_v21 = vshrl.u32 %v8250_v54, 16 }
 0x273   : > { %v8257_v60 = vpop.permute.xlu0 %3578  ;;  %5515 = vrot.lane.b32.xlu1 %v5479_v42, %s6923_s22 }
 0x274   : > { %v3606_v31 = vshrl.u32 %v8257_v60, 16  ;;  %v3619_v58 = vpack.i.b16 %v3618_v21, %v3617_v2 }
 0x275   : > { %v8262_v38 = vpop.permute.xlu1 %3588  ;;  %5513 = vrot.lane.b32.xlu0 %v5476_v52, %s6923_s22 }
 0x276   : > { %v3623_v9 = vshrl.u32 %v8262_v38, 16  ;;  %v3607_v1 = vpack.i.b16 %v3606_v31, %v3605_v44  ;;  %v3759_v5 = vrot.slane %v3619_v58, %v9812_v33  ;;  %v3604_v31 = vpack.i.b16 %v8257_v60, %v8245_v0 }
 0x277   : > { %v8267_v63 = vpop.permute.xlu0 %3586  ;;  %5523 = vrot.lane.b32.xlu1 %v5492_v29, %s6923_s22 }
 0x278   : > { %v3611_v13 = vshrl.u32 %v8267_v63, 16  ;;  %v3691_v34 = vrot.slane %v3607_v1, %v9812_v33  ;;  %v8352_v1 = vld [vmem:[%s6959_s17 + $0x4] sm:$0xf] }
 0x279   : > { %v8274_v48 = vpop.permute.xlu1 %3596  ;;  %5521 = vrot.lane.b32.xlu0 %v5489_v55, %s6923_s22 }
 0x27a   : > { %v3624_v28 = vshrl.u32 %v8274_v48, 16  ;;  %v3622_v29 = vpack.i.b16 %v8274_v48, %v8262_v38  ;;  %v4130_v48 = vld [vmem:[%s6959_s17] sm:$0xe] }
 0x27b   : > { %v3595_v50 = vpop.permute.xlu0 %3594 }
 0x27c   : > { %v3625_v46 = vpack.i.b16 %v3624_v28, %v3623_v9  ;;  %v3612_v24 = vshrl.u32 %v3595_v50, 16  ;;  %v3610_v52 = vpack.i.b16 %v3595_v50, %v8267_v63  ;;  %v3616_v63 = vpack.i.b16 %v8250_v54, %v8237_v4 }
 0x27d   : > { %v8280_v56 = vpop.permute.xlu1 %4843  ;;  %v3733_v0 = vrot.slane %v3622_v29, %v9812_v33  ;;  %v3657_v4 = vrot.slane %v3604_v31, %v9812_v33 }
 0x27e   : > { %v3613_v37 = vpack.i.b16 %v3612_v24, %v3611_v13  ;;  %v3767_v23 = vrot.slane %v3625_v46, %v9812_v33  ;;  %v4888_v12 = vshrl.u32 %v8280_v56, 16  ;;  %v3665_v28 = vrot.slane %v3610_v52, %v9812_v33 }
 0x27f   : > { %v8283_v16 = vpop.permute.xlu0 %4841  ;;  %v3725_v58 = vrot.slane %v3616_v63, %v9812_v33 }
 0x280   : > { %v3699_v7 = vrot.slane %v3613_v37, %v9812_v33  ;;  %v3768_v47 = vcombine.low %v3759_v5, %v3767_v23  ;;  %v3769_v27 = vcombine.high %v3759_v5, %v3767_v23  ;;  %v4876_v36 = vshrl.u32 %v8283_v16, 16 }
 0x281   : > { %v8288_v11 = vpop.permute.xlu1 %4851  ;;  %v6608_v37 = vrot.slane %v4130_v48, 9  ;;  %v4175_v23 = vrot.slane %v8352_v1, 5 }
 0x282   : > { %v3700_v14 = vcombine.low %v3691_v34, %v3699_v7  ;;  %v3701_v41 = vcombine.high %v3691_v34, %v3699_v7  ;;  %v8307_v40 = vrot.slane %v3769_v27, %v9813_v51  ;;  %v8310_v49 = vrot.slane %v3768_v47, %v9813_v51  ;;  %v4135_v47 = vld [vmem:[%s6959_s17 + $0x14] sm:$0xe]  ;;  %v8370_v27 = vld [vmem:[%s6959_s17 + $0x18] sm:$0xf] }
 0x283   : > { %v8290_v30 = vpop.permute.xlu0 %4849  ;;  %v4889_v20 = vshrl.u32 %v8288_v11, 16  ;;  %v3666_v34 = vcombine.low %v3657_v4, %v3665_v28  ;;  %v3667_v7 = vcombine.high %v3657_v4, %v3665_v28  ;;  %v4146_v4 = vld [vmem:[%s6959_s17 + $0x40] sm:$0xf] }
 0x284   : > { %v8295_v6 = vrot.slane %v3701_v41, %v9813_v51  ;;  %v8298_v45 = vrot.slane %v3700_v14, %v9813_v51  ;;  %v4877_v62 = vshrl.u32 %v8290_v30, 16  ;;  %v6589_v25 = vcombine.low %v8307_v40, %v8307_v40 }
 0x285   : > { %v8292_v18 = vpop.permute.xlu1 %4859  ;;  %v6586_v26 = vcombine.low %v8310_v49, %v8310_v49  ;;  %v4890_v22 = vpack.i.b16 %v4889_v20, %v4888_v12  ;;  %v8404_v52 = vrot.slane %v3666_v34, %v9813_v51  ;;  %v8449_v34 = vld [vmem:[%s6959_s17 + $0x8] sm:$0xf] }
 0x286   : > { %v6583_v35 = vcombine.low %v8295_v6, %v8295_v6  ;;  %v6580_v10 = vcombine.low %v8298_v45, %v8298_v45  ;;  %v4894_v3 = vshrl.u32 %v8292_v18, 16  ;;  %v4878_v57 = vpack.i.b16 %v4877_v62, %v4876_v36  ;;  %v4140_v62 = vld [vmem:[%s6959_s17 + $0x28] sm:$0xe] }
 0x287   : > { %v8300_v39 = vpop.permute.xlu0 %4857  ;;  %v5030_v50 = vrot.slane %v4890_v22, %v9812_v33 }
 0x288   : > { %3940 = vrot.lane.b32.xlu1 %v6583_v35, %s6921_s20  ;;  %3925 = vrot.lane.b32.xlu0 %v6580_v10, %s6921_s20  ;;  %v4882_v42 = vshrl.u32 %v8300_v39, 16  ;;  %v4962_v21 = vrot.slane %v4878_v57, %v9812_v33  ;;  %v3735_v35 = vcombine.high %v3725_v58, %v3733_v0  ;;  %v6609_v57 = vrot.slane %v4135_v47, 9 }
 0x289   : > { %v8318_v19 = vpop.permute.xlu1 %4867 }
 0x28a   : > { %v4895_v53 = vshrl.u32 %v8318_v19, 16  ;;  %v4893_v22 = vpack.i.b16 %v8318_v19, %v8292_v18  ;;  %v8425_v28 = vrot.slane %v3735_v35, %v9813_v51  ;;  %v4887_v18 = vpack.i.b16 %v8288_v11, %v8280_v56 }
 0x28b   : > { %v8322_v15 = vpop.permute.xlu0 %4865  ;;  %v6819_v56 = vcombine.high %v8404_v52, %v8404_v52 }
 0x28c   : > { %v4896_v17 = vpack.i.b16 %v4895_v53, %v4894_v3  ;;  %v4883_v8 = vshrl.u32 %v8322_v15, 16  ;;  %3970 = vrot.lane.b32.xlu1 %v6589_v25, %s6921_s20  ;;  %3955 = vrot.lane.b32.xlu0 %v6586_v26, %s6921_s20  ;;  %v4881_v10 = vpack.i.b16 %v8322_v15, %v8300_v39  ;;  %v8388_v25 = vld [vmem:[%s6959_s17 + $0x2c] sm:$0xf]  ;;  %v8391_v26 = vld [vmem:[%s6959_s17 + $0x3c] sm:$0xe]  ;;  %v3734_v39 = vcombine.low %v3725_v58, %v3733_v0 }
 0x28d   : > { %v8333_v32 = vpop.permute.xlu1 %2820  ;;  %v4875_v15 = vpack.i.b16 %v8290_v30, %v8283_v16  ;;  %v8410_v16 = vsel %vm7800_vm8, %v6608_v37, %v4175_v23  ;;  %v6610_v30 = vrot.slane %v4140_v62, 9  ;;  %v6611_v31 = vrot.slane %v8391_v26, 9  ;;  %9814 = vst [vmem:[#allocation12_spill] sm:$0xff] %v8425_v28 }
 0x28e   : > { %v4884_v55 = vpack.i.b16 %v4883_v8, %v4882_v42  ;;  %v5038_v9 = vrot.slane %v4896_v17, %v9812_v33  ;;  %v4188_v42 = vrot.slane %v8370_v27, 5  ;;  %v8401_v8 = vrot.slane %v3667_v7, %v9813_v51 }
 0x28f   : > { %v8340_v2 = vpop.permute.xlu0 %2818  ;;  %v4936_v29 = vrot.slane %v4881_v10, %v9812_v33  ;;  %v4928_v19 = vrot.slane %v4875_v15, %v9812_v33  ;;  %v8432_v48 = vrot.slane %v3734_v39, %v9813_v51  ;;  %v2865_v58 = vshrl.u32 %v8333_v32, 16 }
 0x290   : > { %v4970_v44 = vrot.slane %v4884_v55, %v9812_v33  ;;  %v5039_v54 = vcombine.low %v5030_v50, %v5038_v9  ;;  %v5040_v46 = vcombine.high %v5030_v50, %v5038_v9  ;;  %v4201_v55 = vrot.slane %v8388_v25, 5 }
 0x291   : > { %v8348_v38 = vpop.permute.xlu1 %2828  ;;  %9815 = vst [vmem:[#allocation3_spill] sm:$0xff] %v8432_v48  ;;  %v2853_v0 = vshrl.u32 %v8340_v2, 16  ;;  %v4937_v7 = vcombine.low %v4928_v19, %v4936_v29  ;;  %v4214_v26 = vrot.slane %v4146_v4, 5  ;;  %v6825_v15 = vcombine.high %v8425_v28, %v8425_v28 }
 0x292   : > { %v4971_v60 = vcombine.low %v4962_v21, %v4970_v44  ;;  %v4972_v13 = vcombine.high %v4962_v21, %v4970_v44  ;;  %v8382_v36 = vrot.slane %v5040_v46, %v9813_v51  ;;  %v8385_v53 = vrot.slane %v5039_v54, %v9813_v51 }
 0x293   : > { %v8356_v24 = vpop.permute.xlu0 %2826  ;;  %v5004_v54 = vrot.slane %v4893_v22, %v9812_v33  ;;  %v4938_v46 = vcombine.high %v4928_v19, %v4936_v29  ;;  %v2866_v37 = vshrl.u32 %v8348_v38, 16  ;;  %v8464_v25 = vsel %vm7800_vm8, %v6610_v30, %v4201_v55  ;;  %v8473_v29 = vld [vmem:[%s6959_s17 + $0x1c] sm:$0xf]  ;;  %v8482_v19 = vld [vmem:[%s6959_s17 + $0x30] sm:$0xf] }
 0x294   : > { %v8363_v14 = vrot.slane %v4972_v13, %v9813_v51  ;;  %v8366_v41 = vrot.slane %v4971_v60, %v9813_v51  ;;  %v6653_v21 = vcombine.low %v8382_v36, %v8382_v36  ;;  %v6650_v44 = vcombine.low %v8385_v53, %v8385_v53 }
 0x295   : > { %v8360_v5 = vpop.permute.xlu1 %2836  ;;  %v2854_v60 = vshrl.u32 %v8356_v24, 16  ;;  %v6821_v13 = vcombine.high %v8401_v8, %v8401_v8  ;;  %v8491_v1 = vrot.slane %v4937_v7, %v9813_v51  ;;  %v4190_v4 = vrot.slane %v4188_v42, 4 }
 0x296   : > { %v6647_v12 = vcombine.low %v8363_v14, %v8363_v14  ;;  %v6644_v20 = vcombine.low %v8366_v41, %v8366_v41  ;;  %v2871_v47 = vshrl.u32 %v8360_v5, 16  ;;  %v9739_v7 = vrot.slane %v8482_v19, 5 }
 0x297   : > { %v8375_v3 = vpop.permute.xlu0 %2834  ;;  %v2855_v39 = vpack.i.b16 %v2854_v60, %v2853_v0  ;;  %9817 = vst [vmem:[#allocation14_spill] sm:$0xff] %v8491_v1 }
 0x298   : > { %5211 = vrot.lane.b32.xlu1 %v6647_v12, %s6921_s20  ;;  %5196 = vrot.lane.b32.xlu0 %v6644_v20, %s6921_s20  ;;  %v2859_v9 = vshrl.u32 %v8375_v3, 16  ;;  %v4996_v12 = vrot.slane %v4887_v18, %v9812_v33  ;;  %v8460_v20 = vsel %vm7800_vm8, %v6609_v57, %v4188_v42  ;;  %v4177_v57 = vrot.slane %v4175_v23, 4 }
 0x299   : > { %v8398_v17 = vpop.permute.xlu1 %2844  ;;  %v8479_v18 = vrot.slane %v4938_v46, %v9813_v51  ;;  %v4203_v46 = vrot.slane %v4201_v55, 4 }
 0x29a   : > { %v2872_v35 = vshrl.u32 %v8398_v17, 16  ;;  %v5005_v30 = vcombine.low %v4996_v12, %v5004_v54 }
 0x29b   : > { %v8418_v63 = vpop.permute.xlu0 %2842  ;;  %9816 = vst [vmem:[#allocation4_spill] sm:$0xff] %v8479_v18  ;;  %v6853_v27 = vcombine.high %v8479_v18, %v8479_v18 }
 0x29c   : > { %v2860_v50 = vshrl.u32 %v8418_v63, 16  ;;  %5241 = vrot.lane.b32.xlu1 %v6653_v21, %s6921_s20  ;;  %5226 = vrot.lane.b32.xlu0 %v6650_v44, %s6921_s20  ;;  %v5006_v21 = vcombine.high %v4996_v12, %v5004_v54  ;;  %v2867_v44 = vpack.i.b16 %v2866_v37, %v2865_v58  ;;  %v2873_v0 = vpack.i.b16 %v2872_v35, %v2871_v47 }
 0x29d   : > { %v8442_v11 = vpop.permute.xlu1 %5495  ;;  %v9735_v54 = vrot.slane %v8473_v29, 5  ;;  %v2939_v58 = vrot.slane %v2855_v39, %v9812_v33  ;;  %v4216_v47 = vrot.slane %v4214_v26, 4  ;;  %v8516_v55 = vrot.slane %v5005_v30, %v9813_v51 }
 0x29e   : > { %v2861_v10 = vpack.i.b16 %v2860_v50, %v2859_v9  ;;  %v9734_v9 = vrot.slane %v8449_v34, 5  ;;  %v8485_v50 = vld [vmem:[%s6959_s17 + $0x44] sm:$0xf]  ;;  %v3007_v35 = vrot.slane %v2867_v44, %v9812_v33  ;;  %v8513_v42 = vrot.slane %v5006_v21, %v9813_v51 }
 0x29f   : > { %v8453_v62 = vpop.permute.xlu0 %5493  ;;  %9819 = vst [vmem:[#allocation16_spill] sm:$0xff] %v8516_v55  ;;  %v4228_v44 = vshrl.u32 %v8410_v16, 16 }
 0x2a0   : > { %3945 = vrot.lane.b32.xlu1 %v6821_v13, %s6919_s18  ;;  %3930 = vrot.lane.b32.xlu0 %v6819_v56, %s6919_s18  ;;  %v2947_v60 = vrot.slane %v2861_v10, %v9812_v33  ;;  %v6823_v13 = vcombine.high %v8432_v48, %v8432_v48  ;;  %v8497_v56 = vsel %vm7800_vm8, %v6611_v31, %v4214_v26  ;;  %v4234_v31 = vshrl.u32 %v8464_v25, 16 }
 0x2a1   : > { %v8470_v22 = vpop.permute.xlu1 %5503  ;;  %9818 = vst [vmem:[#allocation15_spill] sm:$0xff] %v8513_v42  ;;  %v3015_v10 = vrot.slane %v2873_v0, %v9812_v33  ;;  %v6851_v26 = vcombine.high %v8491_v1, %v8491_v1  ;;  %v4235_v21 = vshrl.u32 %v8497_v56, 16  ;;  %v8535_v0 = vsel %vm7800_vm8, %v4177_v57, %v9734_v9 }
 0x2a2   : > { %v2948_v12 = vcombine.low %v2939_v58, %v2947_v60  ;;  %v2949_v39 = vcombine.high %v2939_v58, %v2947_v60  ;;  %v8541_v60 = vsel %vm7800_vm8, %v4190_v4, %v9735_v54  ;;  %v6857_v58 = vcombine.high %v8513_v42, %v8513_v42 }
 0x2a3   : > { %v8493_v23 = vpop.permute.xlu0 %5501  ;;  %v9820_v57 = vrot.slane %v8485_v50, 5  ;;  %v3016_v4 = vcombine.low %v3007_v35, %v3015_v10  ;;  %v3017_v54 = vcombine.high %v3007_v35, %v3015_v10  ;;  %v4236_v1 = vpack.i.b16 %v4235_v21, %v4234_v31 }
 0x2a4   : > { %3975 = vrot.lane.b32.xlu1 %v6825_v15, %s6919_s18  ;;  %3960 = vrot.lane.b32.xlu0 %v6823_v13, %s6919_s18  ;;  %v4229_v13 = vshrl.u32 %v8460_v20, 16  ;;  %v8560_v59 = vrot.slane %v2949_v39, %v9813_v51  ;;  %v8563_v43 = vrot.slane %v2948_v12, %v9813_v51  ;;  %v4241_v35 = vshrl.u32 %v8541_v60, 16 }
 0x2a5   : > { %v8505_v37 = vpop.permute.xlu1 %5511  ;;  %v8557_v9 = vsel %vm7800_vm8, %v4216_v47, %v9820_v57  ;;  %v4240_v47 = vshrl.u32 %v8535_v0, 16 }
 0x2a6   : > { %v4230_v42 = vpack.i.b16 %v4229_v13, %v4228_v44  ;;  %v4247_v39 = vshrl.u32 %v8557_v9, 16  ;;  %v6555_v12 = vcombine.low %v8560_v59, %v8560_v59  ;;  %v6552_v31 = vcombine.low %v8563_v43, %v8563_v43 }
 0x2a7   : > { %v8521_v15 = vpop.permute.xlu0 %5509  ;;  %v8580_v44 = vrot.slane %v3017_v54, %v9813_v51  ;;  %v8583_v13 = vrot.slane %v3016_v4, %v9813_v51 }
 0x2a8   : > { %5216 = vrot.lane.b32.xlu1 %v6853_v27, %s6919_s18  ;;  %5201 = vrot.lane.b32.xlu0 %v6851_v26, %s6919_s18  ;;  %v6855_v27 = vcombine.high %v8516_v55, %v8516_v55  ;;  %v8551_v26 = vsel %vm7800_vm8, %v4203_v46, %v9739_v7  ;;  %v4242_v7 = vpack.i.b16 %v4241_v35, %v4240_v47 }
 0x2a9   : > { %v8529_v30 = vpop.permute.xlu1 %5519  ;;  %v4246_v10 = vshrl.u32 %v8551_v26, 16  ;;  %v6561_v54 = vcombine.low %v8580_v44, %v8580_v44  ;;  %v6558_v4 = vcombine.low %v8583_v13, %v8583_v13  ;;  %v6822_v35 = vcombine.high %v8295_v6, %v8295_v6 }
 0x2aa   : > { %v6826_v6 = vcombine.high %v8307_v40, %v8307_v40 }
 0x2ab   : > { %v8565_v55 = vpop.permute.xlu0 %5517  ;;  %v4248_v18 = vpack.i.b16 %v4247_v39, %v4246_v10  ;;  %v6820_v10 = vcombine.high %v8298_v45, %v8298_v45  ;;  %v6824_v45 = vcombine.high %v8310_v49, %v8310_v49  ;;  %v2858_v49 = vpack.i.b16 %v8418_v63, %v8375_v3 }
 0x2ac   : > { %5246 = vrot.lane.b32.xlu1 %v6857_v58, %s6919_s18  ;;  %5231 = vrot.lane.b32.xlu0 %v6855_v27, %s6919_s18  ;;  %v4314_v58 = vrot.slane %v4230_v42, %v9812_v33  ;;  %v4322_v27 = vrot.slane %v4236_v1, %v9812_v33  ;;  %v2864_v3 = vpack.i.b16 %v8348_v38, %v8333_v32 }
 0x2ad   : > { %v8569_v46 = vpop.permute.xlu1 %3576  ;;  %v4390_v47 = vrot.slane %v4248_v18, %v9812_v33  ;;  %v2870_v63 = vpack.i.b16 %v8398_v17, %v8360_v5  ;;  %v6854_v38 = vcombine.high %v8363_v14, %v8363_v14  ;;  %v4239_v14 = vpack.i.b16 %v8541_v60, %v8535_v0 }
 0x2ae   : > { %v4324_v28 = vcombine.high %v4314_v58, %v4322_v27  ;;  %v4323_v42 = vcombine.low %v4314_v58, %v4322_v27  ;;  %v2973_v32 = vrot.slane %v2864_v3, %v9812_v33 }
 0x2af   : > { %v8585_v21 = vpop.permute.xlu0 %3574  ;;  %v2981_v5 = vrot.slane %v2870_v63, %v9812_v33 }
 0x2b0   : > { %3188 = vrot.lane.b32.xlu1 %v6555_v12, %s6921_s20  ;;  %3173 = vrot.lane.b32.xlu0 %v6552_v31, %s6921_s20  ;;  %v4382_v12 = vrot.slane %v4242_v7, %v9812_v33  ;;  %v8612_v31 = vrot.slane %v4324_v28, %v9813_v51  ;;  %v8617_v58 = vrot.slane %v4323_v42, %v9813_v51 }
 0x2b1   : > { %v8591_v57 = vpop.permute.xlu1 %3584  ;;  %v2983_v3 = vcombine.high %v2973_v32, %v2981_v5 }
 0x2b2   : > { %v4392_v18 = vcombine.high %v4382_v12, %v4390_v47  ;;  %v4391_v27 = vcombine.low %v4382_v12, %v4390_v47  ;;  %v6615_v28 = vcombine.low %v8612_v31, %v8612_v31 }
 0x2b3   : > { %v8597_v48 = vpop.permute.xlu0 %3582 }
 0x2b4   : > { %3218 = vrot.lane.b32.xlu1 %v6561_v54, %s6921_s20  ;;  %3203 = vrot.lane.b32.xlu0 %v6558_v4, %s6921_s20  ;;  %v6612_v4 = vcombine.low %v8617_v58, %v8617_v58  ;;  %v8634_v42 = vrot.slane %v4392_v18, %v9813_v51  ;;  %v8637_v40 = vrot.slane %v4391_v27, %v9813_v51 }
 0x2b5   : > { %v8601_v1 = vpop.permute.xlu1 %3592 }
 0x2b6   : > { %v6618_v18 = vcombine.low %v8637_v40, %v8637_v40 }
 0x2b7   : > { %v8609_v39 = vpop.permute.xlu0 %3590 }
 0x2b8   : > { %3950 = vrot.lane.b32.xlu1 %v6822_v35, %s6920_s19  ;;  %3935 = vrot.lane.b32.xlu0 %v6820_v10, %s6920_s19  ;;  %v2852_v35 = vpack.i.b16 %v8356_v24, %v8340_v2  ;;  %v6621_v10 = vcombine.low %v8634_v42, %v8634_v42  ;;  %v2913_v2 = vrot.slane %v2858_v49, %v9812_v33 }
 0x2b9   : > { %v8619_v7 = vpop.permute.xlu1 %3600 }
 0x2bb   : > { %v8625_v54 = vpop.permute.xlu0 %3598 }
 0x2bc   : > { %3980 = vrot.lane.b32.xlu1 %v6826_v6, %s6920_s19  ;;  %3965 = vrot.lane.b32.xlu0 %v6824_v45, %s6920_s19  ;;  %v4227_v6 = vpack.i.b16 %v8460_v20, %v8410_v16  ;;  %v4233_v45 = vpack.i.b16 %v8497_v56, %v8464_v25  ;;  %v6852_v16 = vcombine.high %v8366_v41, %v8366_v41 }
 0x2bd   : > { %v8639_v12 = vpop.permute.xlu1 %4847  ;;  %v6858_v41 = vcombine.high %v8382_v36, %v8382_v36 }
 0x2be   : > { %v4280_v56 = vrot.slane %v4227_v6, %v9812_v33  ;;  %v4288_v49 = vrot.slane %v4233_v45, %v9812_v33 }
 0x2bf   : > { %v8643_v47 = vpop.permute.xlu0 %4845 }
 0x2c0   : > { %4563 = vrot.lane.b32.xlu1 %v6615_v28, %s6921_s20  ;;  %4548 = vrot.lane.b32.xlu0 %v6612_v4, %s6921_s20  ;;  %v2905_v28 = vrot.slane %v2852_v35, %v9812_v33  ;;  %v4245_v35 = vpack.i.b16 %v8557_v9, %v8551_v26  ;;  %v4290_v6 = vcombine.high %v4280_v56, %v4288_v49 }
 0x2c1   : > { %v8653_v27 = vpop.permute.xlu1 %4855  ;;  %v4289_v36 = vcombine.low %v4280_v56, %v4288_v49 }
 0x2c2   : > { %v2914_v17 = vcombine.low %v2905_v28, %v2913_v2  ;;  %v2915_v4 = vcombine.high %v2905_v28, %v2913_v2  ;;  %v4356_v60 = vrot.slane %v4245_v35, %v9812_v33  ;;  %v8710_v28 = vrot.slane %v2983_v3, %v9813_v51 }
 0x2c3   : > { %v8660_v24 = vpop.permute.xlu0 %4853 }
 0x2c4   : > { %4593 = vrot.lane.b32.xlu1 %v6621_v10, %s6921_s20  ;;  %4578 = vrot.lane.b32.xlu0 %v6618_v18, %s6921_s20  ;;  %v6856_v10 = vcombine.high %v8385_v53, %v8385_v53  ;;  %v2982_v18 = vcombine.low %v2973_v32, %v2981_v5  ;;  %v8692_v63 = vrot.slane %v2915_v4, %v9813_v51 }
 0x2c5   : > { %v8675_v20 = vpop.permute.xlu1 %4863  ;;  %v8695_v2 = vrot.slane %v2914_v17, %v9813_v51  ;;  %v4348_v53 = vrot.slane %v4239_v14, %v9812_v33  ;;  %9823 = vst [vmem:[#allocation19_spill] sm:$0xff] %v8710_v28  ;;  %v8721_v5 = vrot.slane %v4289_v36, %v9813_v51 }
 0x2c6   : > { %9821 = vst [vmem:[#allocation17_spill] sm:$0xff] %v8692_v63  ;;  %v6805_v26 = vcombine.high %v8692_v63, %v8692_v63  ;;  %v8713_v32 = vrot.slane %v2982_v18, %v9813_v51 }
 0x2c7   : > { %v8677_v25 = vpop.permute.xlu0 %4861  ;;  %9822 = vst [vmem:[#allocation18_spill] sm:$0xff] %v8695_v2  ;;  %v6803_v45 = vcombine.high %v8695_v2, %v8695_v2  ;;  %9826 = vst [vmem:[#allocation22_spill] sm:$0xff] %v8721_v5  ;;  %v4358_v17 = vcombine.high %v4348_v53, %v4356_v60  ;;  %v4357_v4 = vcombine.low %v4348_v53, %v4356_v60  ;;  %v5528_v60 = vshrl.u32 %v8453_v62, 16 }
 0x2c8   : > { %5221 = vrot.lane.b32.xlu1 %v6854_v38, %s6920_s19  ;;  %5206 = vrot.lane.b32.xlu0 %v6852_v16, %s6920_s19  ;;  %9824 = vst [vmem:[#allocation20_spill] sm:$0xff] %v8713_v32  ;;  %v8716_v38 = vrot.slane %v4290_v6, %v9813_v51  ;;  %v6809_v16 = vcombine.high %v8710_v28, %v8710_v28 }
 0x2c9   : > { %v8699_v9 = vpop.permute.xlu1 %4871  ;;  %v6807_v56 = vcombine.high %v8713_v32, %v8713_v32  ;;  %v8741_v18 = vrot.slane %v4357_v4, %v9813_v51  ;;  %v5540_v4 = vshrl.u32 %v8442_v11, 16  ;;  %v6808_v32 = vcombine.high %v8583_v13, %v8583_v13 }
 0x2ca   : > { %9825 = vst [vmem:[#allocation21_spill] sm:$0xff] %v8716_v38  ;;  %v6837_v35 = vcombine.high %v8716_v38, %v8716_v38  ;;  %v6806_v38 = vcombine.high %v8560_v59, %v8560_v59  ;;  %v5533_v13 = vpack.i.b16 %v8565_v55, %v8521_v15 }
 0x2cb   : > { %v8701_v0 = vpop.permute.xlu0 %4869  ;;  %9829 = vst [vmem:[#allocation25_spill] sm:$0xff] %v8741_v18  ;;  %v6839_v53 = vcombine.high %v8741_v18, %v8741_v18 }
 0x2cc   : > { %5251 = vrot.lane.b32.xlu1 %v6858_v41, %s6920_s19  ;;  %5236 = vrot.lane.b32.xlu0 %v6856_v10, %s6920_s19  ;;  %v6835_v41 = vcombine.high %v8721_v5, %v8721_v5  ;;  %v8738_v10 = vrot.slane %v4358_v17, %v9813_v51  ;;  %v5535_v17 = vshrl.u32 %v8565_v55, 16  ;;  %v5545_v55 = vpack.i.b16 %v8529_v30, %v8505_v37 }
 0x2cd   : > { %v8727_v49 = vpop.permute.xlu1 %2824 }
 0x2ce   : > { %9827 = vst [vmem:[#allocation23_spill] sm:$0xff] %v8727_v49  ;;  %9828 = vst [vmem:[#allocation24_spill] sm:$0xff] %v8738_v10  ;;  %v6841_v36 = vcombine.high %v8738_v10, %v8738_v10 }
 0x2cf   : > { %v8729_v14 = vpop.permute.xlu0 %2822 }
 0x2d0   : > { %3193 = vrot.lane.b32.xlu1 %v6805_v26, %s6919_s18  ;;  %3178 = vrot.lane.b32.xlu0 %v6803_v45, %s6919_s18  ;;  %v5529_v26 = vshrl.u32 %v8493_v23, 16  ;;  %v5534_v45 = vshrl.u32 %v8521_v15, 16  ;;  %v5588_v15 = vrot.slane %v5533_v13, %v9812_v33 }
 0x2d1   : > { %v8745_v3 = vpop.permute.xlu1 %2832 }
 0x2d2   : > { %9830 = vst [vmem:[#allocation26_spill] sm:$0xff] %v8745_v3  ;;  %v5536_v18 = vpack.i.b16 %v5535_v17, %v5534_v45  ;;  %v6810_v17 = vcombine.high %v8580_v44, %v8580_v44  ;;  %v5527_v44 = vpack.i.b16 %v8493_v23, %v8453_v62  ;;  %v5539_v62 = vpack.i.b16 %v8470_v22, %v8442_v11 }
 0x2d3   : > { %v8747_v6 = vpop.permute.xlu0 %2830 }
 0x2d4   : > { %3223 = vrot.lane.b32.xlu1 %v6809_v16, %s6919_s18  ;;  %3208 = vrot.lane.b32.xlu0 %v6807_v56, %s6919_s18  ;;  %v5541_v16 = vshrl.u32 %v8470_v22, 16  ;;  %v5530_v56 = vpack.i.b16 %v5529_v26, %v5528_v60  ;;  %v5622_v45 = vrot.slane %v5536_v18, %v9812_v33  ;;  %v5580_v23 = vrot.slane %v5527_v44, %v9812_v33 }
 0x2d5   : > { %v8763_v10 = vpop.permute.xlu1 %2840  ;;  %v5648_v11 = vrot.slane %v5539_v62, %v9812_v33  ;;  %v5656_v22 = vrot.slane %v5545_v55, %v9812_v33 }
 0x2d6   : > { %9831 = vst [vmem:[#allocation27_spill] sm:$0xff] %v8763_v10  ;;  %v5614_v60 = vrot.slane %v5530_v56, %v9812_v33 }
 0x2d7   : > { %v8765_v5 = vpop.permute.xlu0 %2838  ;;  %v5658_v44 = vcombine.high %v5648_v11, %v5656_v22 }
 0x2d8   : > { %4568 = vrot.lane.b32.xlu1 %v6837_v35, %s6919_s18  ;;  %4553 = vrot.lane.b32.xlu0 %v6835_v41, %s6919_s18  ;;  %v5546_v35 = vshrl.u32 %v8505_v37, 16  ;;  %v5547_v41 = vshrl.u32 %v8529_v30, 16  ;;  %v5624_v56 = vcombine.high %v5614_v60, %v5622_v45  ;;  %v5589_v37 = vcombine.low %v5580_v23, %v5588_v15 }
 0x2d9   : > { %v8779_v59 = vpop.permute.xlu1 %2848  ;;  %v5590_v30 = vcombine.high %v5580_v23, %v5588_v15 }
 0x2da   : > { %v5548_v26 = vpack.i.b16 %v5547_v41, %v5546_v35  ;;  %9832 = vst [vmem:[#allocation28_spill] sm:$0xff] %v8779_v59 }
 0x2db   : > { %v8781_v28 = vpop.permute.xlu0 %2846 }
 0x2dc   : > { %4598 = vrot.lane.b32.xlu1 %v6841_v36, %s6919_s18  ;;  %4583 = vrot.lane.b32.xlu0 %v6839_v53, %s6919_s18  ;;  %v6804_v36 = vcombine.high %v8563_v43, %v8563_v43  ;;  %v5542_v53 = vpack.i.b16 %v5541_v16, %v5540_v4  ;;  %v6838_v43 = vcombine.high %v8612_v31, %v8612_v31 }
 0x2dd   : > { %v5690_v4 = vrot.slane %v5548_v26, %v9812_v33  ;;  %v5623_v16 = vcombine.low %v5614_v60, %v5622_v45  ;;  %v6842_v31 = vcombine.high %v8634_v42, %v8634_v42  ;;  %v8807_v41 = vpop.permute.xlu1 %5499  ;;  %v8812_v42 = vrot.slane %v5624_v56, %v9813_v51  ;;  %v9839_v56 = vld [vmem:[#allocation8_spill] sm:$0xff] }
 0x2de   : > { %v5682_v18 = vrot.slane %v5542_v53, %v9812_v33  ;;  %9833 = vst [vmem:[#allocation29_spill] sm:$0xff] %v8807_v41 }
 0x2df   : > { %v6679_v53 = vcombine.low %v8812_v42, %v8812_v42 }
 0x2e0   : > { %3198 = vrot.lane.b32.xlu1 %v6806_v38, %s6920_s19  ;;  %3183 = vrot.lane.b32.xlu0 %v6804_v36, %s6920_s19  ;;  %v6836_v38 = vcombine.high %v8617_v58, %v8617_v58  ;;  %v6840_v58 = vcombine.high %v8637_v40, %v8637_v40  ;;  %v5692_v35 = vcombine.high %v5682_v18, %v5690_v4  ;;  %v8809_v36 = vpop.permute.xlu0 %5497 }
 0x2e1   : > { %9834 = vst [vmem:[#allocation30_spill] sm:$0xff] %v8809_v36  ;;  %v5631_v40 = vrot.slane %v5623_v16, %v9813_v51  ;;  %v8837_v16 = vrot.slane %v5589_v37, %v9813_v51  ;;  %v3630_v37 = vshrl.u32 %v8597_v48, 16  ;;  %v2895_v36 = vshrl.u32 %v8763_v10, 16 }
 0x2e2   : > { %v8822_v26 = vrot.slane %v5692_v35, %v9813_v51 }
 0x2e3   : > { %v6676_v60 = vcombine.low %v5631_v40, %v5631_v40  ;;  %9838 = vst [vmem:[#allocation34_spill] sm:$0xff] %v8837_v16  ;;  %v6867_v15 = vcombine.high %v8837_v16, %v8837_v16 }
 0x2e4   : > { %3228 = vrot.lane.b32.xlu1 %v6810_v17, %s6920_s19  ;;  %3213 = vrot.lane.b32.xlu0 %v6808_v32, %s6920_s19  ;;  %v5691_v32 = vcombine.low %v5682_v18, %v5690_v4  ;;  %v8825_v17 = vpop.permute.xlu1 %5507  ;;  %v6685_v13 = vcombine.low %v8822_v26, %v8822_v26  ;;  %v8834_v4 = vrot.slane %v5590_v30, %v9813_v51  ;;  %v3635_v30 = vshrl.u32 %v8609_v39, 16 }
 0x2e5   : > { %9835 = vst [vmem:[#allocation31_spill] sm:$0xff] %v8825_v17 }
 0x2e6   : > { %v5699_v45 = vrot.slane %v5691_v32, %v9813_v51  ;;  %9837 = vst [vmem:[#allocation33_spill] sm:$0xff] %v8834_v4  ;;  %v6869_v55 = vcombine.high %v8834_v4, %v8834_v4  ;;  %v8852_v32 = vrot.slane %v5658_v44, %v9813_v51 }
 0x2e8   : > { %4573 = vrot.lane.b32.xlu1 %v6838_v43, %s6920_s19  ;;  %4558 = vrot.lane.b32.xlu0 %v6836_v38, %s6920_s19  ;;  %v8827_v43 = vpop.permute.xlu0 %5505  ;;  %v5657_v38 = vcombine.low %v5648_v11, %v5656_v22  ;;  %v6682_v18 = vcombine.low %v5699_v45, %v5699_v45  ;;  %v8843_v62 = vpop.permute.xlu1 %5515  ;;  %9843 = vst [vmem:[#allocation35_spill] sm:$0xff] %v8852_v32  ;;  %v3629_v22 = vshrl.u32 %v8585_v21, 16 }
 0x2e9   : > { %9836 = vst [vmem:[#allocation32_spill] sm:$0xff] %v8827_v43  ;;  %9841 = vst [vmem:[#allocation8_spill] sm:$0xff] %v8843_v62  ;;  %v6868_v62 = vcombine.high %v5631_v40, %v5631_v40  ;;  %v6870_v40 = vcombine.high %v8812_v42, %v8812_v42  ;;  %v6874_v42 = vcombine.high %v8822_v26, %v8822_v26 }
 0x2ea   : > { %v8855_v35 = vrot.slane %v5657_v38, %v9813_v51  ;;  %v3628_v26 = vpack.i.b16 %v8597_v48, %v8585_v21 }
 0x2ec   : > { %4603 = vrot.lane.b32.xlu1 %v6842_v31, %s6920_s19  ;;  %4588 = vrot.lane.b32.xlu0 %v6840_v58, %s6920_s19  ;;  %v9840_v31 = vld [vmem:[#allocation7_spill] sm:$0xff]  ;;  %v8845_v23 = vpop.permute.xlu0 %5513  ;;  %9844 = vst [vmem:[#allocation36_spill] sm:$0xff] %v8855_v35  ;;  %v6871_v38 = vcombine.high %v8855_v35, %v8855_v35  ;;  %v8878_v16 = vpop.permute.xlu1 %5523  ;;  %v3631_v35 = vpack.i.b16 %v3630_v37, %v3629_v22  ;;  %v4900_v37 = vshrl.u32 %v8643_v47, 16 }
 0x2ed   : > { %v2397_v58 = vcombine.high %v9840_v31, %v9839_v56  ;;  %9842 = vst [vmem:[#allocation7_spill] sm:$0xff] %v8845_v23  ;;  %v3641_v31 = vshrl.u32 %v8569_v46, 16  ;;  %v6872_v22 = vcombine.high %v5699_v45, %v5699_v45 }
 0x2ef   : > { %v8858_v11 = vrot.slane %v2397_v58, %v9813_v51  ;;  %v3642_v58 = vshrl.u32 %v8591_v57, 16 }
 0x2f0   : > { %5863 = vrot.lane.b32.xlu1 %v6679_v53, %s6921_s20  ;;  %5848 = vrot.lane.b32.xlu0 %v6676_v60, %s6921_s20  ;;  %v3636_v53 = vshrl.u32 %v8625_v54, 16  ;;  %v6873_v60 = vcombine.high %v8852_v32, %v8852_v32  ;;  %v8880_v32 = vpop.permute.xlu0 %5521 }
 0x2f1   : > { %v6545_v44 = vcombine.low %v8858_v11, %v8858_v11 }
 0x2f2   : > { %v3637_v4 = vpack.i.b16 %v3636_v53, %v3635_v30  ;;  %v4901_v30 = vshrl.u32 %v8660_v24, 16  ;;  %v4906_v53 = vshrl.u32 %v8677_v25, 16 }
 0x2f4   : > { %5893 = vrot.lane.b32.xlu1 %v6685_v13, %s6921_s20  ;;  %5878 = vrot.lane.b32.xlu0 %v6682_v18, %s6921_s20  ;;  %v9845_v13 = vld [vmem:[#allocation6_spill] sm:$0xff]  ;;  %v9846_v18 = vld [vmem:[#allocation5_spill] sm:$0xff] }
 0x2f5   : > { %v2363_v56 = vcombine.high %v9846_v18, %v9845_v13  ;;  %9847 = vst [vmem:[#allocation6_spill] sm:$0xff] %v8878_v16  ;;  %9848 = vst [vmem:[#allocation5_spill] sm:$0xff] %v8880_v32  ;;  %v3643_v18 = vpack.i.b16 %v3642_v58, %v3641_v31  ;;  %v4912_v31 = vshrl.u32 %v8639_v12, 16  ;;  %v4913_v58 = vshrl.u32 %v8653_v27, 16 }
 0x2f7   : > { %v8885_v13 = vrot.slane %v2363_v56, %v9813_v51  ;;  %v4907_v56 = vshrl.u32 %v8701_v0, 16 }
 0x2f8   : > { %5868 = vrot.lane.b32.xlu1 %v6869_v55, %s6919_s18  ;;  %5853 = vrot.lane.b32.xlu0 %v6867_v15, %s6919_s18  ;;  %v3647_v55 = vshrl.u32 %v8601_v1, 16  ;;  %v3648_v15 = vshrl.u32 %v8619_v7, 16 }
 0x2f9   : > { %9849 = vst [vmem:[#allocation37_spill] sm:$0xff] %v8885_v13 }
 0x2fa   : > { %v3649_v17 = vpack.i.b16 %v3648_v15, %v3647_v55  ;;  %v8887_v41 = vpop.permute.xlu1 %3940  ;;  %v8889_v23 = vpop.permute.xlu0 %3925  ;;  %v4902_v55 = vpack.i.b16 %v4901_v30, %v4900_v37  ;;  %v4918_v15 = vshrl.u32 %v8675_v20, 16  ;;  %v4914_v30 = vpack.i.b16 %v4913_v58, %v4912_v31 }
 0x2fc   : > { %5898 = vrot.lane.b32.xlu1 %v6873_v60, %s6919_s18  ;;  %5883 = vrot.lane.b32.xlu0 %v6871_v38, %s6919_s18  ;;  %v3827_v60 = vrot.slane %v3631_v35, %v9812_v33  ;;  %v3835_v38 = vrot.slane %v3637_v4, %v9812_v33  ;;  %v3903_v35 = vrot.slane %v3649_v17, %v9812_v33 }
 0x2fd   : > { %v5098_v48 = vrot.slane %v4902_v55, %v9812_v33  ;;  %v5166_v31 = vrot.slane %v4914_v30, %v9812_v33 }
 0x2fe   : > { %v3836_v45 = vcombine.low %v3827_v60, %v3835_v38  ;;  %v3837_v4 = vcombine.high %v3827_v60, %v3835_v38  ;;  %v8913_v17 = vpop.permute.xlu1 %3970  ;;  %v6802_v38 = vcombine.high %v8858_v11, %v8858_v11 }
 0x300   : > { %5858 = vrot.lane.b32.xlu1 %v6868_v62, %s6920_s19  ;;  %2522 = vrot.lane.b32.xlu0 %v6545_v44, %s6921_s20  ;;  %v6801_v62 = vcombine.high %v8885_v13, %v8885_v13  ;;  %v3895_v44 = vrot.slane %v3643_v18, %v9812_v33  ;;  %v4919_v18 = vshrl.u32 %v8699_v9, 16  ;;  %v4908_v13 = vpack.i.b16 %v4907_v56, %v4906_v53 }
 0x301   : > { %v8926_v53 = vrot.slane %v3837_v4, %v9813_v51  ;;  %v9759_v56 = vmov 0   ;;  %v8937_v11 = vrot.slane %v3836_v45, %v9813_v51  ;;  %v3793_v4 = vrot.slane %v3628_v26, %v9812_v33 }
 0x302   : > { %v3904_v60 = vcombine.low %v3895_v44, %v3903_v35  ;;  %v3905_v37 = vcombine.high %v3895_v44, %v3903_v35  ;;  %6237 = vmatprep.mubr.bf16.mxu0 %v9759_v56  ;;  %6278 = vmatprep.mubr.bf16.mxu1 %v9759_v56  ;;  %v4920_v21 = vpack.i.b16 %v4919_v18, %v4918_v15 }
 0x303   : > { %6900 = vset.pattern.permute.xlu0 %v9759_v56  ;;  %v3634_v44 = vpack.i.b16 %v8625_v54, %v8609_v39  ;;  %v3640_v35 = vpack.i.b16 %v8591_v57, %v8569_v46  ;;  %v6595_v45 = vcombine.low %v8926_v53, %v8926_v53  ;;  %v6592_v15 = vcombine.low %v8937_v11, %v8937_v11 }
 0x304   : > { %5888 = vrot.lane.b32.xlu1 %v6872_v22, %s6920_s19  ;;  %5873 = vrot.lane.b32.xlu0 %v6870_v40, %s6920_s19  ;;  %v8915_v22 = vpop.permute.xlu0 %3955  ;;  %v9850_v40 = vld [vmem:[#allocation10_spill] sm:$0xff]  ;;  %v8954_v58 = vrot.slane %v3905_v37, %v9813_v51  ;;  %v8957_v39 = vrot.slane %v3904_v60, %v9813_v51  ;;  %v5174_v46 = vrot.slane %v4920_v21, %v9812_v33  ;;  %v9851_v60 = vrot.slane %v8449_v34, 5 }
 0x305   : > { %v6800_v16 = vcombine.high %v9850_v40, %v9850_v40  ;;  %v3646_v18 = vpack.i.b16 %v8619_v7, %v8601_v1  ;;  %v3801_v26 = vrot.slane %v3634_v44, %v9812_v33  ;;  %v3861_v30 = vrot.slane %v3640_v35, %v9812_v33  ;;  %v8980_v7 = vld [vmem:[%s6959_s17 + $0x20] sm:$0xf] }
 0x306   : > { %v6598_v1 = vcombine.low %v8957_v39, %v8957_v39  ;;  %v5175_v21 = vcombine.low %v5166_v31, %v5174_v46  ;;  %v9864_v63 = vrot.slane %v8980_v7, 5 }
 0x307   : > { %v3803_v56 = vcombine.high %v3793_v4, %v3801_v26  ;;  %v3802_v43 = vcombine.low %v3793_v4, %v3801_v26  ;;  %v9856_v4 = vrot.slane %v8482_v19, 5 }
 0x308   : > { %2527 = vrot.lane.b32.xlu1 %v6801_v62, %s6919_s18  ;;  %5903 = vrot.lane.b32.xlu0 %v6874_v42, %s6920_s19  ;;  %v5106_v62 = vrot.slane %v4908_v13, %v9812_v33  ;;  %v8948_v13 = vld [vmem:[%s6959_s17 + $0xc] sm:$0xf] }
 0x309   : > { %v9763_v37 = vrot.slane %v8948_v13, 5 }
 0x30a   : > { %v8932_v42 = vpop.permute.xlu1 %5211  ;;  %v8934_v40 = vpop.permute.xlu0 %5196  ;;  %v5107_v57 = vcombine.low %v5098_v48, %v5106_v62  ;;  %v5108_v54 = vcombine.high %v5098_v48, %v5106_v62  ;;  %v6601_v48 = vcombine.low %v8954_v58, %v8954_v58  ;;  %v5176_v62 = vcombine.high %v5166_v31, %v5174_v46 }
 0x30b   : > { %v9855_v46 = vrot.slane %v8473_v29, 5  ;;  %v4905_v29 = vpack.i.b16 %v8701_v0, %v8677_v25  ;;  %v9033_v25 = vrot.slane %v5175_v21, %v9813_v51  ;;  %v9047_v21 = vrot.slane %v3802_v43, %v9813_v51 }
 0x30c   : > { %2532 = vrot.lane.b32.xlu1 %v6802_v38, %s6920_s19  ;;  %2517 = vrot.lane.b32.xlu0 %v6800_v16, %s6920_s19  ;;  %v4180_v38 = vrot.slane %v9851_v60, 4  ;;  %v8990_v35 = vrot.slane %v5107_v57, %v9813_v51  ;;  %v3869_v60 = vrot.slane %v3646_v18, %v9812_v33  ;;  %v4899_v57 = vpack.i.b16 %v8660_v24, %v8643_v47 }
 0x30d   : > { %v4193_v32 = vrot.slane %v9855_v46, 4  ;;  %v9016_v46 = vld [vmem:[%s6959_s17 + $0x48] sm:$0xf]  ;;  %9858 = vst [vmem:[#allocation41_spill] sm:$0xff] %v9033_v25  ;;  %9861 = vst [vmem:[#allocation43_spill] sm:$0xff] %v9047_v21  ;;  %v2890_v18 = vshrl.u32 %v8745_v3, 16 }
 0x30e   : > { %v8960_v55 = vpop.permute.xlu1 %5241  ;;  %v8962_v16 = vpop.permute.xlu0 %5226  ;;  %9853 = vst [vmem:[#allocation38_spill] sm:$0xff] %v8990_v35  ;;  %v9000_v31 = vsel %vm7800_vm8, %v4180_v38, %v9763_v37  ;;  %v4917_v38 = vpack.i.b16 %v8699_v9, %v8675_v20  ;;  %v6656_v20 = vcombine.low %v8990_v35, %v8990_v35  ;;  %v9030_v9 = vrot.slane %v5176_v62, %v9813_v51 }
 0x30f   : > { %9854 = vst [vmem:[#allocation39_spill] sm:$0xff] %v9000_v31  ;;  %v3870_v19 = vcombine.low %v3861_v30, %v3869_v60  ;;  %v3871_v0 = vcombine.high %v3861_v30, %v3869_v60  ;;  %v2878_v62 = vshrl.u32 %v8747_v6, 16  ;;  %v2884_v60 = vshrl.u32 %v8781_v28, 16 }
 0x310   : > { %4000 = vrot.lane.b32.xlu1 %v6595_v45, %s6921_s20  ;;  %3985 = vrot.lane.b32.xlu0 %v6592_v15, %s6921_s20  ;;  %v8987_v45 = vrot.slane %v5108_v54, %v9813_v51  ;;  %v8993_v15 = vld [vmem:[%s6959_s17 + $0x34] sm:$0xf]  ;;  %v4911_v54 = vpack.i.b16 %v8653_v27, %v8639_v12  ;;  %v4206_v12 = vrot.slane %v9856_v4, 4  ;;  %9857 = vst [vmem:[#allocation40_spill] sm:$0xff] %v9030_v9  ;;  %v2889_v30 = vshrl.u32 %v8727_v49, 16 }
 0x311   : > { %v5064_v27 = vrot.slane %v4899_v57, %v9812_v33  ;;  %v5072_v57 = vrot.slane %v4905_v29, %v9812_v33  ;;  %v6665_v43 = vcombine.low %v9030_v9, %v9030_v9  ;;  %v9073_v29 = vrot.slane %v3871_v0, %v9813_v51 }
 0x312   : > { %v8982_v34 = vpop.permute.xlu1 %3945  ;;  %v8984_v44 = vpop.permute.xlu0 %3930  ;;  %9852 = vst [vmem:[#allocation10_spill] sm:$0xff] %v8987_v45  ;;  %v6659_v26 = vcombine.low %v8987_v45, %v8987_v45  ;;  %v9041_v37 = vrot.slane %v4911_v54, %v9812_v33  ;;  %v9055_v54 = vrot.slane %v4917_v38, %v9812_v33  ;;  %v2896_v38 = vshrl.u32 %v8779_v59, 16 }
 0x313   : > { %9862 = vst [vmem:[#allocation44_spill] sm:$0xff] %v9073_v29  ;;  %v9076_v2 = vrot.slane %v3870_v19, %v9813_v51  ;;  %v5073_v19 = vcombine.low %v5064_v27, %v5072_v57 }
 0x314   : > { %4030 = vrot.lane.b32.xlu1 %v6601_v48, %s6921_s20  ;;  %4015 = vrot.lane.b32.xlu0 %v6598_v1, %s6921_s20  ;;  %v9036_v48 = vrot.slane %v3803_v56, %v9813_v51  ;;  %v9860_v1 = vrot.slane %v8485_v50, 5  ;;  %v2877_v56 = vshrl.u32 %v8729_v14, 16  ;;  %v2883_v50 = vshrl.u32 %v8765_v5, 16 }
 0x315   : > { %9863 = vst [vmem:[#allocation45_spill] sm:$0xff] %v9076_v2 }
 0x316   : > { %v9021_v47 = vpop.permute.xlu1 %3975  ;;  %v9023_v24 = vpop.permute.xlu0 %3960  ;;  %9859 = vst [vmem:[#allocation42_spill] sm:$0xff] %v9036_v48  ;;  %v4219_v4 = vrot.slane %v9860_v1, 4  ;;  %v6662_v1 = vcombine.low %v9033_v25, %v9033_v25  ;;  %v9082_v25 = vsel %vm7800_vm8, %v4193_v32, %v9864_v63  ;;  %v2879_v9 = vpack.i.b16 %v2878_v62, %v2877_v56 }
 0x317   : > { %9865 = vst [vmem:[#allocation46_spill] sm:$0xff] %v9082_v25  ;;  %v2885_v35 = vpack.i.b16 %v2884_v60, %v2883_v50  ;;  %v6829_v45 = vcombine.high %v9036_v48, %v9036_v48  ;;  %v6827_v63 = vcombine.high %v9047_v21, %v9047_v21  ;;  %v9868_v32 = vrot.slane %v9016_v46, 5 }
 0x318   : > { %5271 = vrot.lane.b32.xlu1 %v6659_v26, %s6921_s20  ;;  %5256 = vrot.lane.b32.xlu0 %v6656_v20, %s6921_s20  ;;  %v2891_v62 = vpack.i.b16 %v2890_v18, %v2889_v30  ;;  %v6833_v50 = vcombine.high %v9073_v29, %v9073_v29  ;;  %v6831_v60 = vcombine.high %v9076_v2, %v9076_v2  ;;  %v4139_v30 = vld [vmem:[%s6959_s17 + $0x24] sm:$0x1]  ;;  %v9872_v48 = vrot.slane %v8948_v13, 5 }
 0x319   : > { %v9102_v56 = vsel %vm7800_vm8, %v4219_v4, %v9868_v32  ;;  %v4252_v4 = vshrl.u32 %v9000_v31, 16  ;;  %v3075_v32 = vrot.slane %v2879_v9, %v9812_v33  ;;  %v9131_v9 = vrot.slane %v5073_v19, %v9813_v51 }
 0x31a   : > { %v9058_v26 = vpop.permute.xlu1 %5216  ;;  %v9060_v20 = vpop.permute.xlu0 %5201  ;;  %9869 = vst [vmem:[#allocation48_spill] sm:$0xff] %v9102_v56  ;;  %v4259_v18 = vshrl.u32 %v9102_v56, 16  ;;  %v3143_v56 = vrot.slane %v2891_v62, %v9812_v33 }
 0x31c   : > { %5301 = vrot.lane.b32.xlu1 %v6665_v43, %s6921_s20  ;;  %5286 = vrot.lane.b32.xlu0 %v6662_v1, %s6921_s20  ;;  %v9866_v43 = vrot.slane %v8993_v15, 5  ;;  %v5074_v1 = vcombine.high %v5064_v27, %v5072_v57  ;;  %v2897_v27 = vpack.i.b16 %v2896_v38, %v2895_v36  ;;  %v4253_v57 = vshrl.u32 %v9082_v25, 16  ;;  %v4144_v38 = vld [vmem:[%s6959_s17 + $0x38] sm:$0x1] }
 0x31d   : > { %v3083_v36 = vrot.slane %v2885_v35, %v9812_v33  ;;  %v4149_v35 = vld [vmem:[%s6959_s17 + $0x4c] sm:$0x1] }
 0x31e   : > { %v9090_v0 = vsel %vm7800_vm8, %v4206_v12, %v9866_v43  ;;  %v9092_v59 = vpop.permute.xlu1 %5246  ;;  %v9094_v10 = vpop.permute.xlu0 %5231  ;;  %v5142_v12 = vcombine.high %v9041_v37, %v9055_v54  ;;  %v4134_v43 = vld [vmem:[%s6959_s17 + $0x10] sm:$0x1]  ;;  %v9128_v21 = vrot.slane %v5074_v1, %v9813_v51  ;;  %v3151_v25 = vrot.slane %v2897_v27, %v9812_v33 }
 0x31f   : > { %9867 = vst [vmem:[#allocation47_spill] sm:$0xff] %v9090_v0  ;;  %v9873_v1 = vrot.slane %v8980_v7, 5  ;;  %v3085_v31 = vcombine.high %v3075_v32, %v3083_v36  ;;  %v4254_v62 = vpack.i.b16 %v4253_v57, %v4252_v4  ;;  %v9875_v27 = vrot.slane %v9016_v46, 5 }
 0x320   : > { %4005 = vrot.lane.b32.xlu1 %v6829_v45, %s6919_s18  ;;  %3990 = vrot.lane.b32.xlu0 %v6827_v63, %s6919_s18  ;;  %v4258_v45 = vshrl.u32 %v9090_v0, 16  ;;  %v5141_v63 = vcombine.low %v9041_v37, %v9055_v54  ;;  %v4183_v0 = vrot.slane %v9872_v48, 4  ;;  %v9139_v37 = vrot.slane %v5142_v12, %v9813_v51 }
 0x321   : > { %v4184_v54 = vrot.slane %v4134_v43, 5  ;;  %v4196_v19 = vrot.slane %v9873_v1, 4  ;;  %v4210_v48 = vrot.slane %v4144_v38, 5  ;;  %v4222_v3 = vrot.slane %v9875_v27, 4  ;;  %v9877_v1 = vld [vmem:[#allocation3_spill] sm:$0xff] }
 0x322   : > { %v9123_v29 = vpop.permute.xlu1 %3188  ;;  %v9125_v2 = vpop.permute.xlu0 %3173  ;;  %v4223_v12 = vrot.slane %v4149_v35, 5  ;;  %v3084_v49 = vcombine.low %v3075_v32, %v3083_v36  ;;  %v6861_v7 = vcombine.high %v9128_v21, %v9128_v21  ;;  %v6865_v46 = vcombine.high %v9139_v37, %v9139_v37  ;;  %v9876_v35 = vld [vmem:[#allocation12_spill] sm:$0xff] }
 0x323   : > { %9870 = vst [vmem:[#allocation49_spill] sm:$0xff] %v9123_v29  ;;  %9871 = vst [vmem:[#allocation50_spill] sm:$0xff] %v9125_v2  ;;  %v4197_v2 = vrot.slane %v4139_v30, 5  ;;  %v9874_v29 = vrot.slane %v8993_v15, 5  ;;  %v9158_v15 = vrot.slane %v5141_v63, %v9813_v51  ;;  %v4260_v4 = vpack.i.b16 %v4259_v18, %v4258_v45 }
 0x324   : > { %4035 = vrot.lane.b32.xlu1 %v6833_v50, %s6919_s18  ;;  %4020 = vrot.lane.b32.xlu0 %v6831_v60, %s6919_s18  ;;  %v6859_v60 = vcombine.high %v9131_v9, %v9131_v9  ;;  %v9164_v57 = vsel %vm7800_vm8, %v4183_v0, %v4184_v54  ;;  %v3152_v32 = vcombine.low %v3143_v56, %v3151_v25 }
 0x325   : > { %v4209_v13 = vrot.slane %v9874_v29, 4  ;;  %v3153_v29 = vcombine.high %v3143_v56, %v3151_v25  ;;  %v9170_v36 = vsel %vm7800_vm8, %v4196_v19, %v4197_v2  ;;  %v4051_v45 = vsel %vm628_vm0, %v8401_v8, %v8887_v41 }
 0x326   : > { %v9149_v43 = vpop.permute.xlu1 %3218  ;;  %v9151_v50 = vpop.permute.xlu0 %3203  ;;  %v4044_v25 = vsel %vm628_vm0, %v8404_v52, %v8889_v23  ;;  %v9183_v0 = vrot.slane %v3085_v31, %v9813_v51  ;;  %v9187_v56 = vsel %vm7800_vm8, %v4222_v3, %v4223_v12  ;;  %v4053_v2 = vsel %vm632_vm1, %v4051_v45, %v8982_v34 }
 0x327   : > { %v9174_v30 = vsel %vm7800_vm8, %v4209_v13, %v4210_v48  ;;  %v4046_v18 = vsel %vm632_vm1, %v4044_v25, %v8984_v44  ;;  %v6863_v8 = vcombine.high %v9158_v15, %v9158_v15  ;;  %v9196_v52 = vrot.slane %v3084_v49, %v9813_v51 }
 0x328   : > { %5276 = vrot.lane.b32.xlu1 %v6861_v7, %s6919_s18  ;;  %5261 = vrot.lane.b32.xlu0 %v6859_v60, %s6919_s18  ;;  %v9201_v3 = vrot.slane %v3153_v29, %v9813_v51  ;;  %v4264_v23 = vshrl.u32 %v9164_v57, 16  ;;  %v4265_v44 = vshrl.u32 %v9170_v36, 16  ;;  %v4270_v31 = vshrl.u32 %v9174_v30, 16 }
 0x329   : > { %v4271_v49 = vshrl.u32 %v9187_v56, 16  ;;  %v4065_v54 = vsel %vm628_vm0, %v9876_v35, %v8913_v17  ;;  %v4058_v19 = vsel %vm628_vm0, %v9877_v1, %v8915_v22  ;;  %v6567_v13 = vcombine.low %v9183_v0, %v9183_v0 }
 0x32a   : > { %v3951_v38 = vpop.permute.xlu1 %3950  ;;  %v3936_v63 = vpop.permute.xlu0 %3935  ;;  %v9218_v48 = vrot.slane %v3152_v32, %v9813_v51  ;;  %v4067_v27 = vsel %vm632_vm1, %v4065_v54, %v9021_v47  ;;  %v4060_v12 = vsel %vm632_vm1, %v4058_v19, %v9023_v24  ;;  %v6564_v17 = vcombine.low %v9196_v52, %v9196_v52  ;;  %v9878_v19 = vld [vmem:[#allocation4_spill] sm:$0xff] }
 0x32b   : > { %v4055_v41 = vsel %vm635_vm2, %v4053_v2, %v3951_v38  ;;  %v4048_v61 = vsel %vm635_vm2, %v4046_v18, %v3936_v63  ;;  %v4450_v45 = vrot.slane %v4254_v62, %v9812_v33  ;;  %v4458_v32 = vrot.slane %v4260_v4, %v9812_v33 }
 0x32c   : > { %v6604_v34 = vcombine.low %v4048_v61, %v4055_v41  ;;  %5306 = vrot.lane.b32.xlu1 %v6865_v46, %s6919_s18  ;;  %5291 = vrot.lane.b32.xlu0 %v6863_v8, %s6919_s18  ;;  %v4266_v47 = vpack.i.b16 %v4265_v44, %v4264_v23  ;;  %v4272_v24 = vpack.i.b16 %v4271_v49, %v4270_v31 }
 0x32d   : > { %v6573_v63 = vcombine.low %v9201_v3, %v9201_v3  ;;  %v6570_v62 = vcombine.low %v9218_v48, %v9218_v48  ;;  %v4460_v4 = vcombine.high %v4450_v45, %v4458_v32  ;;  %v4459_v8 = vcombine.low %v4450_v45, %v4458_v32  ;;  %v9880_v45 = vld [vmem:[#allocation15_spill] sm:$0xff] }
 0x32e   : > { %v4118_v7 = vrot.slane %v6604_v34, 6  ;;  %v3981_v60 = vpop.permute.xlu1 %3980  ;;  %v3966_v29 = vpop.permute.xlu0 %3965  ;;  %v4518_v41 = vrot.slane %v4266_v47, %v9812_v33  ;;  %v4526_v61 = vrot.slane %v4272_v24, %v9812_v33  ;;  %v6830_v44 = vcombine.high %v8926_v53, %v8926_v53  ;;  %v9879_v53 = vld [vmem:[#allocation14_spill] sm:$0xff] }
 0x32f   : > { %v4069_v22 = vsel %vm635_vm2, %v4067_v27, %v3981_v60  ;;  %v4062_v46 = vsel %vm635_vm2, %v4060_v12, %v3966_v29  ;;  %v6828_v31 = vcombine.high %v8937_v11, %v8937_v11  ;;  %v9253_v49 = vrot.slane %v4460_v4, %v9813_v51 }
 0x330   : > { %4126 = vst [vmem:[#allocation2 + $0x40] sm:$0xcc] %v4118_v7  ;;  %v6605_v25 = vcombine.low %v4062_v46, %v4069_v22  ;;  %3248 = vrot.lane.b32.xlu1 %v6567_v13, %s6921_s20  ;;  %3233 = vrot.lane.b32.xlu0 %v6564_v17, %s6921_s20  ;;  %v9256_v35 = vrot.slane %v4459_v8, %v9813_v51 }
 0x331   : > { %v4528_v54 = vcombine.high %v4518_v41, %v4526_v61  ;;  %v4527_v1 = vcombine.low %v4518_v41, %v4526_v61  ;;  %v5322_v13 = vsel %vm628_vm0, %v9878_v19, %v8932_v42  ;;  %v5315_v11 = vsel %vm628_vm0, %v9879_v53, %v8934_v40  ;;  %v9884_v41 = vld [vmem:[#allocation27_spill] sm:$0xff]  ;;  %v9885_v61 = vld [vmem:[#allocation28_spill] sm:$0xff] }
 0x332   : > { %v4119_v2 = vrot.slane %v6605_v25, 6  ;;  %v9232_v18 = vpop.permute.xlu1 %4563  ;;  %v9234_v38 = vpop.permute.xlu0 %4548  ;;  %v5324_v27 = vsel %vm632_vm1, %v5322_v13, %v9058_v26  ;;  %v5317_v12 = vsel %vm632_vm1, %v5315_v11, %v9060_v20  ;;  %v6834_v29 = vcombine.high %v8954_v58, %v8954_v58  ;;  %v9881_v25 = vld [vmem:[#allocation16_spill] sm:$0xff]  ;;  %v9886_v53 = vld [vmem:[#allocation39_spill] sm:$0xff]  ;;  %v9887_v11 = vld [vmem:[#allocation46_spill] sm:$0xff] }
 0x333   : > { %v6832_v17 = vcombine.high %v8957_v39, %v8957_v39  ;;  %v6627_v40 = vcombine.low %v9253_v49, %v9253_v49  ;;  %v6624_v26 = vcombine.low %v9256_v35, %v9256_v35  ;;  %v9283_v58 = vrot.slane %v4528_v54, %v9813_v51 }
 0x334   : > { %4127 = vst [vmem:[#allocation2 + $0x48] sm:$0xcc] %v4119_v2  ;;  %3278 = vrot.lane.b32.xlu1 %v6573_v63, %s6921_s20  ;;  %3263 = vrot.lane.b32.xlu0 %v6570_v62, %s6921_s20  ;;  %v9286_v39 = vrot.slane %v4527_v1, %v9813_v51  ;;  %v2876_v20 = vpack.i.b16 %v8747_v6, %v8729_v14 }
 0x335   : > { %v5336_v32 = vsel %vm628_vm0, %v9880_v45, %v8960_v55  ;;  %v5329_v47 = vsel %vm628_vm0, %v9881_v25, %v8962_v16  ;;  %v2882_v24 = vpack.i.b16 %v8781_v28, %v8765_v5  ;;  %v6633_v28 = vcombine.low %v9283_v58, %v9283_v58  ;;  %v9891_v45 = vld [vmem:[#allocation38_spill] sm:$0xff] }
 0x336   : > { %v9244_v23 = vpop.permute.xlu1 %4593  ;;  %v9246_v34 = vpop.permute.xlu0 %4578  ;;  %v5338_v2 = vsel %vm632_vm1, %v5336_v32, %v9092_v59  ;;  %v5331_v63 = vsel %vm632_vm1, %v5329_v47, %v9094_v10  ;;  %v6630_v5 = vcombine.low %v9286_v39, %v9286_v39  ;;  %v9882_v10 = vld [vmem:[#allocation23_spill] sm:$0xff]  ;;  %v9883_v59 = vld [vmem:[#allocation26_spill] sm:$0xff]  ;;  %v6860_v32 = vcombine.high %v9891_v45, %v9891_v45 }
 0x337   : > { %v2888_v16 = vpack.i.b16 %v9883_v59, %v9882_v10  ;;  %v3049_v54 = vrot.slane %v2882_v24, %v9812_v33  ;;  %v4263_v25 = vpack.i.b16 %v9170_v36, %v9164_v57  ;;  %v4269_v47 = vpack.i.b16 %v9187_v56, %v9174_v30 }
 0x338   : > { %4010 = vrot.lane.b32.xlu1 %v6830_v44, %s6920_s19  ;;  %3995 = vrot.lane.b32.xlu0 %v6828_v31, %s6920_s19  ;;  %v2894_v44 = vpack.i.b16 %v9885_v61, %v9884_v41  ;;  %v3041_v31 = vrot.slane %v2876_v20, %v9812_v33 }
 0x339   : > { %v4484_v56 = vrot.slane %v4263_v25, %v9812_v33 }
 0x33a   : > { %v5222_v7 = vpop.permute.xlu1 %5221  ;;  %v5207_v60 = vpop.permute.xlu0 %5206 }
 0x33b   : > { %v5326_v42 = vsel %vm635_vm2, %v5324_v27, %v5222_v7  ;;  %v5319_v22 = vsel %vm635_vm2, %v5317_v12, %v5207_v60  ;;  %v4251_v27 = vpack.i.b16 %v9887_v11, %v9886_v53  ;;  %v9888_v12 = vld [vmem:[#allocation47_spill] sm:$0xff]  ;;  %v9889_v7 = vld [vmem:[#allocation48_spill] sm:$0xff] }
 0x33c   : > { %v6668_v46 = vcombine.low %v5319_v22, %v5326_v42  ;;  %4040 = vrot.lane.b32.xlu1 %v6834_v29, %s6920_s19  ;;  %4025 = vrot.lane.b32.xlu0 %v6832_v17, %s6920_s19  ;;  %v4257_v60 = vpack.i.b16 %v9889_v7, %v9888_v12  ;;  %v3109_v29 = vrot.slane %v2888_v16, %v9812_v33  ;;  %v9895_v12 = vld [vmem:[#allocation17_spill] sm:$0xff] }
 0x33d   : > { %v3117_v17 = vrot.slane %v2894_v44, %v9812_v33  ;;  %v3050_v42 = vcombine.low %v3041_v31, %v3049_v54  ;;  %v3051_v22 = vcombine.high %v3041_v31, %v3049_v54  ;;  %v4416_v24 = vrot.slane %v4251_v27, %v9812_v33  ;;  %v9894_v27 = vld [vmem:[#allocation49_spill] sm:$0xff] }
 0x33e   : > { %v5389_v62 = vrot.slane %v6668_v46, 6  ;;  %v5252_v4 = vpop.permute.xlu1 %5251  ;;  %v5237_v14 = vpop.permute.xlu0 %5236  ;;  %v9890_v46 = vld [vmem:[#allocation10_spill] sm:$0xff]  ;;  %v3299_v7 = vsel %vm628_vm0, %v9895_v12, %v9894_v27 }
 0x33f   : > { %v5340_v6 = vsel %vm635_vm2, %v5338_v2, %v5252_v4  ;;  %v5333_v55 = vsel %vm635_vm2, %v5331_v63, %v5237_v14  ;;  %v6862_v20 = vcombine.high %v9890_v46, %v9890_v46  ;;  %v4424_v2 = vrot.slane %v4257_v60, %v9812_v33  ;;  %v9896_v60 = vld [vmem:[#allocation50_spill] sm:$0xff] }
 0x340   : > { %5397 = vst [vmem:[#allocation2 + $0x60] sm:$0xcc] %v5389_v62  ;;  %v6669_v8 = vcombine.low %v5333_v55, %v5340_v6  ;;  %4623 = vrot.lane.b32.xlu1 %v6627_v40, %s6921_s20  ;;  %4608 = vrot.lane.b32.xlu0 %v6624_v26, %s6921_s20  ;;  %v3118_v63 = vcombine.low %v3109_v29, %v3117_v17  ;;  %v9892_v6 = vld [vmem:[#allocation40_spill] sm:$0xff] }
 0x341   : > { %v3119_v62 = vcombine.high %v3109_v29, %v3117_v17  ;;  %v6866_v55 = vcombine.high %v9892_v6, %v9892_v6  ;;  %v9341_v36 = vrot.slane %v3051_v22, %v9813_v51  ;;  %v9344_v30 = vrot.slane %v3050_v42, %v9813_v51  ;;  %v9897_v29 = vld [vmem:[#allocation18_spill] sm:$0xff] }
 0x342   : > { %v5390_v1 = vrot.slane %v6669_v8, 6  ;;  %v3194_v19 = vpop.permute.xlu1 %3193  ;;  %v3179_v13 = vpop.permute.xlu0 %3178  ;;  %v9893_v8 = vld [vmem:[#allocation41_spill] sm:$0xff]  ;;  %v4425_v10 = vcombine.low %v4416_v24, %v4424_v2  ;;  %v9362_v31 = vrot.slane %v3118_v63, %v9813_v51  ;;  %v3292_v17 = vsel %vm628_vm0, %v9897_v29, %v9896_v60 }
 0x343   : > { %v6864_v57 = vcombine.high %v9893_v8, %v9893_v8  ;;  %v6813_v41 = vcombine.high %v9341_v36, %v9341_v36  ;;  %v6811_v61 = vcombine.high %v9344_v30, %v9344_v30  ;;  %v9359_v44 = vrot.slane %v3119_v62, %v9813_v51  ;;  %v9898_v62 = vld [vmem:[#allocation19_spill] sm:$0xff]  ;;  %v9904_v29 = vld [vmem:[#allocation21_spill] sm:$0xff] }
 0x344   : > { %5398 = vst [vmem:[#allocation2 + $0x68] sm:$0xcc] %v5390_v1  ;;  %4653 = vrot.lane.b32.xlu1 %v6633_v28, %s6921_s20  ;;  %4638 = vrot.lane.b32.xlu0 %v6630_v5, %s6921_s20  ;;  %v4492_v28 = vrot.slane %v4269_v47, %v9812_v33  ;;  %v4426_v5 = vcombine.high %v4416_v24, %v4424_v2 }
 0x345   : > { %v9370_v11 = vrot.slane %v4425_v10, %v9813_v51  ;;  %v3301_v42 = vsel %vm632_vm1, %v3299_v7, %v3194_v19  ;;  %v3294_v22 = vsel %vm632_vm1, %v3292_v17, %v3179_v13  ;;  %v6817_v45 = vcombine.high %v9359_v44, %v9359_v44  ;;  %v9900_v10 = vld [vmem:[#allocation30_spill] sm:$0xff]  ;;  %v9903_v7 = vld [vmem:[#allocation5_spill] sm:$0xff] }
 0x346   : > { %v3224_v40 = vpop.permute.xlu1 %3223  ;;  %v3209_v26 = vpop.permute.xlu0 %3208  ;;  %v4494_v54 = vcombine.high %v4484_v56, %v4492_v28  ;;  %v4493_v1 = vcombine.low %v4484_v56, %v4492_v28  ;;  %v9367_v53 = vrot.slane %v4426_v5, %v9813_v51  ;;  %v3313_v6 = vsel %vm628_vm0, %v9898_v62, %v9149_v43 }
 0x347   : > { %v6843_v63 = vcombine.high %v9370_v11, %v9370_v11  ;;  %v5559_v60 = vshrl.u32 %v9903_v7, 16  ;;  %v4674_v17 = vsel %vm628_vm0, %v9904_v29, %v9232_v18 }
 0x348   : > { %5281 = vrot.lane.b32.xlu1 %v6862_v20, %s6920_s19  ;;  %5266 = vrot.lane.b32.xlu0 %v6860_v32, %s6920_s19  ;;  %v6815_v32 = vcombine.high %v9362_v31, %v9362_v31  ;;  %v9387_v24 = vrot.slane %v4494_v54, %v9813_v51  ;;  %v9390_v2 = vrot.slane %v4493_v1, %v9813_v51  ;;  %v9901_v1 = vld [vmem:[#allocation32_spill] sm:$0xff] }
 0x349   : > { %v6845_v13 = vcombine.high %v9367_v53, %v9367_v53  ;;  %v5553_v27 = vshrl.u32 %v9901_v1, 16 }
 0x34a   : > { %v4569_v4 = vpop.permute.xlu1 %4568  ;;  %v4554_v14 = vpop.permute.xlu0 %4553 }
 0x34c   : > { %5311 = vrot.lane.b32.xlu1 %v6866_v55, %s6920_s19  ;;  %5296 = vrot.lane.b32.xlu0 %v6864_v57, %s6920_s19  ;;  %v9899_v55 = vld [vmem:[#allocation20_spill] sm:$0xff]  ;;  %v3315_v57 = vsel %vm632_vm1, %v3313_v6, %v3224_v40  ;;  %v6847_v40 = vcombine.high %v9390_v2, %v9390_v2 }
 0x34d   : > { %v3306_v8 = vsel %vm628_vm0, %v9899_v55, %v9151_v50  ;;  %v6849_v50 = vcombine.high %v9387_v24, %v9387_v24  ;;  %v9908_v6 = vld [vmem:[#allocation8_spill] sm:$0xff] }
 0x34e   : > { %v9350_v59 = vpop.permute.xlu1 %4598  ;;  %v9352_v16 = vpop.permute.xlu0 %4583  ;;  %v3308_v56 = vsel %vm632_vm1, %v3306_v8, %v3209_v26  ;;  %v9902_v26 = vld [vmem:[#allocation7_spill] sm:$0xff]  ;;  %v5570_v55 = vshrl.u32 %v9908_v6, 16 }
 0x34f   : > { %v5558_v12 = vshrl.u32 %v9902_v26, 16 }
 0x350   : > { %3253 = vrot.lane.b32.xlu1 %v6813_v41, %s6919_s18  ;;  %3238 = vrot.lane.b32.xlu0 %v6811_v61, %s6919_s18  ;;  %v5552_v41 = vshrl.u32 %v9900_v10, 16 }
 0x352   : > { %v3199_v46 = vpop.permute.xlu1 %3198  ;;  %v3184_v20 = vpop.permute.xlu0 %3183  ;;  %v5554_v18 = vpack.i.b16 %v5553_v27, %v5552_v41 }
 0x353   : > { %v3303_v25 = vsel %vm635_vm2, %v3301_v42, %v3199_v46  ;;  %v3296_v47 = vsel %vm635_vm2, %v3294_v22, %v3184_v20  ;;  %v9905_v42 = vld [vmem:[#allocation22_spill] sm:$0xff]  ;;  %v4676_v46 = vsel %vm632_vm1, %v4674_v17, %v4569_v4  ;;  %v6816_v17 = vcombine.high %v9218_v48, %v9218_v48 }
 0x354   : > { %v6576_v19 = vcombine.low %v3296_v47, %v3303_v25  ;;  %3283 = vrot.lane.b32.xlu1 %v6817_v45, %s6919_s18  ;;  %3268 = vrot.lane.b32.xlu0 %v6815_v32, %s6919_s18  ;;  %v4667_v22 = vsel %vm628_vm0, %v9905_v42, %v9234_v38  ;;  %v9906_v25 = vld [vmem:[#allocation29_spill] sm:$0xff]  ;;  %v9909_v38 = vld [vmem:[#allocation6_spill] sm:$0xff]  ;;  %v5551_v42 = vpack.i.b16 %v9901_v1, %v9900_v10 }
 0x355   : > { %v4669_v20 = vsel %vm632_vm1, %v4667_v22, %v4554_v14  ;;  %v5564_v47 = vshrl.u32 %v9906_v25, 16  ;;  %v5571_v4 = vshrl.u32 %v9909_v38, 16  ;;  %v5560_v14 = vpack.i.b16 %v5559_v60, %v5558_v12 }
 0x356   : > { %3370 = vst [vmem:[#allocation2 + $0x40] sm:$0x33] %v6576_v19  ;;  %v3229_v28 = vpop.permute.xlu1 %3228  ;;  %v3214_v5 = vpop.permute.xlu0 %3213  ;;  %v5750_v12 = vrot.slane %v5554_v18, %v9812_v33  ;;  %v6846_v22 = vcombine.high %v9253_v49, %v9253_v49  ;;  %v5557_v48 = vpack.i.b16 %v9903_v7, %v9902_v26  ;;  %v6850_v26 = vcombine.high %v9283_v58, %v9283_v58 }
 0x357   : > { %v3317_v61 = vsel %vm635_vm2, %v3315_v57, %v3229_v28  ;;  %v3310_v54 = vsel %vm635_vm2, %v3308_v56, %v3214_v5  ;;  %v9910_v57 = vld [vmem:[#allocation24_spill] sm:$0xff]  ;;  %v9911_v28 = vld [vmem:[#allocation25_spill] sm:$0xff]  ;;  %v5758_v60 = vrot.slane %v5560_v14, %v9812_v33  ;;  %v6848_v7 = vcombine.high %v9286_v39, %v9286_v39 }
 0x358   : > { %v6577_v43 = vcombine.low %v3310_v54, %v3317_v61  ;;  %4628 = vrot.lane.b32.xlu1 %v6845_v13, %s6919_s18  ;;  %4613 = vrot.lane.b32.xlu0 %v6843_v63, %s6919_s18  ;;  %v9907_v63 = vld [vmem:[#allocation31_spill] sm:$0xff]  ;;  %v4688_v56 = vsel %vm628_vm0, %v9910_v57, %v9244_v23  ;;  %v4681_v5 = vsel %vm628_vm0, %v9911_v28, %v9246_v34 }
 0x359   : > { %v5565_v62 = vshrl.u32 %v9907_v63, 16  ;;  %v4690_v41 = vsel %vm632_vm1, %v4688_v56, %v9350_v59  ;;  %v4683_v61 = vsel %vm632_vm1, %v4681_v5, %v9352_v16  ;;  %v5572_v16 = vpack.i.b16 %v5571_v4, %v5570_v55 }
 0x35a   : > { %3371 = vst [vmem:[#allocation2 + $0x48] sm:$0x33] %v6577_v43  ;;  %v4574_v45 = vpop.permute.xlu1 %4573  ;;  %v4559_v32 = vpop.permute.xlu0 %4558  ;;  %v6814_v43 = vcombine.high %v9183_v0, %v9183_v0  ;;  %v5759_v10 = vcombine.low %v5750_v12, %v5758_v60  ;;  %v5760_v1 = vcombine.high %v5750_v12, %v5758_v60  ;;  %v5569_v18 = vpack.i.b16 %v9909_v38, %v9908_v6 }
 0x35b   : > { %v4678_v19 = vsel %vm635_vm2, %v4676_v46, %v4574_v45  ;;  %v4671_v13 = vsel %vm635_vm2, %v4669_v20, %v4559_v32  ;;  %v5566_v59 = vpack.i.b16 %v5565_v62, %v5564_v47  ;;  %v6844_v46 = vcombine.high %v9256_v35, %v9256_v35 }
 0x35c   : > { %v6636_v8 = vcombine.low %v4671_v13, %v4678_v19  ;;  %4658 = vrot.lane.b32.xlu1 %v6849_v50, %s6919_s18  ;;  %4643 = vrot.lane.b32.xlu0 %v6847_v40, %s6919_s18  ;;  %v6812_v50 = vcombine.high %v9196_v52, %v9196_v52  ;;  %v6818_v52 = vcombine.high %v9201_v3, %v9201_v3 }
 0x35d   : > { %v5818_v20 = vrot.slane %v5566_v59, %v9812_v33  ;;  %v5826_v3 = vrot.slane %v5572_v16, %v9812_v33  ;;  %v6058_v45 = vld [vmem:[#allocation2 + $0x40] sm:$0xff]  ;;  %v5563_v35 = vpack.i.b16 %v9907_v63, %v9906_v25  ;;  %v5716_v62 = vrot.slane %v5551_v42, %v9812_v33 }
 0x35e   : > { %4745 = vst [vmem:[#allocation2 + $0x60] sm:$0x33] %v6636_v8  ;;  %v4604_v54 = vpop.permute.xlu1 %4603  ;;  %v4589_v27 = vpop.permute.xlu0 %4588  ;;  %v5724_v4 = vrot.slane %v5557_v48, %v9812_v33  ;;  %v9491_v58 = vrot.slane %v5760_v1, %v9813_v51  ;;  %v9494_v39 = vrot.slane %v5759_v10, %v9813_v51  ;;  %v5792_v38 = vrot.slane %v5569_v18, %v9812_v33 }
 0x35f   : > { %v4692_v23 = vsel %vm635_vm2, %v4690_v41, %v4604_v54  ;;  %v4685_v40 = vsel %vm635_vm2, %v4683_v61, %v4589_v27  ;;  %v5827_v55 = vcombine.low %v5818_v20, %v5826_v3  ;;  %v5828_v8 = vcombine.high %v5818_v20, %v5826_v3 }
 0x360   : > { %v6637_v34 = vcombine.low %v4685_v40, %v4692_v23  ;;  %3258 = vrot.lane.b32.xlu1 %v6814_v43, %s6920_s19  ;;  %3243 = vrot.lane.b32.xlu0 %v6812_v50, %s6920_s19  ;;  %v5784_v6 = vrot.slane %v5563_v35, %v9812_v33  ;;  %v5725_v5 = vcombine.low %v5716_v62, %v5724_v4  ;;  %v9914_v35 = vld [vmem:[#allocation35_spill] sm:$0xff] }
 0x361   : > { %v6059_v25 = vld [vmem:[#allocation2 + $0x48] sm:$0xff]  ;;  %v5726_v41 = vcombine.high %v5716_v62, %v5724_v4  ;;  %v6691_v27 = vcombine.low %v9491_v58, %v9491_v58  ;;  %v6688_v43 = vcombine.low %v9494_v39, %v9494_v39  ;;  %v9505_v50 = vrot.slane %v5828_v8, %v9813_v51 }
 0x362   : > { %4746 = vst [vmem:[#allocation2 + $0x68] sm:$0x33] %v6637_v34  ;;  %v9454_v0 = vpop.permute.xlu1 %5863  ;;  %v9456_v29 = vpop.permute.xlu0 %5848  ;;  %v9508_v23 = vrot.slane %v5827_v55, %v9813_v51  ;;  %v5794_v33 = vcombine.high %v5784_v6, %v5792_v38  ;;  %v5793_v34 = vcombine.low %v5784_v6, %v5792_v38 }
 0x363   : > { %v9513_v40 = vrot.slane %v5726_v41, %v9813_v51  ;;  %v6697_v12 = vcombine.low %v9505_v50, %v9505_v50  ;;  %v9919_v41 = vld [vmem:[#allocation13_spill] sm:$0xff] }
 0x364   : > { %3288 = vrot.lane.b32.xlu1 %v6818_v52, %s6920_s19  ;;  %3273 = vrot.lane.b32.xlu0 %v6816_v17, %s6920_s19  ;;  %v6694_v60 = vcombine.low %v9508_v23, %v9508_v23  ;;  %v9520_v52 = vrot.slane %v5725_v5, %v9813_v51  ;;  %v9912_v17 = vld [vmem:[#allocation33_spill] sm:$0xff]  ;;  %v9533_v3 = vrot.slane %v5794_v33, %v9813_v51 }
 0x365   : > { %v6062_v32 = vld [vmem:[#allocation2 + $0x60] sm:$0xff]  ;;  %v5974_v42 = vsel %vm628_vm0, %v9912_v17, %v9454_v0  ;;  %v6877_v20 = vcombine.high %v9513_v40, %v9513_v40  ;;  %v9540_v0 = vrot.slane %v5793_v34, %v9813_v51 }
 0x366   : > { %v9474_v47 = vpop.permute.xlu1 %5893  ;;  %v9476_v19 = vpop.permute.xlu0 %5878  ;;  %v6713_v13 = vcombine.high %v6058_v45, %v6062_v32  ;;  %v6712_v49 = vcombine.low %v6058_v45, %v6062_v32  ;;  %v6875_v1 = vcombine.high %v9520_v52, %v9520_v52  ;;  %v6881_v4 = vcombine.high %v9533_v3, %v9533_v3 }
 0x367   : > { %v5988_v62 = vsel %vm628_vm0, %v9914_v35, %v9474_v47  ;;  %v6070_v35 = vld [vmem:[%s9715_s2] sm:$0xff] }
 0x368   : > { %4633 = vrot.lane.b32.xlu1 %v6846_v22, %s6920_s19  ;;  %4618 = vrot.lane.b32.xlu0 %v6844_v46, %s6920_s19  ;;  %v9913_v22 = vld [vmem:[#allocation34_spill] sm:$0xff] }
 0x369   : > { %6207 = vmatprep.subr.bf16.mxu0 %v6713_v13  ;;  %v6063_v63 = vld [vmem:[#allocation2 + $0x68] sm:$0xff]  ;;  %v5967_v46 = vsel %vm628_vm0, %v9913_v22, %v9456_v29 }
 0x36a   : > { %6208 = vmatpush1.bf16.msra.mxu0 %v6712_v49  ;;  %v5869_v14 = vpop.permute.xlu1 %5868  ;;  %v5854_v57 = vpop.permute.xlu0 %5853  ;;  %v6715_v56 = vcombine.high %v6059_v25, %v6063_v63  ;;  %v6714_v28 = vcombine.low %v6059_v25, %v6063_v63  ;;  %v6879_v25 = vcombine.high %v9540_v0, %v9540_v0  ;;  %v9916_v63 = vld [vmem:[#allocation11_spill] sm:$0xff] }
 0x36b   : > { %v5976_v48 = vsel %vm632_vm1, %v5974_v42, %v5869_v14  ;;  %v5969_v45 = vsel %vm632_vm1, %v5967_v46, %v5854_v57  ;;  %v9917_v14 = vld [vmem:[#allocation9_spill] sm:$0xff] }
 0x36c   : > { %4663 = vrot.lane.b32.xlu1 %v6850_v26, %s6920_s19  ;;  %4648 = vrot.lane.b32.xlu0 %v6848_v7, %s6920_s19  ;;  %v9915_v26 = vld [vmem:[#allocation36_spill] sm:$0xff]  ;;  %v2578_v47 = vsel %vm628_vm0, %v9917_v14, %v9916_v63  ;;  %v6056_v46 = vld [vmem:[#allocation2 + $0x30] sm:$0xff] }
 0x36d   : > { %6248 = vmatprep.subr.bf16.mxu1 %v6715_v56  ;;  %v5981_v7 = vsel %vm628_vm0, %v9915_v26, %v9476_v19 }
 0x36e   : > { %6249 = vmatpush1.bf16.msra.mxu1 %v6714_v28  ;;  %v5899_v61 = vpop.permute.xlu1 %5898  ;;  %v5884_v54 = vpop.permute.xlu0 %5883  ;;  %v9918_v28 = vld [vmem:[#allocation37_spill] sm:$0xff] }
 0x36f   : > { %v5990_v51 = vsel %vm632_vm1, %v5988_v62, %v5899_v61  ;;  %v5983_v18 = vsel %vm632_vm1, %v5981_v7, %v5884_v54  ;;  %v2580_v61 = vsel %vm632_vm1, %v2578_v47, %v9919_v41  ;;  %v9920_v7 = vmov 0  }
 0x370   : > { %5923 = vrot.lane.b32.xlu1 %v6691_v27, %s6921_s20  ;;  %5908 = vrot.lane.b32.xlu0 %v6688_v43, %s6921_s20  ;;  %v6878_v27 = vcombine.high %v9491_v58, %v9491_v58  ;;  %v6876_v43 = vcombine.high %v9494_v39, %v9494_v39  ;;  %v6880_v39 = vcombine.high %v9508_v23, %v9508_v23  ;;  %v9589_v23 = vld [vmem:[%s9714_s1] sm:$0xf] }
 0x372   : > { %v5859_v59 = vpop.permute.xlu1 %5858  ;;  %v2523_v16 = vpop.permute.xlu0 %2522 }
 0x373   : > { %v5971_v29 = vsel %vm635_vm2, %v5969_v45, %v5859_v59  ;;  %v2585_v6 = vsel %vm628_vm0, %v9918_v28, %v2523_v16  ;;  %v6882_v16 = vcombine.high %v9505_v50, %v9505_v50 }
 0x374   : > { %5953 = vrot.lane.b32.xlu1 %v6697_v12, %s6921_s20  ;;  %5938 = vrot.lane.b32.xlu0 %v6694_v60, %s6921_s20 }
 0x376   : > { %v5889_v32 = vpop.permute.xlu1 %5888  ;;  %v5874_v10 = vpop.permute.xlu0 %5873 }
 0x377   : > { %v5978_v13 = vsel %vm635_vm2, %v5976_v48, %v5874_v10  ;;  %v5985_v57 = vsel %vm635_vm2, %v5983_v18, %v5889_v32  ;;  %v6052_v48 = vld [vmem:[#allocation2 + $0x10] sm:$0xff] }
 0x378   : > { %v6700_v49 = vcombine.low %v5971_v29, %v5978_v13  ;;  %5928 = vrot.lane.b32.xlu1 %v6877_v20, %s6919_s18  ;;  %5913 = vrot.lane.b32.xlu0 %v6875_v1, %s6919_s18  ;;  %v6709_v50 = vcombine.high %v6052_v48, %v6056_v46  ;;  %v6708_v13 = vcombine.low %v6052_v48, %v6056_v46 }
 0x37a   : > { %6045 = vst [vmem:[#allocation2 + $0x80] sm:$0x33] %v6700_v49  ;;  %v2528_v55 = vpop.permute.xlu1 %2527  ;;  %v5904_v8 = vpop.permute.xlu0 %5903 }
 0x37b   : > { %v5992_v19 = vsel %vm635_vm2, %v5990_v51, %v5904_v8  ;;  %v2587_v38 = vsel %vm632_vm1, %v2585_v6, %v2528_v55  ;;  %v6053_v51 = vld [vmem:[#allocation2 + $0x18] sm:$0xff] }
 0x37c   : > { %v6701_v56 = vcombine.low %v5985_v57, %v5992_v19  ;;  %5958 = vrot.lane.b32.xlu1 %v6881_v4, %s6919_s18  ;;  %5943 = vrot.lane.b32.xlu0 %v6879_v25, %s6919_s18 }
 0x37e   : > { %6046 = vst [vmem:[#allocation2 + $0x88] sm:$0x33] %v6701_v56  ;;  %v2533_v5 = vpop.permute.xlu1 %2532  ;;  %v2518_v54 = vpop.permute.xlu0 %2517 }
 0x37f   : > { %v2589_v33 = vsel %vm635_vm2, %v2587_v38, %v2533_v5  ;;  %v2582_v34 = vsel %vm635_vm2, %v2580_v61, %v2518_v54  ;;  %v9921_v54 = vld [vmem:[#allocation42_spill] sm:$0xff] }
 0x380   : > { %v6551_v59 = vcombine.low %v2582_v34, %v2589_v33  ;;  %5933 = vrot.lane.b32.xlu1 %v6878_v27, %s6920_s19  ;;  %5918 = vrot.lane.b32.xlu0 %v6876_v43, %s6920_s19  ;;  %v9922_v43 = vld [vmem:[#allocation43_spill] sm:$0xff] }
 0x381   : > { %v6066_v12 = vld [vmem:[#allocation2 + $0x80] sm:$0x33] }
 0x382   : > { %v2613_v60 = vrot.slane %v6551_v59, 6  ;;  %v4001_v17 = vpop.permute.xlu1 %4000  ;;  %v3986_v58 = vpop.permute.xlu0 %3985  ;;  %v6721_v42 = vcombine.high %v6066_v12, %v6066_v12  ;;  %v6720_v22 = vcombine.low %v6066_v12, %v6066_v12 }
 0x383   : > { %v4079_v27 = vsel %vm628_vm0, %v9921_v54, %v4001_v17  ;;  %v4072_v33 = vsel %vm628_vm0, %v9922_v43, %v3986_v58 }
 0x384   : > { %2621 = vst [vmem:[#allocation2 + $0x38] sm:$0xcc] %v2613_v60  ;;  %5963 = vrot.lane.b32.xlu1 %v6882_v16, %s6920_s19  ;;  %5948 = vrot.lane.b32.xlu0 %v6880_v39, %s6920_s19  ;;  %v6182_v20 = vsel %vm6180_vm9, %v6720_v22, 0  ;;  %v9923_v22 = vld [vmem:[#allocation44_spill] sm:$0xff] }
 0x385   : > { %6728 = vmatprep.subr.msk.bf16.mxu0 %vm6180_vm9, %v6721_v42  ;;  %v6067_v45 = vld [vmem:[#allocation2 + $0x88] sm:$0x33] }
 0x386   : > { %6210 = vmatpush1.bf16.msra.mxu0 %v6182_v20  ;;  %v4031_v32 = vpop.permute.xlu1 %4030  ;;  %v4016_v10 = vpop.permute.xlu0 %4015  ;;  %v6723_v1 = vcombine.high %v6067_v45, %v6067_v45  ;;  %v6722_v29 = vcombine.low %v6067_v45, %v6067_v45  ;;  %v9924_v20 = vld [vmem:[#allocation45_spill] sm:$0xff] }
 0x387   : > { %6287 = vmatprep.subr.bf16.mxu0 %v6709_v50  ;;  %v4093_v46 = vsel %vm628_vm0, %v9923_v22, %v4031_v32  ;;  %v4086_v17 = vsel %vm628_vm0, %v9924_v20, %v4016_v10 }
 0x388   : > { %6730 = vmatprep.subr.msk.bf16.mxu1 %vm6180_vm9, %v6723_v1  ;;  %v6188_v49 = vsel %vm6180_vm9, %v6722_v29, 0  ;;  %6073 = vperm.xlu0 %6900, %v6070_v35  }
 0x389   : > { %6729 = vmatmul.mubr.msk.bf16.vlgmr.msra.gmra.mrb[0].mxu0 %vm6176_vm10, %v9589_v23  ;;  %6251 = vmatpush1.bf16.msra.mxu1 %v6188_v49 }
 0x38a   : > { %6288 = vmatpush1.bf16.msra.mxu0 %v6708_v13  ;;  %v5272_v62 = vpop.permute.xlu1 %5271  ;;  %v5257_v26 = vpop.permute.xlu0 %5256  ;;  %6319 = vmatprep.mubr.bf16.mxu0 %v9920_v7 }
 0x38b   : > { %v6057_v18 = vld [vmem:[#allocation2 + $0x38] sm:$0xff]  ;;  %v5350_v10 = vsel %vm628_vm0, %v9128_v21, %v5272_v62 }
 0x38c   : > { %v6710_v55 = vcombine.low %v6053_v51, %v6057_v18  ;;  %v6711_v8 = vcombine.high %v6053_v51, %v6057_v18  ;;  %6731 = vmatmul.mubr.msk.bf16.vlgmr.msra.gmra.mrb[0].mxu1 %vm6176_vm10, %v9589_v23 }
 0x38d   : > { %6360 = vmatprep.mubr.bf16.mxu1 %v9920_v7 }
 0x38e   : > { %v5302_v4 = vpop.permute.xlu1 %5301  ;;  %6328 = vmatprep.subr.bf16.mxu1 %v6711_v8  ;;  %v5287_v25 = vpop.permute.xlu0 %5286 }
 0x38f   : > { %6329 = vmatpush1.bf16.msra.mxu1 %v6710_v55  ;;  %v5343_v55 = vsel %vm628_vm0, %v9131_v9, %v5257_v26  ;;  %v5364_v43 = vsel %vm628_vm0, %v9139_v37, %v5302_v4  ;;  %v5357_v21 = vsel %vm628_vm0, %v9158_v15, %v5287_v25 }
 0x392   : > { %v4006_v63 = vpop.permute.xlu1 %4005  ;;  %v3991_v14 = vpop.permute.xlu0 %3990 }
 0x393   : > { %v4081_v34 = vsel %vm632_vm1, %v4079_v27, %v4006_v63  ;;  %v4074_v59 = vsel %vm632_vm1, %v4072_v33, %v3991_v14 }
 0x396   : > { %v4036_v47 = vpop.permute.xlu1 %4035  ;;  %v4021_v57 = vpop.permute.xlu0 %4020 }
 0x397   : > { %v4095_v48 = vsel %vm632_vm1, %v4093_v46, %v4036_v47  ;;  %v4088_v58 = vsel %vm632_vm1, %v4086_v17, %v4021_v57 }
 0x39a   : > { %v5277_v19 = vpop.permute.xlu1 %5276  ;;  %v5262_v56 = vpop.permute.xlu0 %5261 }
 0x39b   : > { %v5352_v8 = vsel %vm632_vm1, %v5350_v10, %v5277_v19  ;;  %v5345_v63 = vsel %vm632_vm1, %v5343_v55, %v5262_v56 }
 0x39e   : > { %v5307_v28 = vpop.permute.xlu1 %5306  ;;  %v5292_v6 = vpop.permute.xlu0 %5291 }
 0x39f   : > { %v5366_v62 = vsel %vm632_vm1, %v5364_v43, %v5307_v28  ;;  %v5359_v9 = vsel %vm632_vm1, %v5357_v21, %v5292_v6 }
 0x3a2   : > { %v3249_v38 = vpop.permute.xlu1 %3248  ;;  %v3234_v5 = vpop.permute.xlu0 %3233 }
 0x3a3   : > { %v3327_v6 = vsel %vm628_vm0, %v9341_v36, %v3249_v38 }
 0x3a6   : > { %v9602_v41 = vpop.permute.xlu1 %3278  ;;  %v9604_v61 = vpop.permute.xlu0 %3263 }
 0x3a7   : > { %v3334_v36 = vsel %vm628_vm0, %v9362_v31, %v9604_v61 }
 0x3aa   : > { %v4011_v16 = vpop.permute.xlu1 %4010  ;;  %v3996_v12 = vpop.permute.xlu0 %3995 }
 0x3ab   : > { %v4083_v60 = vsel %vm635_vm2, %v4081_v34, %v4011_v16  ;;  %v4076_v39 = vsel %vm635_vm2, %v4074_v59, %v3996_v12 }
 0x3ac   : > { %v6606_v42 = vcombine.low %v4076_v39, %v4083_v60 }
 0x3ae   : > { %v4120_v50 = vrot.slane %v6606_v42, 6  ;;  %v4041_v45 = vpop.permute.xlu1 %4040  ;;  %v4026_v1 = vpop.permute.xlu0 %4025  ;;  %v3320_v42 = vsel %vm628_vm0, %v9344_v30, %v3234_v5 }
 0x3af   : > { %v4097_v29 = vsel %vm635_vm2, %v4095_v48, %v4041_v45  ;;  %v4090_v13 = vsel %vm635_vm2, %v4088_v58, %v4026_v1  ;;  %v3341_v45 = vsel %vm628_vm0, %v9359_v44, %v9602_v41 }
 0x3b0   : > { %4128 = vst [vmem:[#allocation2 + $0x50] sm:$0xcc] %v4120_v50  ;;  %v6607_v49 = vcombine.low %v4090_v13, %v4097_v29 }
 0x3b2   : > { %v4121_v35 = vrot.slane %v6607_v49, 6  ;;  %v4624_v7 = vpop.permute.xlu1 %4623  ;;  %v4609_v51 = vpop.permute.xlu0 %4608 }
 0x3b3   : > { %v4695_v44 = vsel %vm628_vm0, %v9370_v11, %v4609_v51 }
 0x3b4   : > { %4129 = vst [vmem:[#allocation2 + $0x58] sm:$0xcc] %v4121_v35  ;;  %v4702_v35 = vsel %vm628_vm0, %v9367_v53, %v4624_v7 }
 0x3b6   : > { %v4654_v32 = vpop.permute.xlu1 %4653  ;;  %v4639_v18 = vpop.permute.xlu0 %4638 }
 0x3b7   : > { %v4709_v53 = vsel %vm628_vm0, %v9390_v2, %v4639_v18 }
 0x3ba   : > { %v5282_v14 = vpop.permute.xlu1 %5281  ;;  %v5267_v47 = vpop.permute.xlu0 %5266 }
 0x3bb   : > { %v5354_v57 = vsel %vm635_vm2, %v5352_v8, %v5282_v14  ;;  %v5347_v54 = vsel %vm635_vm2, %v5345_v63, %v5267_v47  ;;  %v4716_v14 = vsel %vm628_vm0, %v9387_v24, %v4654_v32 }
 0x3bc   : > { %v6670_v27 = vcombine.low %v5347_v54, %v5354_v57 }
 0x3be   : > { %v5391_v26 = vrot.slane %v6670_v27, 6  ;;  %v5312_v19 = vpop.permute.xlu1 %5311  ;;  %v5297_v56 = vpop.permute.xlu0 %5296 }
 0x3bf   : > { %v5368_v33 = vsel %vm635_vm2, %v5366_v62, %v5312_v19  ;;  %v5361_v34 = vsel %vm635_vm2, %v5359_v9, %v5297_v56 }
 0x3c0   : > { %5399 = vst [vmem:[#allocation2 + $0x70] sm:$0xcc] %v5391_v26  ;;  %v6671_v59 = vcombine.low %v5361_v34, %v5368_v33 }
 0x3c2   : > { %v5392_v16 = vrot.slane %v6671_v59, 6  ;;  %v3254_v12 = vpop.permute.xlu1 %3253  ;;  %v3239_v60 = vpop.permute.xlu0 %3238 }
 0x3c3   : > { %v3329_v22 = vsel %vm632_vm1, %v3327_v6, %v3254_v12  ;;  %v3322_v46 = vsel %vm632_vm1, %v3320_v42, %v3239_v60 }
 0x3c4   : > { %5400 = vst [vmem:[#allocation2 + $0x78] sm:$0xcc] %v5392_v16 }
 0x3c6   : > { %v3284_v37 = vpop.permute.xlu1 %3283  ;;  %v3269_v4 = vpop.permute.xlu0 %3268 }
 0x3c7   : > { %v3343_v30 = vsel %vm632_vm1, %v3341_v45, %v3284_v37  ;;  %v3336_v38 = vsel %vm632_vm1, %v3334_v36, %v3269_v4 }
 0x3ca   : > { %v4629_v15 = vpop.permute.xlu1 %4628  ;;  %v4614_v25 = vpop.permute.xlu0 %4613 }
 0x3cb   : > { %v4704_v31 = vsel %vm632_vm1, %v4702_v35, %v4629_v15  ;;  %v4697_v41 = vsel %vm632_vm1, %v4695_v44, %v4614_v25 }
 0x3ce   : > { %v4659_v28 = vpop.permute.xlu1 %4658  ;;  %v4644_v39 = vpop.permute.xlu0 %4643 }
 0x3cf   : > { %v4718_v11 = vsel %vm632_vm1, %v4716_v14, %v4659_v28  ;;  %v4711_v7 = vsel %vm632_vm1, %v4709_v53, %v4644_v39 }
 0x3d2   : > { %v3259_v20 = vpop.permute.xlu1 %3258  ;;  %v3244_v17 = vpop.permute.xlu0 %3243 }
 0x3d3   : > { %v3331_v48 = vsel %vm635_vm2, %v3329_v22, %v3259_v20  ;;  %v3324_v58 = vsel %vm635_vm2, %v3322_v46, %v3244_v17 }
 0x3d4   : > { %v6578_v50 = vcombine.low %v3324_v58, %v3331_v48 }
 0x3d6   : > { %3372 = vst [vmem:[#allocation2 + $0x50] sm:$0x33] %v6578_v50  ;;  %v3289_v5 = vpop.permute.xlu1 %3288  ;;  %v3274_v1 = vpop.permute.xlu0 %3273 }
 0x3d7   : > { %v3345_v29 = vsel %vm635_vm2, %v3343_v30, %v3289_v5  ;;  %v3338_v13 = vsel %vm635_vm2, %v3336_v38, %v3274_v1 }
 0x3d8   : > { %v6579_v49 = vcombine.low %v3338_v13, %v3345_v29 }
 0x3da   : > { %3373 = vst [vmem:[#allocation2 + $0x58] sm:$0x33] %v6579_v49  ;;  %v4634_v61 = vpop.permute.xlu1 %4633  ;;  %v4619_v10 = vpop.permute.xlu0 %4618 }
 0x3db   : > { %v4706_v55 = vsel %vm635_vm2, %v4704_v31, %v4634_v61  ;;  %v4699_v8 = vsel %vm635_vm2, %v4697_v41, %v4619_v10 }
 0x3dc   : > { %v6638_v63 = vcombine.low %v4699_v8, %v4706_v55 }
 0x3dd   : > { %v6060_v62 = vld [vmem:[#allocation2 + $0x50] sm:$0xff] }
 0x3de   : > { %4747 = vst [vmem:[#allocation2 + $0x70] sm:$0x33] %v6638_v63  ;;  %v4664_v51 = vpop.permute.xlu1 %4663  ;;  %v4649_v47 = vpop.permute.xlu0 %4648 }
 0x3df   : > { %v4720_v57 = vsel %vm635_vm2, %v4718_v11, %v4664_v51  ;;  %v4713_v54 = vsel %vm635_vm2, %v4711_v7, %v4649_v47 }
 0x3e0   : > { %v6639_v27 = vcombine.low %v4713_v54, %v4720_v57 }
 0x3e1   : > { %v6061_v26 = vld [vmem:[#allocation2 + $0x58] sm:$0xff] }
 0x3e2   : > { %4748 = vst [vmem:[#allocation2 + $0x78] sm:$0x33] %v6639_v27  ;;  %v5924_v43 = vpop.permute.xlu1 %5923  ;;  %v5909_v21 = vpop.permute.xlu0 %5908 }
 0x3e3   : > { %v6002_v60 = vsel %vm628_vm0, %v9513_v40, %v5924_v43  ;;  %v5995_v37 = vsel %vm628_vm0, %v9520_v52, %v5909_v21 }
 0x3e5   : > { %v6064_v24 = vld [vmem:[#allocation2 + $0x70] sm:$0xff] }
 0x3e6   : > { %v5954_v32 = vpop.permute.xlu1 %5953  ;;  %v5939_v9 = vpop.permute.xlu0 %5938  ;;  %v6716_v2 = vcombine.low %v6060_v62, %v6064_v24  ;;  %v6717_v18 = vcombine.high %v6060_v62, %v6064_v24 }
 0x3e7   : > { %v6016_v22 = vsel %vm628_vm0, %v9533_v3, %v5954_v32  ;;  %v6009_v40 = vsel %vm628_vm0, %v9540_v0, %v5939_v9 }
 0x3e8   : > { %6289 = vmatprep.subr.bf16.mxu0 %v6717_v18 }
 0x3e9   : > { %6290 = vmatpush1.bf16.msra.mxu0 %v6716_v2  ;;  %v6065_v19 = vld [vmem:[#allocation2 + $0x78] sm:$0xff] }
 0x3ea   : > { %v5929_v56 = vpop.permute.xlu1 %5928  ;;  %v5914_v33 = vpop.permute.xlu0 %5913  ;;  %v6718_v34 = vcombine.low %v6061_v26, %v6065_v19  ;;  %v6719_v59 = vcombine.high %v6061_v26, %v6065_v19 }
 0x3eb   : > { %v6004_v4 = vsel %vm632_vm1, %v6002_v60, %v5929_v56  ;;  %v5997_v15 = vsel %vm632_vm1, %v5995_v37, %v5914_v33 }
 0x3ec   : > { %6330 = vmatprep.subr.bf16.mxu1 %v6719_v59 }
 0x3ed   : > { %6331 = vmatpush1.bf16.msra.mxu1 %v6718_v34 }
 0x3ee   : > { %v5959_v16 = vpop.permute.xlu1 %5958  ;;  %v5944_v12 = vpop.permute.xlu0 %5943 }
 0x3ef   : > { %v6018_v46 = vsel %vm632_vm1, %v6016_v22, %v5959_v16  ;;  %v6011_v52 = vsel %vm632_vm1, %v6009_v40, %v5944_v12 }
 0x3f2   : > { %v5934_v25 = vpop.permute.xlu1 %5933  ;;  %v5919_v28 = vpop.permute.xlu0 %5918 }
 0x3f3   : > { %v6006_v39 = vsel %vm635_vm2, %v6004_v4, %v5934_v25  ;;  %v5999_v6 = vsel %vm635_vm2, %v5997_v15, %v5919_v28 }
 0x3f4   : > { %v6702_v42 = vcombine.low %v5999_v6, %v6006_v39 }
 0x3f6   : > { %6047 = vst [vmem:[#allocation2 + $0x90] sm:$0x33] %v6702_v42  ;;  %v5964_v20 = vpop.permute.xlu1 %5963  ;;  %v5949_v17 = vpop.permute.xlu0 %5948 }
 0x3f7   : > { %v6020_v48 = vsel %vm635_vm2, %v6018_v46, %v5964_v20  ;;  %v6013_v58 = vsel %vm635_vm2, %v6011_v52, %v5949_v17 }
 0x3f8   : > { %v6703_v50 = vcombine.low %v6013_v58, %v6020_v48 }
 0x3fa   : > { %6048 = vst [vmem:[#allocation2 + $0x98] sm:$0x33] %v6703_v50 }
 0x3fd   : > { %v6068_v45 = vld [vmem:[#allocation2 + $0x90] sm:$0x33] }
 0x3fe   : > { %v6725_v36 = vcombine.high %v6068_v45, %v6068_v45  ;;  %v6724_v3 = vcombine.low %v6068_v45, %v6068_v45 }
 0x400   : > { %6732 = vmatprep.subr.msk.bf16.mxu0 %vm6180_vm9, %v6725_v36  ;;  %v6194_v0 = vsel %vm6180_vm9, %v6724_v3, 0 }
 0x401   : > { %6292 = vmatpush1.bf16.msra.mxu0 %v6194_v0  ;;  %v6069_v30 = vld [vmem:[#allocation2 + $0x98] sm:$0x33] }
 0x402   : > { %v6727_v38 = vcombine.high %v6069_v30, %v6069_v30  ;;  %v6726_v5 = vcombine.low %v6069_v30, %v6069_v30 }
 0x404   : > { %6734 = vmatprep.subr.msk.bf16.mxu1 %vm6180_vm9, %v6727_v38  ;;  %6733 = vmatmul.mubr.msk.bf16.vlgmr.msra.gmra.mrb[4].mxu0 %vm6176_vm10, %v9589_v23  ;;  %v6200_v1 = vsel %vm6180_vm9, %v6726_v5, 0 }
 0x405   : > { %6333 = vmatpush1.bf16.msra.mxu1 %v6200_v1 }
 0x407   : > { %v6074_v29 = vpop.permute.xlu0 %6073 }
 0x408   : > { %6735 = vmatmul.mubr.msk.bf16.vlgmr.msra.gmra.mrb[4].mxu1 %vm6176_vm10, %v9589_v23 }
 0x45c   : > { %v6239_v13 = vpop.f32.mrb[0].mxu0 }
 0x45d   : > { %v6241_v49 = vpop.f32.mrb[1].mxu0  ;;  %v6240_v35 = vadd.f32 %v6239_v13, %v6074_v29 }
 0x45e   : > { %v6243_v44 = vpop.f32.mrb[2].mxu0  ;;  %v6242_v31 = vadd.f32 %v6241_v49, %v6074_v29 }
 0x45f   : > { %v6280_v41 = vpop.f32.mrb[0].mxu1  ;;  %v6244_v61 = vpop.f32.mrb[3].mxu0  ;;  %6369 = vst [vmem:[%s9700_s30] sm:$0xff] %v6240_v35 }
 0x460   : > { %v6282_v23 = vpop.f32.mrb[1].mxu1  ;;  %v6281_v10 = vadd.f32 %v6280_v41, %v6074_v29  ;;  %6370 = vst [vmem:[%s9700_s30 + $0x8] sm:$0xff] %v6242_v31 }
 0x461   : > { %v6284_v55 = vpop.f32.mrb[2].mxu1  ;;  %v6283_v8 = vadd.f32 %v6282_v23, %v6074_v29 }
 0x462   : > { %v6285_v63 = vpop.f32.mrb[3].mxu1  ;;  %6371 = vst [vmem:[%s9700_s30 + $0x10] sm:$0xff] %v6281_v10 }
 0x463   : > { %6372 = vst [vmem:[%s9700_s30 + $0x18] sm:$0xff] %v6283_v8 }
 0x4d7   : > { %v6321_v14 = vpop.f32.mrb[4].mxu0 }
 0x4d8   : > { %v6322_v53 = vadd.f32 %v6321_v14, %v6074_v29  ;;  %v6323_v11 = vpop.f32.mrb[5].mxu0 }
 0x4d9   : > { %v6324_v7 = vadd.f32 %v6323_v11, %v6074_v29  ;;  %v6325_v51 = vpop.f32.mrb[6].mxu0 }
 0x4da   : > { %6373 = vst [vmem:[%s9700_s30 + $0x20] sm:$0xff] %v6322_v53  ;;  %v6326_v47 = vpop.f32.mrb[7].mxu0 }
 0x4db   : > { %6374 = vst [vmem:[%s9700_s30 + $0x28] sm:$0xff] %v6324_v7  ;;  %v6362_v57 = vpop.f32.mrb[4].mxu1 }
 0x4dc   : > { %v6363_v54 = vadd.f32 %v6362_v57, %v6074_v29  ;;  %v6364_v27 = vpop.f32.mrb[5].mxu1 }
 0x4dd   : > { %v6365_v43 = vadd.f32 %v6364_v27, %v6074_v29  ;;  %v6366_v21 = vpop.f32.mrb[6].mxu1 }
 0x4de   : > { %6375 = vst [vmem:[%s9700_s30 + $0x30] sm:$0xff] %v6363_v54  ;;  %v6367_v62 = vpop.f32.mrb[7].mxu1 }
 0x4df   : > { %6376 = vst [vmem:[%s9700_s30 + $0x38] sm:$0xff] %v6365_v43 }
 0x4e0 PF: > { %s13_s12 = sadd.s32 1, %s6915_s12  }
 0x4e1   : > { %p10_p4 = scmp.ge.s32.totalorder %s13_s12, 4  }
 0x4e3   :  { %12 = sbr.rel (!%p10_p4) target bundleno = 1 (0x1), region = 62 }

</bundles_post_ra>
